<compile_context>
chip_gen: v5e
topology: v5e:2x2
jax: 0.10.0
libtpu: 0.0.40
codegen_flags: <defaults>
</compile_context>

<pallas_src>
import math

import jax
import jax.numpy as jnp
from jax import lax
from jax.experimental import pallas as pl
from jax.experimental.pallas import tpu as pltpu


def _layernorm(v, gamma, beta, eps=1e-5):
    """torch.nn.LayerNorm over last dim (biased variance, eps inside sqrt)."""
    mu = jnp.mean(v, axis=-1, keepdims=True)
    d = v - mu
    var = jnp.mean(d * d, axis=-1, keepdims=True)
    return d * lax.rsqrt(var + eps) * gamma + beta


def _make_kernel(num_layer, nhead):
    """Fused forward kernel for a fixed layer count / head count."""

    def kernel(x_ref, w_in_ref, vecs_ref, w_qkv_ref, w_o_ref,
               w_ff1_ref, b_ff1_ref, w_ff2_ref, w_out_ref, b_out_ref, out_ref):
        B, S, IN = x_ref.shape
        H = w_in_ref.shape[1]
        hd = H // nhead
        scale = 1.0 / math.sqrt(hd)
        T = B * S

        # All (1,H)-sized params (biases / LayerNorm) arrive packed in ONE array.
        vecs = vecs_ref[...]                     # [1 + 9*num_layer, H], loaded once
        row = lambda r: vecs[r:r + 1, :]         # static (1, H) slice

        # Block-diagonal head mask, built once from 2-D iota (no division):
        #   head_mask[h, c] = 1.0  iff channel c belongs to head h.
        c_idx = lax.broadcasted_iota(jnp.int32, (nhead, H), 1)
        h_lo = lax.broadcasted_iota(jnp.int32, (nhead, H), 0) * hd
        head_mask = ((c_idx >= h_lo) & (c_idx < h_lo + hd)).astype(jnp.float32)

        # ---- linear1 (the preceding nn.Dropout is identity at inference) ----
        x2 = x_ref[...].reshape(T, IN)
        h = jnp.dot(x2, w_in_ref[...], preferred_element_type=jnp.float32) + row(0)

        # ---- num_layer x TransformerEncoderLayer (post-norm, ReLU FFN) ----
        for l in range(num_layer):
            r0 = 1 + 9 * l
            b_q, b_k, b_v, b_o = row(r0), row(r0 + 1), row(r0 + 2), row(r0 + 3)
            g1, be1 = row(r0 + 4), row(r0 + 5)
            b_f2 = row(r0 + 6)
            g2, be2 = row(r0 + 7), row(r0 + 8)

            # Q/K/V projections: leading-dim indexed weight stack (no lane slicing).
            q = jnp.dot(h, w_qkv_ref[3 * l + 0], preferred_element_type=jnp.float32) + b_q
            k = jnp.dot(h, w_qkv_ref[3 * l + 1], preferred_element_type=jnp.float32) + b_k
            v = jnp.dot(h, w_qkv_ref[3 * l + 2], preferred_element_type=jnp.float32) + b_v

            k3 = k.reshape(B, S, H)
            v3 = v.reshape(B, S, H)

            # Head-batched attention in one pass: fold the per-head channel
            # selection into Q with the block-diagonal mask, then two standard
            # leading-batch einsums + one softmax over all (b, head, q) rows.
            q4 = (q * scale).reshape(B, S, H)[:, :, None, :]            # [B,S,1,H]
            a_heads = (q4 * head_mask[None, None, :, :]).reshape(B, S * nhead, H)

            logits = jnp.einsum('bqd,bkd->bqk', a_heads, k3,
                                preferred_element_type=jnp.float32)     # [B,S*nh,S]
            m = jnp.max(logits, axis=-1, keepdims=True)
            p = jnp.exp(logits - m)
            p = p * pl.reciprocal(jnp.sum(p, axis=-1, keepdims=True), approx=True)

            o_all = jnp.einsum('bqk,bkd->bqd', p, v3,
                               preferred_element_type=jnp.float32)      # [B,S*nh,H]
            # Keep, per channel, only its own head's row, then sum heads away.
            o = jnp.sum(o_all.reshape(B, S, nhead, H) * head_mask[None, None, :, :],
                        axis=2).reshape(T, H)

            # ONE output projection for all heads.
            attn = jnp.dot(o, w_o_ref[l], preferred_element_type=jnp.float32) + b_o
            h = _layernorm(h + attn, g1, be1)                           # norm1(x + sa(x))

            # Feed-forward: bf16 operands (weights stored bf16), f32 accumulation.
            ff = jnp.dot(h.astype(jnp.bfloat16), w_ff1_ref[l],
                         preferred_element_type=jnp.float32) + b_ff1_ref[l]
            ff = jnp.maximum(ff, 0.0)                                   # ReLU (torch default)
            ff = jnp.dot(ff.astype(jnp.bfloat16), w_ff2_ref[l],
                         preferred_element_type=jnp.float32) + b_f2
            h = _layernorm(h + ff, g2, be2)                             # norm2(x + ff(x))

        # ---- linear2: lane-contiguous 2-D store (3-D reshape happens in wrapper) ----
        out_ref[...] = jnp.dot(h, w_out_ref[...],
                               preferred_element_type=jnp.float32) + b_out_ref[...]

    return kernel


def cas_transformer_forward(x, params, *, nhead, state=None):
    """x: [B, S, input_size] f32. Returns (output [B, S, output_size], state)."""
    B, S, _ = x.shape
    H = params['lin1_w'].shape[1]
    OUT = params['lin2_w'].shape[1]
    layers = params['layers']
    L = len(layers)

    # ---- host-side parameter packing: a handful of stacked arrays ----
    rows = [params['lin1_b']]
    for lp in layers:
        rows += [lp['b_qkv'][:H], lp['b_qkv'][H:2 * H], lp['b_qkv'][2 * H:],
                 lp['b_o'], lp['ln1_g'], lp['ln1_b'],
                 lp['b_ff2'], lp['ln2_g'], lp['ln2_b']]
    vecs = jnp.stack(rows).astype(jnp.float32)                            # [1+9L, H]

    w_qkv = jnp.concatenate(
        [jnp.stack([lp['w_qkv'][:, :H], lp['w_qkv'][:, H:2 * H], lp['w_qkv'][:, 2 * H:]])
         for lp in layers], axis=0)                                       # [3L, H, H]
    w_o = jnp.stack([lp['w_o'] for lp in layers])                         # [L, H, H]
    w_ff1 = jnp.stack([lp['w_ff1'] for lp in layers]).astype(jnp.bfloat16)  # [L, H, F]
    b_ff1 = jnp.stack([lp['b_ff1'].reshape(1, -1) for lp in layers])      # [L, 1, F]
    w_ff2 = jnp.stack([lp['w_ff2'] for lp in layers]).astype(jnp.bfloat16)  # [L, F, H]
    w_out = params['lin2_w']
    b_out = params['lin2_b'].reshape(1, -1)

    inputs = (x, params['lin1_w'], vecs, w_qkv, w_o, w_ff1, b_ff1, w_ff2, w_out, b_out)

    out2d = pl.pallas_call(
        _make_kernel(L, nhead),
        out_shape=jax.ShapeDtypeStruct((B * S, OUT), jnp.float32),
        in_specs=[pl.BlockSpec(memory_space=pltpu.MemorySpace.VMEM)
                  for _ in range(len(inputs))],
        out_specs=pl.BlockSpec(memory_space=pltpu.MemorySpace.VMEM),
    )(*inputs)
    return out2d.reshape(B, S, OUT), state


# ----------------------------------------------------------------------------- #
# parameter init (torch-Linear-style) and a pure-JAX reference for verification
# ----------------------------------------------------------------------------- #
def init_params(key, input_size, hidden_size, output_size, num_layer, ffn_size):
    def linear(k, fan_in, fan_out):
        kw, kb = jax.random.split(k)
        bound = 1.0 / math.sqrt(fan_in)
        w = jax.random.uniform(kw, (fan_in, fan_out), jnp.float32, -bound, bound)
        b = jax.random.uniform(kb, (fan_out,), jnp.float32, -bound, bound)
        return w, b

    keys = jax.random.split(key, 2 + num_layer)
    lin1_w, lin1_b = linear(keys[0], input_size, hidden_size)
    lin2_w, lin2_b = linear(keys[1], hidden_size, output_size)
    layers = []
    for l in range(num_layer):
        k = jax.random.split(keys[2 + l], 8)
        w_qkv, b_qkv = linear(k[0], hidden_size, 3 * hidden_size)
        w_o, b_o = linear(k[1], hidden_size, hidden_size)
        w_f1, b_f1 = linear(k[2], hidden_size, ffn_size)
        w_f2, b_f2 = linear(k[3], ffn_size, hidden_size)
        layers.append(dict(
            w_qkv=w_qkv, b_qkv=b_qkv, w_o=w_o, b_o=b_o,
            ln1_g=1.0 + 0.1 * jax.random.normal(k[4], (hidden_size,), jnp.float32),
            ln1_b=0.1 * jax.random.normal(k[5], (hidden_size,), jnp.float32),
            w_ff1=w_f1, b_ff1=b_f1, w_ff2=w_f2, b_ff2=b_f2,
            ln2_g=1.0 + 0.1 * jax.random.normal(k[6], (hidden_size,), jnp.float32),
            ln2_b=0.1 * jax.random.normal(k[7], (hidden_size,), jnp.float32)))
    return dict(lin1_w=lin1_w, lin1_b=lin1_b, layers=layers,
                lin2_w=lin2_w, lin2_b=lin2_b)


def reference(x, params, *, nhead):
    P = jax.lax.Precision.HIGHEST

    def ln(v, g, b, eps=1e-5):
        mu = jnp.mean(v, -1, keepdims=True)
        var = jnp.mean((v - mu) ** 2, -1, keepdims=True)
        return (v - mu) / jnp.sqrt(var + eps) * g + b

    h = jnp.einsum('bsi,ih->bsh', x, params['lin1_w'], precision=P) + params['lin1_b']
    B, S, H = h.shape
    hd = H // nhead
    for lp in params['layers']:
        qkv = jnp.einsum('bsh,hk->bsk', h, lp['w_qkv'], precision=P) + lp['b_qkv']
        q, k, v = qkv[..., :H], qkv[..., H:2 * H], qkv[..., 2 * H:]
        q = q.reshape(B, S, nhead, hd).transpose(0, 2, 1, 3)
        k = k.reshape(B, S, nhead, hd).transpose(0, 2, 1, 3)
        v = v.reshape(B, S, nhead, hd).transpose(0, 2, 1, 3)
        logits = jnp.einsum('bhqd,bhkd->bhqk', q, k, precision=P) / math.sqrt(hd)
        p = jax.nn.softmax(logits, axis=-1)
        attn = jnp.einsum('bhqk,bhkd->bhqd', p, v, precision=P)
        attn = attn.transpose(0, 2, 1, 3).reshape(B, S, H)
        attn = jnp.einsum('bsh,ho->bso', attn, lp['w_o'], precision=P) + lp['b_o']
        h = ln(h + attn, lp['ln1_g'], lp['ln1_b'])
        ff = jax.nn.relu(jnp.einsum('bsh,hf->bsf', h, lp['w_ff1'], precision=P) + lp['b_ff1'])
        ff = jnp.einsum('bsf,fh->bsh', ff, lp['w_ff2'], precision=P) + lp['b_ff2']
        h = ln(h + ff, lp['ln2_g'], lp['ln2_b'])
    return jnp.einsum('bsh,ho->bso', h, params['lin2_w'], precision=P) + params['lin2_b']


if __name__ == "__main__":
    key = jax.random.PRNGKey(0)
    kx, kp = jax.random.split(key)

    # Small shapes consistent with the module's constructor arguments.
    B, S = 2, 8
    INPUT_SIZE, HIDDEN_SIZE, OUTPUT_SIZE = 16, 32, 8
    NUM_LAYER, NHEAD = 2, 8
    FFN_SIZE = 2048  # nn.TransformerEncoderLayer default dim_feedforward

    x = jax.random.normal(kx, (B, S, INPUT_SIZE), jnp.float32)
    params = init_params(kp, INPUT_SIZE, HIDDEN_SIZE, OUTPUT_SIZE, NUM_LAYER, FFN_SIZE)

    out, state = cas_transformer_forward(x, params, nhead=NHEAD, state=None)
    jax.block_until_ready(out)

    ref = reference(x, params, nhead=NHEAD)
    assert out.shape == (B, S, OUTPUT_SIZE)
    assert state is None
    # bf16 FFN weights/operands (f32 accumulation) + approx reciprocal ->
    # slightly looser tolerance than the pure-f32 variant.
    assert jnp.allclose(out, ref, atol=1e-2, rtol=1e-2), "output mismatch vs JAX reference"

    print("KERNEL_OK")
</pallas_src>

<mosaic_0001>
module attributes {stable_mosaic.version = 11 : i64} {
  func.func @kernel(%arg0: memref<2x8x16xf32, #tpu.memory_space<vmem>>, %arg1: memref<16x32xf32, #tpu.memory_space<vmem>>, %arg2: memref<19x32xf32, #tpu.memory_space<vmem>>, %arg3: memref<6x32x32xf32, #tpu.memory_space<vmem>>, %arg4: memref<2x32x32xf32, #tpu.memory_space<vmem>>, %arg5: memref<2x32x2048xbf16, #tpu.memory_space<vmem>>, %arg6: memref<2x1x2048xf32, #tpu.memory_space<vmem>>, %arg7: memref<2x2048x32xbf16, #tpu.memory_space<vmem>>, %arg8: memref<32x8xf32, #tpu.memory_space<vmem>>, %arg9: memref<1x8xf32, #tpu.memory_space<vmem>>, %arg10: memref<16x8xf32, #tpu.memory_space<vmem>>) attributes {dimension_semantics = [], scalar_prefetch = 0 : i64, scratch_operands = 0 : i64, tpu.core_type = #tpu.core_type<tc>} {
    %c0 = arith.constant 0 : index
    %c0_0 = arith.constant 0 : index
    %0 = vector.load %arg2[%c0, %c0_0] : memref<19x32xf32, #tpu.memory_space<vmem>>, vector<19x32xf32>
    %1 = tpu.iota {dimensions = array<i32: 1>} : vector<8x32xi32>
    %2 = tpu.iota {dimensions = array<i32: 0>} : vector<8x32xi32>
    %c4_i32 = arith.constant 4 : i32
    %3 = vector.broadcast %c4_i32 : i32 to vector<8x32xi32>
    %4 = arith.muli %2, %3 : vector<8x32xi32>
    %5 = arith.cmpi sge, %1, %4 : vector<8x32xi32>
    %c4_i32_1 = arith.constant 4 : i32
    %6 = vector.broadcast %c4_i32_1 : i32 to vector<8x32xi32>
    %7 = arith.addi %4, %6 : vector<8x32xi32>
    %8 = arith.cmpi slt, %1, %7 : vector<8x32xi32>
    %9 = arith.andi %5, %8 : vector<8x32xi1>
    %10 = arith.extui %9 : vector<8x32xi1> to vector<8x32xi32>
    %11 = arith.sitofp %10 : vector<8x32xi32> to vector<8x32xf32>
    %c0_2 = arith.constant 0 : index
    %c0_3 = arith.constant 0 : index
    %c0_4 = arith.constant 0 : index
    %12 = vector.load %arg0[%c0_2, %c0_3, %c0_4] : memref<2x8x16xf32, #tpu.memory_space<vmem>>, vector<2x8x16xf32>
    %13 = vector.shape_cast %12 : vector<2x8x16xf32> to vector<16x16xf32>
    %c0_5 = arith.constant 0 : index
    %c0_6 = arith.constant 0 : index
    %14 = vector.load %arg1[%c0_5, %c0_6] : memref<16x32xf32, #tpu.memory_space<vmem>>, vector<16x32xf32>
    %cst = arith.constant dense<0.000000e+00> : vector<16x32xf32>
    %15 = tpu.matmul %13, %14, %cst {dimension_numbers = #tpu.dot_dimension_numbers<[1], [0], [0], [1], [0, 0, 1, 1], [], []>} : vector<16x16xf32>, vector<16x32xf32>, vector<16x32xf32> -> vector<16x32xf32>
    %16 = vector.extract_strided_slice %0 {offsets = [0, 0], sizes = [1, 32], strides = [1, 1]} : vector<19x32xf32> to vector<1x32xf32>
    %17 = vector.broadcast %16 : vector<1x32xf32> to vector<16x32xf32>
    %18 = arith.addf %15, %17 : vector<16x32xf32>
    %19 = vector.extract_strided_slice %0 {offsets = [1, 0], sizes = [1, 32], strides = [1, 1]} : vector<19x32xf32> to vector<1x32xf32>
    %20 = vector.extract_strided_slice %0 {offsets = [2, 0], sizes = [1, 32], strides = [1, 1]} : vector<19x32xf32> to vector<1x32xf32>
    %21 = vector.extract_strided_slice %0 {offsets = [3, 0], sizes = [1, 32], strides = [1, 1]} : vector<19x32xf32> to vector<1x32xf32>
    %22 = vector.extract_strided_slice %0 {offsets = [4, 0], sizes = [1, 32], strides = [1, 1]} : vector<19x32xf32> to vector<1x32xf32>
    %23 = vector.extract_strided_slice %0 {offsets = [5, 0], sizes = [1, 32], strides = [1, 1]} : vector<19x32xf32> to vector<1x32xf32>
    %24 = vector.extract_strided_slice %0 {offsets = [6, 0], sizes = [1, 32], strides = [1, 1]} : vector<19x32xf32> to vector<1x32xf32>
    %25 = vector.extract_strided_slice %0 {offsets = [7, 0], sizes = [1, 32], strides = [1, 1]} : vector<19x32xf32> to vector<1x32xf32>
    %26 = vector.extract_strided_slice %0 {offsets = [8, 0], sizes = [1, 32], strides = [1, 1]} : vector<19x32xf32> to vector<1x32xf32>
    %27 = vector.extract_strided_slice %0 {offsets = [9, 0], sizes = [1, 32], strides = [1, 1]} : vector<19x32xf32> to vector<1x32xf32>
    %c0_7 = arith.constant 0 : index
    %c0_8 = arith.constant 0 : index
    %c0_9 = arith.constant 0 : index
    %28 = vector.load %arg3[%c0_7, %c0_8, %c0_9] : memref<6x32x32xf32, #tpu.memory_space<vmem>>, vector<1x32x32xf32>
    %29 = vector.shape_cast %28 : vector<1x32x32xf32> to vector<32x32xf32>
    %cst_10 = arith.constant dense<0.000000e+00> : vector<16x32xf32>
    %30 = tpu.matmul %18, %29, %cst_10 {dimension_numbers = #tpu.dot_dimension_numbers<[1], [0], [0], [1], [0, 0, 1, 1], [], []>} : vector<16x32xf32>, vector<32x32xf32>, vector<16x32xf32> -> vector<16x32xf32>
    %31 = vector.broadcast %19 : vector<1x32xf32> to vector<16x32xf32>
    %32 = arith.addf %30, %31 : vector<16x32xf32>
    %c1 = arith.constant 1 : index
    %c0_11 = arith.constant 0 : index
    %c0_12 = arith.constant 0 : index
    %33 = vector.load %arg3[%c1, %c0_11, %c0_12] : memref<6x32x32xf32, #tpu.memory_space<vmem>>, vector<1x32x32xf32>
    %34 = vector.shape_cast %33 : vector<1x32x32xf32> to vector<32x32xf32>
    %cst_13 = arith.constant dense<0.000000e+00> : vector<16x32xf32>
    %35 = tpu.matmul %18, %34, %cst_13 {dimension_numbers = #tpu.dot_dimension_numbers<[1], [0], [0], [1], [0, 0, 1, 1], [], []>} : vector<16x32xf32>, vector<32x32xf32>, vector<16x32xf32> -> vector<16x32xf32>
    %36 = vector.broadcast %20 : vector<1x32xf32> to vector<16x32xf32>
    %37 = arith.addf %35, %36 : vector<16x32xf32>
    %c2 = arith.constant 2 : index
    %c0_14 = arith.constant 0 : index
    %c0_15 = arith.constant 0 : index
    %38 = vector.load %arg3[%c2, %c0_14, %c0_15] : memref<6x32x32xf32, #tpu.memory_space<vmem>>, vector<1x32x32xf32>
    %39 = vector.shape_cast %38 : vector<1x32x32xf32> to vector<32x32xf32>
    %cst_16 = arith.constant dense<0.000000e+00> : vector<16x32xf32>
    %40 = tpu.matmul %18, %39, %cst_16 {dimension_numbers = #tpu.dot_dimension_numbers<[1], [0], [0], [1], [0, 0, 1, 1], [], []>} : vector<16x32xf32>, vector<32x32xf32>, vector<16x32xf32> -> vector<16x32xf32>
    %41 = vector.broadcast %21 : vector<1x32xf32> to vector<16x32xf32>
    %42 = arith.addf %40, %41 : vector<16x32xf32>
    %43 = vector.shape_cast %37 : vector<16x32xf32> to vector<2x8x32xf32>
    %44 = vector.shape_cast %42 : vector<16x32xf32> to vector<2x8x32xf32>
    %cst_17 = arith.constant 5.000000e-01 : f32
    %45 = vector.broadcast %cst_17 : f32 to vector<16x32xf32>
    %46 = arith.mulf %32, %45 : vector<16x32xf32>
    %47 = vector.shape_cast %46 : vector<16x32xf32> to vector<2x8x32xf32>
    %48 = vector.shape_cast %47 : vector<2x8x32xf32> to vector<2x8x1x32xf32>
    %49 = vector.shape_cast %11 : vector<8x32xf32> to vector<1x1x8x32xf32>
    %50 = vector.broadcast %48 : vector<2x8x1x32xf32> to vector<2x8x8x32xf32>
    %51 = vector.broadcast %49 : vector<1x1x8x32xf32> to vector<2x8x8x32xf32>
    %52 = arith.mulf %50, %51 : vector<2x8x8x32xf32>
    %53 = vector.shape_cast %52 : vector<2x8x8x32xf32> to vector<2x64x32xf32>
    "tpu.trace_start"() <{level = 10 : i32, message = "bqd,bkd->bqk"}> : () -> ()
    %cst_18 = arith.constant dense<0.000000e+00> : vector<2x64x8xf32>
    %54 = tpu.matmul %53, %43, %cst_18 {dimension_numbers = #tpu.dot_dimension_numbers<[2], [2], [1], [1], [0, 0, 0, 1, 1, 1], [0], [0]>} : vector<2x64x32xf32>, vector<2x8x32xf32>, vector<2x64x8xf32> -> vector<2x64x8xf32>
    "tpu.trace_stop"() : () -> ()
    %cst_19 = arith.constant dense<0xFF800000> : vector<2x64xf32>
    %55 = vector.multi_reduction <maximumf>, %54, %cst_19 [2] : vector<2x64x8xf32> to vector<2x64xf32>
    %56 = vector.shape_cast %55 : vector<2x64xf32> to vector<2x64x1xf32>
    %57 = vector.broadcast %56 : vector<2x64x1xf32> to vector<2x64x8xf32>
    %58 = arith.subf %54, %57 : vector<2x64x8xf32>
    %59 = math.exp %58 : vector<2x64x8xf32>
    %cst_20 = arith.constant dense<0.000000e+00> : vector<2x64xf32>
    %60 = vector.multi_reduction <add>, %59, %cst_20 [2] : vector<2x64x8xf32> to vector<2x64xf32>
    %61 = vector.shape_cast %60 : vector<2x64xf32> to vector<2x64x1xf32>
    %62 = tpu.reciprocal %61 {approx = true} : vector<2x64x1xf32> -> vector<2x64x1xf32>
    %63 = vector.broadcast %62 : vector<2x64x1xf32> to vector<2x64x8xf32>
    %64 = arith.mulf %59, %63 : vector<2x64x8xf32>
    "tpu.trace_start"() <{level = 10 : i32, message = "bqk,bkd->bqd"}> : () -> ()
    %cst_21 = arith.constant dense<0.000000e+00> : vector<2x64x32xf32>
    %65 = tpu.matmul %64, %44, %cst_21 {dimension_numbers = #tpu.dot_dimension_numbers<[2], [1], [1], [2], [0, 0, 0, 1, 1, 2], [0], [0]>} : vector<2x64x8xf32>, vector<2x8x32xf32>, vector<2x64x32xf32> -> vector<2x64x32xf32>
    "tpu.trace_stop"() : () -> ()
    %66 = vector.shape_cast %65 : vector<2x64x32xf32> to vector<2x8x8x32xf32>
    %67 = vector.shape_cast %11 : vector<8x32xf32> to vector<1x1x8x32xf32>
    %68 = vector.broadcast %67 : vector<1x1x8x32xf32> to vector<2x8x8x32xf32>
    %69 = arith.mulf %66, %68 : vector<2x8x8x32xf32>
    %cst_22 = arith.constant dense<0.000000e+00> : vector<2x8x32xf32>
    %70 = vector.multi_reduction <add>, %69, %cst_22 [2] : vector<2x8x8x32xf32> to vector<2x8x32xf32>
    %71 = vector.shape_cast %70 : vector<2x8x32xf32> to vector<16x32xf32>
    %c0_23 = arith.constant 0 : index
    %c0_24 = arith.constant 0 : index
    %c0_25 = arith.constant 0 : index
    %72 = vector.load %arg4[%c0_23, %c0_24, %c0_25] : memref<2x32x32xf32, #tpu.memory_space<vmem>>, vector<1x32x32xf32>
    %73 = vector.shape_cast %72 : vector<1x32x32xf32> to vector<32x32xf32>
    %cst_26 = arith.constant dense<0.000000e+00> : vector<16x32xf32>
    %74 = tpu.matmul %71, %73, %cst_26 {dimension_numbers = #tpu.dot_dimension_numbers<[1], [0], [0], [1], [0, 0, 1, 1], [], []>} : vector<16x32xf32>, vector<32x32xf32>, vector<16x32xf32> -> vector<16x32xf32>
    %75 = vector.broadcast %22 : vector<1x32xf32> to vector<16x32xf32>
    %76 = arith.addf %74, %75 : vector<16x32xf32>
    %77 = arith.addf %18, %76 : vector<16x32xf32>
    %cst_27 = arith.constant dense<0.000000e+00> : vector<16xf32>
    %78 = vector.multi_reduction <add>, %77, %cst_27 [1] : vector<16x32xf32> to vector<16xf32>
    %79 = vector.shape_cast %78 : vector<16xf32> to vector<16x1xf32>
    %cst_28 = arith.constant 3.200000e+01 : f32
    %80 = vector.broadcast %cst_28 : f32 to vector<16x1xf32>
    %81 = arith.divf %79, %80 : vector<16x1xf32>
    %82 = vector.broadcast %81 : vector<16x1xf32> to vector<16x32xf32>
    %83 = arith.subf %77, %82 : vector<16x32xf32>
    %84 = arith.mulf %83, %83 : vector<16x32xf32>
    %cst_29 = arith.constant dense<0.000000e+00> : vector<16xf32>
    %85 = vector.multi_reduction <add>, %84, %cst_29 [1] : vector<16x32xf32> to vector<16xf32>
    %86 = vector.shape_cast %85 : vector<16xf32> to vector<16x1xf32>
    %cst_30 = arith.constant 3.200000e+01 : f32
    %87 = vector.broadcast %cst_30 : f32 to vector<16x1xf32>
    %88 = arith.divf %86, %87 : vector<16x1xf32>
    %cst_31 = arith.constant 9.99999974E-6 : f32
    %89 = vector.broadcast %cst_31 : f32 to vector<16x1xf32>
    %90 = arith.addf %88, %89 : vector<16x1xf32>
    %91 = math.rsqrt %90 : vector<16x1xf32>
    %92 = vector.broadcast %91 : vector<16x1xf32> to vector<16x32xf32>
    %93 = arith.mulf %83, %92 : vector<16x32xf32>
    %94 = vector.broadcast %23 : vector<1x32xf32> to vector<16x32xf32>
    %95 = arith.mulf %93, %94 : vector<16x32xf32>
    %96 = vector.broadcast %24 : vector<1x32xf32> to vector<16x32xf32>
    %97 = arith.addf %95, %96 : vector<16x32xf32>
    %98 = arith.truncf %97 : vector<16x32xf32> to vector<16x32xbf16>
    %c0_32 = arith.constant 0 : index
    %c0_33 = arith.constant 0 : index
    %c0_34 = arith.constant 0 : index
    %99 = vector.load %arg5[%c0_32, %c0_33, %c0_34] : memref<2x32x2048xbf16, #tpu.memory_space<vmem>>, vector<1x32x2048xbf16>
    %100 = vector.shape_cast %99 : vector<1x32x2048xbf16> to vector<32x2048xbf16>
    %cst_35 = arith.constant dense<0.000000e+00> : vector<16x2048xf32>
    %101 = tpu.matmul %98, %100, %cst_35 {dimension_numbers = #tpu.dot_dimension_numbers<[1], [0], [0], [1], [0, 0, 1, 1], [], []>} : vector<16x32xbf16>, vector<32x2048xbf16>, vector<16x2048xf32> -> vector<16x2048xf32>
    %c0_36 = arith.constant 0 : index
    %c0_37 = arith.constant 0 : index
    %c0_38 = arith.constant 0 : index
    %102 = vector.load %arg6[%c0_36, %c0_37, %c0_38] : memref<2x1x2048xf32, #tpu.memory_space<vmem>>, vector<1x1x2048xf32>
    %103 = vector.shape_cast %102 : vector<1x1x2048xf32> to vector<1x2048xf32>
    %104 = vector.broadcast %103 : vector<1x2048xf32> to vector<16x2048xf32>
    %105 = arith.addf %101, %104 : vector<16x2048xf32>
    %cst_39 = arith.constant 0.000000e+00 : f32
    %106 = vector.broadcast %cst_39 : f32 to vector<16x2048xf32>
    %107 = arith.maximumf %105, %106 : vector<16x2048xf32>
    %108 = arith.truncf %107 : vector<16x2048xf32> to vector<16x2048xbf16>
    %c0_40 = arith.constant 0 : index
    %c0_41 = arith.constant 0 : index
    %c0_42 = arith.constant 0 : index
    %109 = vector.load %arg7[%c0_40, %c0_41, %c0_42] : memref<2x2048x32xbf16, #tpu.memory_space<vmem>>, vector<1x2048x32xbf16>
    %110 = vector.shape_cast %109 : vector<1x2048x32xbf16> to vector<2048x32xbf16>
    %cst_43 = arith.constant dense<0.000000e+00> : vector<16x32xf32>
    %111 = tpu.matmul %108, %110, %cst_43 {dimension_numbers = #tpu.dot_dimension_numbers<[1], [0], [0], [1], [0, 0, 1, 1], [], []>} : vector<16x2048xbf16>, vector<2048x32xbf16>, vector<16x32xf32> -> vector<16x32xf32>
    %112 = vector.broadcast %25 : vector<1x32xf32> to vector<16x32xf32>
    %113 = arith.addf %111, %112 : vector<16x32xf32>
    %114 = arith.addf %97, %113 : vector<16x32xf32>
    %cst_44 = arith.constant dense<0.000000e+00> : vector<16xf32>
    %115 = vector.multi_reduction <add>, %114, %cst_44 [1] : vector<16x32xf32> to vector<16xf32>
    %116 = vector.shape_cast %115 : vector<16xf32> to vector<16x1xf32>
    %cst_45 = arith.constant 3.200000e+01 : f32
    %117 = vector.broadcast %cst_45 : f32 to vector<16x1xf32>
    %118 = arith.divf %116, %117 : vector<16x1xf32>
    %119 = vector.broadcast %118 : vector<16x1xf32> to vector<16x32xf32>
    %120 = arith.subf %114, %119 : vector<16x32xf32>
    %121 = arith.mulf %120, %120 : vector<16x32xf32>
    %cst_46 = arith.constant dense<0.000000e+00> : vector<16xf32>
    %122 = vector.multi_reduction <add>, %121, %cst_46 [1] : vector<16x32xf32> to vector<16xf32>
    %123 = vector.shape_cast %122 : vector<16xf32> to vector<16x1xf32>
    %cst_47 = arith.constant 3.200000e+01 : f32
    %124 = vector.broadcast %cst_47 : f32 to vector<16x1xf32>
    %125 = arith.divf %123, %124 : vector<16x1xf32>
    %cst_48 = arith.constant 9.99999974E-6 : f32
    %126 = vector.broadcast %cst_48 : f32 to vector<16x1xf32>
    %127 = arith.addf %125, %126 : vector<16x1xf32>
    %128 = math.rsqrt %127 : vector<16x1xf32>
    %129 = vector.broadcast %128 : vector<16x1xf32> to vector<16x32xf32>
    %130 = arith.mulf %120, %129 : vector<16x32xf32>
    %131 = vector.broadcast %26 : vector<1x32xf32> to vector<16x32xf32>
    %132 = arith.mulf %130, %131 : vector<16x32xf32>
    %133 = vector.broadcast %27 : vector<1x32xf32> to vector<16x32xf32>
    %134 = arith.addf %132, %133 : vector<16x32xf32>
    %135 = vector.extract_strided_slice %0 {offsets = [10, 0], sizes = [1, 32], strides = [1, 1]} : vector<19x32xf32> to vector<1x32xf32>
    %136 = vector.extract_strided_slice %0 {offsets = [11, 0], sizes = [1, 32], strides = [1, 1]} : vector<19x32xf32> to vector<1x32xf32>
    %137 = vector.extract_strided_slice %0 {offsets = [12, 0], sizes = [1, 32], strides = [1, 1]} : vector<19x32xf32> to vector<1x32xf32>
    %138 = vector.extract_strided_slice %0 {offsets = [13, 0], sizes = [1, 32], strides = [1, 1]} : vector<19x32xf32> to vector<1x32xf32>
    %139 = vector.extract_strided_slice %0 {offsets = [14, 0], sizes = [1, 32], strides = [1, 1]} : vector<19x32xf32> to vector<1x32xf32>
    %140 = vector.extract_strided_slice %0 {offsets = [15, 0], sizes = [1, 32], strides = [1, 1]} : vector<19x32xf32> to vector<1x32xf32>
    %141 = vector.extract_strided_slice %0 {offsets = [16, 0], sizes = [1, 32], strides = [1, 1]} : vector<19x32xf32> to vector<1x32xf32>
    %142 = vector.extract_strided_slice %0 {offsets = [17, 0], sizes = [1, 32], strides = [1, 1]} : vector<19x32xf32> to vector<1x32xf32>
    %143 = vector.extract_strided_slice %0 {offsets = [18, 0], sizes = [1, 32], strides = [1, 1]} : vector<19x32xf32> to vector<1x32xf32>
    %c3 = arith.constant 3 : index
    %c0_49 = arith.constant 0 : index
    %c0_50 = arith.constant 0 : index
    %144 = vector.load %arg3[%c3, %c0_49, %c0_50] : memref<6x32x32xf32, #tpu.memory_space<vmem>>, vector<1x32x32xf32>
    %145 = vector.shape_cast %144 : vector<1x32x32xf32> to vector<32x32xf32>
    %cst_51 = arith.constant dense<0.000000e+00> : vector<16x32xf32>
    %146 = tpu.matmul %134, %145, %cst_51 {dimension_numbers = #tpu.dot_dimension_numbers<[1], [0], [0], [1], [0, 0, 1, 1], [], []>} : vector<16x32xf32>, vector<32x32xf32>, vector<16x32xf32> -> vector<16x32xf32>
    %147 = vector.broadcast %135 : vector<1x32xf32> to vector<16x32xf32>
    %148 = arith.addf %146, %147 : vector<16x32xf32>
    %c4 = arith.constant 4 : index
    %c0_52 = arith.constant 0 : index
    %c0_53 = arith.constant 0 : index
    %149 = vector.load %arg3[%c4, %c0_52, %c0_53] : memref<6x32x32xf32, #tpu.memory_space<vmem>>, vector<1x32x32xf32>
    %150 = vector.shape_cast %149 : vector<1x32x32xf32> to vector<32x32xf32>
    %cst_54 = arith.constant dense<0.000000e+00> : vector<16x32xf32>
    %151 = tpu.matmul %134, %150, %cst_54 {dimension_numbers = #tpu.dot_dimension_numbers<[1], [0], [0], [1], [0, 0, 1, 1], [], []>} : vector<16x32xf32>, vector<32x32xf32>, vector<16x32xf32> -> vector<16x32xf32>
    %152 = vector.broadcast %136 : vector<1x32xf32> to vector<16x32xf32>
    %153 = arith.addf %151, %152 : vector<16x32xf32>
    %c5 = arith.constant 5 : index
    %c0_55 = arith.constant 0 : index
    %c0_56 = arith.constant 0 : index
    %154 = vector.load %arg3[%c5, %c0_55, %c0_56] : memref<6x32x32xf32, #tpu.memory_space<vmem>>, vector<1x32x32xf32>
    %155 = vector.shape_cast %154 : vector<1x32x32xf32> to vector<32x32xf32>
    %cst_57 = arith.constant dense<0.000000e+00> : vector<16x32xf32>
    %156 = tpu.matmul %134, %155, %cst_57 {dimension_numbers = #tpu.dot_dimension_numbers<[1], [0], [0], [1], [0, 0, 1, 1], [], []>} : vector<16x32xf32>, vector<32x32xf32>, vector<16x32xf32> -> vector<16x32xf32>
    %157 = vector.broadcast %137 : vector<1x32xf32> to vector<16x32xf32>
    %158 = arith.addf %156, %157 : vector<16x32xf32>
    %159 = vector.shape_cast %153 : vector<16x32xf32> to vector<2x8x32xf32>
    %160 = vector.shape_cast %158 : vector<16x32xf32> to vector<2x8x32xf32>
    %cst_58 = arith.constant 5.000000e-01 : f32
    %161 = vector.broadcast %cst_58 : f32 to vector<16x32xf32>
    %162 = arith.mulf %148, %161 : vector<16x32xf32>
    %163 = vector.shape_cast %162 : vector<16x32xf32> to vector<2x8x32xf32>
    %164 = vector.shape_cast %163 : vector<2x8x32xf32> to vector<2x8x1x32xf32>
    %165 = vector.shape_cast %11 : vector<8x32xf32> to vector<1x1x8x32xf32>
    %166 = vector.broadcast %164 : vector<2x8x1x32xf32> to vector<2x8x8x32xf32>
    %167 = vector.broadcast %165 : vector<1x1x8x32xf32> to vector<2x8x8x32xf32>
    %168 = arith.mulf %166, %167 : vector<2x8x8x32xf32>
    %169 = vector.shape_cast %168 : vector<2x8x8x32xf32> to vector<2x64x32xf32>
    "tpu.trace_start"() <{level = 10 : i32, message = "bqd,bkd->bqk"}> : () -> ()
    %cst_59 = arith.constant dense<0.000000e+00> : vector<2x64x8xf32>
    %170 = tpu.matmul %169, %159, %cst_59 {dimension_numbers = #tpu.dot_dimension_numbers<[2], [2], [1], [1], [0, 0, 0, 1, 1, 1], [0], [0]>} : vector<2x64x32xf32>, vector<2x8x32xf32>, vector<2x64x8xf32> -> vector<2x64x8xf32>
    "tpu.trace_stop"() : () -> ()
    %cst_60 = arith.constant dense<0xFF800000> : vector<2x64xf32>
    %171 = vector.multi_reduction <maximumf>, %170, %cst_60 [2] : vector<2x64x8xf32> to vector<2x64xf32>
    %172 = vector.shape_cast %171 : vector<2x64xf32> to vector<2x64x1xf32>
    %173 = vector.broadcast %172 : vector<2x64x1xf32> to vector<2x64x8xf32>
    %174 = arith.subf %170, %173 : vector<2x64x8xf32>
    %175 = math.exp %174 : vector<2x64x8xf32>
    %cst_61 = arith.constant dense<0.000000e+00> : vector<2x64xf32>
    %176 = vector.multi_reduction <add>, %175, %cst_61 [2] : vector<2x64x8xf32> to vector<2x64xf32>
    %177 = vector.shape_cast %176 : vector<2x64xf32> to vector<2x64x1xf32>
    %178 = tpu.reciprocal %177 {approx = true} : vector<2x64x1xf32> -> vector<2x64x1xf32>
    %179 = vector.broadcast %178 : vector<2x64x1xf32> to vector<2x64x8xf32>
    %180 = arith.mulf %175, %179 : vector<2x64x8xf32>
    "tpu.trace_start"() <{level = 10 : i32, message = "bqk,bkd->bqd"}> : () -> ()
    %cst_62 = arith.constant dense<0.000000e+00> : vector<2x64x32xf32>
    %181 = tpu.matmul %180, %160, %cst_62 {dimension_numbers = #tpu.dot_dimension_numbers<[2], [1], [1], [2], [0, 0, 0, 1, 1, 2], [0], [0]>} : vector<2x64x8xf32>, vector<2x8x32xf32>, vector<2x64x32xf32> -> vector<2x64x32xf32>
    "tpu.trace_stop"() : () -> ()
    %182 = vector.shape_cast %181 : vector<2x64x32xf32> to vector<2x8x8x32xf32>
    %183 = vector.shape_cast %11 : vector<8x32xf32> to vector<1x1x8x32xf32>
    %184 = vector.broadcast %183 : vector<1x1x8x32xf32> to vector<2x8x8x32xf32>
    %185 = arith.mulf %182, %184 : vector<2x8x8x32xf32>
    %cst_63 = arith.constant dense<0.000000e+00> : vector<2x8x32xf32>
    %186 = vector.multi_reduction <add>, %185, %cst_63 [2] : vector<2x8x8x32xf32> to vector<2x8x32xf32>
    %187 = vector.shape_cast %186 : vector<2x8x32xf32> to vector<16x32xf32>
    %c1_64 = arith.constant 1 : index
    %c0_65 = arith.constant 0 : index
    %c0_66 = arith.constant 0 : index
    %188 = vector.load %arg4[%c1_64, %c0_65, %c0_66] : memref<2x32x32xf32, #tpu.memory_space<vmem>>, vector<1x32x32xf32>
    %189 = vector.shape_cast %188 : vector<1x32x32xf32> to vector<32x32xf32>
    %cst_67 = arith.constant dense<0.000000e+00> : vector<16x32xf32>
    %190 = tpu.matmul %187, %189, %cst_67 {dimension_numbers = #tpu.dot_dimension_numbers<[1], [0], [0], [1], [0, 0, 1, 1], [], []>} : vector<16x32xf32>, vector<32x32xf32>, vector<16x32xf32> -> vector<16x32xf32>
    %191 = vector.broadcast %138 : vector<1x32xf32> to vector<16x32xf32>
    %192 = arith.addf %190, %191 : vector<16x32xf32>
    %193 = arith.addf %134, %192 : vector<16x32xf32>
    %cst_68 = arith.constant dense<0.000000e+00> : vector<16xf32>
    %194 = vector.multi_reduction <add>, %193, %cst_68 [1] : vector<16x32xf32> to vector<16xf32>
    %195 = vector.shape_cast %194 : vector<16xf32> to vector<16x1xf32>
    %cst_69 = arith.constant 3.200000e+01 : f32
    %196 = vector.broadcast %cst_69 : f32 to vector<16x1xf32>
    %197 = arith.divf %195, %196 : vector<16x1xf32>
    %198 = vector.broadcast %197 : vector<16x1xf32> to vector<16x32xf32>
    %199 = arith.subf %193, %198 : vector<16x32xf32>
    %200 = arith.mulf %199, %199 : vector<16x32xf32>
    %cst_70 = arith.constant dense<0.000000e+00> : vector<16xf32>
    %201 = vector.multi_reduction <add>, %200, %cst_70 [1] : vector<16x32xf32> to vector<16xf32>
    %202 = vector.shape_cast %201 : vector<16xf32> to vector<16x1xf32>
    %cst_71 = arith.constant 3.200000e+01 : f32
    %203 = vector.broadcast %cst_71 : f32 to vector<16x1xf32>
    %204 = arith.divf %202, %203 : vector<16x1xf32>
    %cst_72 = arith.constant 9.99999974E-6 : f32
    %205 = vector.broadcast %cst_72 : f32 to vector<16x1xf32>
    %206 = arith.addf %204, %205 : vector<16x1xf32>
    %207 = math.rsqrt %206 : vector<16x1xf32>
    %208 = vector.broadcast %207 : vector<16x1xf32> to vector<16x32xf32>
    %209 = arith.mulf %199, %208 : vector<16x32xf32>
    %210 = vector.broadcast %139 : vector<1x32xf32> to vector<16x32xf32>
    %211 = arith.mulf %209, %210 : vector<16x32xf32>
    %212 = vector.broadcast %140 : vector<1x32xf32> to vector<16x32xf32>
    %213 = arith.addf %211, %212 : vector<16x32xf32>
    %214 = arith.truncf %213 : vector<16x32xf32> to vector<16x32xbf16>
    %c1_73 = arith.constant 1 : index
    %c0_74 = arith.constant 0 : index
    %c0_75 = arith.constant 0 : index
    %215 = vector.load %arg5[%c1_73, %c0_74, %c0_75] : memref<2x32x2048xbf16, #tpu.memory_space<vmem>>, vector<1x32x2048xbf16>
    %216 = vector.shape_cast %215 : vector<1x32x2048xbf16> to vector<32x2048xbf16>
    %cst_76 = arith.constant dense<0.000000e+00> : vector<16x2048xf32>
    %217 = tpu.matmul %214, %216, %cst_76 {dimension_numbers = #tpu.dot_dimension_numbers<[1], [0], [0], [1], [0, 0, 1, 1], [], []>} : vector<16x32xbf16>, vector<32x2048xbf16>, vector<16x2048xf32> -> vector<16x2048xf32>
    %c1_77 = arith.constant 1 : index
    %c0_78 = arith.constant 0 : index
    %c0_79 = arith.constant 0 : index
    %218 = vector.load %arg6[%c1_77, %c0_78, %c0_79] : memref<2x1x2048xf32, #tpu.memory_space<vmem>>, vector<1x1x2048xf32>
    %219 = vector.shape_cast %218 : vector<1x1x2048xf32> to vector<1x2048xf32>
    %220 = vector.broadcast %219 : vector<1x2048xf32> to vector<16x2048xf32>
    %221 = arith.addf %217, %220 : vector<16x2048xf32>
    %cst_80 = arith.constant 0.000000e+00 : f32
    %222 = vector.broadcast %cst_80 : f32 to vector<16x2048xf32>
    %223 = arith.maximumf %221, %222 : vector<16x2048xf32>
    %224 = arith.truncf %223 : vector<16x2048xf32> to vector<16x2048xbf16>
    %c1_81 = arith.constant 1 : index
    %c0_82 = arith.constant 0 : index
    %c0_83 = arith.constant 0 : index
    %225 = vector.load %arg7[%c1_81, %c0_82, %c0_83] : memref<2x2048x32xbf16, #tpu.memory_space<vmem>>, vector<1x2048x32xbf16>
    %226 = vector.shape_cast %225 : vector<1x2048x32xbf16> to vector<2048x32xbf16>
    %cst_84 = arith.constant dense<0.000000e+00> : vector<16x32xf32>
    %227 = tpu.matmul %224, %226, %cst_84 {dimension_numbers = #tpu.dot_dimension_numbers<[1], [0], [0], [1], [0, 0, 1, 1], [], []>} : vector<16x2048xbf16>, vector<2048x32xbf16>, vector<16x32xf32> -> vector<16x32xf32>
    %228 = vector.broadcast %141 : vector<1x32xf32> to vector<16x32xf32>
    %229 = arith.addf %227, %228 : vector<16x32xf32>
    %230 = arith.addf %213, %229 : vector<16x32xf32>
    %cst_85 = arith.constant dense<0.000000e+00> : vector<16xf32>
    %231 = vector.multi_reduction <add>, %230, %cst_85 [1] : vector<16x32xf32> to vector<16xf32>
    %232 = vector.shape_cast %231 : vector<16xf32> to vector<16x1xf32>
    %cst_86 = arith.constant 3.200000e+01 : f32
    %233 = vector.broadcast %cst_86 : f32 to vector<16x1xf32>
    %234 = arith.divf %232, %233 : vector<16x1xf32>
    %235 = vector.broadcast %234 : vector<16x1xf32> to vector<16x32xf32>
    %236 = arith.subf %230, %235 : vector<16x32xf32>
    %237 = arith.mulf %236, %236 : vector<16x32xf32>
    %cst_87 = arith.constant dense<0.000000e+00> : vector<16xf32>
    %238 = vector.multi_reduction <add>, %237, %cst_87 [1] : vector<16x32xf32> to vector<16xf32>
    %239 = vector.shape_cast %238 : vector<16xf32> to vector<16x1xf32>
    %cst_88 = arith.constant 3.200000e+01 : f32
    %240 = vector.broadcast %cst_88 : f32 to vector<16x1xf32>
    %241 = arith.divf %239, %240 : vector<16x1xf32>
    %cst_89 = arith.constant 9.99999974E-6 : f32
    %242 = vector.broadcast %cst_89 : f32 to vector<16x1xf32>
    %243 = arith.addf %241, %242 : vector<16x1xf32>
    %244 = math.rsqrt %243 : vector<16x1xf32>
    %245 = vector.broadcast %244 : vector<16x1xf32> to vector<16x32xf32>
    %246 = arith.mulf %236, %245 : vector<16x32xf32>
    %247 = vector.broadcast %142 : vector<1x32xf32> to vector<16x32xf32>
    %248 = arith.mulf %246, %247 : vector<16x32xf32>
    %249 = vector.broadcast %143 : vector<1x32xf32> to vector<16x32xf32>
    %250 = arith.addf %248, %249 : vector<16x32xf32>
    %c0_90 = arith.constant 0 : index
    %c0_91 = arith.constant 0 : index
    %251 = vector.load %arg8[%c0_90, %c0_91] : memref<32x8xf32, #tpu.memory_space<vmem>>, vector<32x8xf32>
    %cst_92 = arith.constant dense<0.000000e+00> : vector<16x8xf32>
    %252 = tpu.matmul %250, %251, %cst_92 {dimension_numbers = #tpu.dot_dimension_numbers<[1], [0], [0], [1], [0, 0, 1, 1], [], []>} : vector<16x32xf32>, vector<32x8xf32>, vector<16x8xf32> -> vector<16x8xf32>
    %c0_93 = arith.constant 0 : index
    %c0_94 = arith.constant 0 : index
    %253 = vector.load %arg9[%c0_93, %c0_94] : memref<1x8xf32, #tpu.memory_space<vmem>>, vector<1x8xf32>
    %254 = vector.broadcast %253 : vector<1x8xf32> to vector<16x8xf32>
    %255 = arith.addf %252, %254 : vector<16x8xf32>
    %c0_95 = arith.constant 0 : index
    %c0_96 = arith.constant 0 : index
    %256 = vector.load %arg10[%c0_95, %c0_96] : memref<16x8xf32, #tpu.memory_space<vmem>>, vector<16x8xf32>
    tpu.vector_store %arg10[%c0_95, %c0_96], %255 {strides = array<i32>} : memref<16x8xf32, #tpu.memory_space<vmem>>, vector<16x8xf32>,
    return
  }
}

</mosaic_0001>

<bundles_post_ra>
// kernel: tpu_custom_call.1
= control target key start
LH: loop header
LB: loop body
LE: loop exit
PB: predicated region body
PF: predicated region fallthrough
CT: control target
= control target key end

     0   :  { %vm55_vm0 = vcmask 130048   ;;  %vm90_vm1 = vcmask 261120   ;;  %v39_v22 = vlaneseq  ;;  %v7636_v42 = vmov 0.0   ;;  %s9759_s1 = inlined_call_operand.vmem [shape: f32[16,32], index: 1, kind: input, shape index: {}]   ;;  %s9760_s0 = inlined_call_operand.vmem [shape: f32[2,8,16], index: 0, kind: input, shape index: {}]   ;;  %s9761_s3 = inlined_call_operand.vmem [shape: f32[6,32,32], index: 3, kind: input, shape index: {}]   ;;  %s9762_s2 = inlined_call_operand.vmem [shape: f32[19,32], index: 2, kind: input, shape index: {}]   ;;  %s9763_s4 = inlined_call_operand.vmem [shape: f32[2,32,32], index: 4, kind: input, shape index: {}]   ;;  %s9764_s5 = inlined_call_operand.vmem [shape: bf16[2,32,2048], index: 5, kind: input, shape index: {}]   ;;  %s9765_s7 = inlined_call_operand.vmem [shape: bf16[2,2048,32], index: 7, kind: input, shape index: {}]   ;;  %s9766_s6 = inlined_call_operand.vmem [shape: f32[2,1,2048], index: 6, kind: input, shape index: {}]   ;;  %s9767_s9 = inlined_call_operand.vmem [shape: f32[1,8], index: 9, kind: input, shape index: {}]   ;;  %s9768_s8 = inlined_call_operand.vmem [shape: f32[32,8], index: 8, kind: input, shape index: {}]   ;;  %s9769_s10 = inlined_call_operand.vmem [shape: f32[16,8], index: 10, kind: output, shape index: {}]  }
   0x1   :  { %v53_v0 = vld [vmem:[%s9759_s1 + $0x8] sm:$0xff]  ;;  %v52_v1 = vld [vmem:[%s9759_s1] sm:$0xff]  ;;  %v5457_v4 = vld [vmem:[%s9761_s3 + $0x58] sm:$0xff]  ;;  %vm380_vm5 = vcmask 64512   ;;  %vm836_vm6 = vcmask 1041409   ;;  %vm838_vm7 = vcmask 1042434  }
   0x2   :  { %76 = vmatpush.msra.mxu0 %v53_v0  ;;  %7478 = vmatpush.msra.mxu3 %v53_v0  ;;  %v50_v2 = vld [vmem:[%s9760_s0] sm:$0xff]  ;;  %v51_v3 = vld [vmem:[%s9760_s0 + $0x8] sm:$0xff]  ;;  %v5456_v5 = vld [vmem:[%s9761_s3 + $0x50] sm:$0xff]  ;;  %v42_v24 = vshrl.u32 %v39_v22, 7  ;;  %v40_v32 = vand.u32 127, %v39_v22  ;;  %vm840_vm8 = vcmask 1043459  }
   0x3   :  { %v5455_v6 = vld [vmem:[%s9761_s3 + $0x48] sm:$0xff]  ;;  %v88_v7 = vld [vmem:[%s9761_s3 + $0x18] sm:$0xff]  ;;  %v5454_v8 = vld [vmem:[%s9761_s3 + $0x40] sm:$0xff]  ;;  %vm842_vm9 = vcmask 1044484   ;;  %vm844_vm10 = vcmask 1045509   ;;  %vm846_vm11 = vcmask 1046534  }
   0x4   :  { %77 = vmatpush.msra.mxu0 %v52_v1  ;;  %7479 = vmatpush.msra.mxu3 %v52_v1  ;;  %v87_v9 = vld [vmem:[%s9761_s3 + $0x10] sm:$0xff]  ;;  %v86_v10 = vld [vmem:[%s9761_s3 + $0x8] sm:$0xff]  ;;  %v85_v11 = vld [vmem:[%s9761_s3] sm:$0xff]  ;;  %v43_v28 = vmul.u32 4, %v42_v24  ;;  %vm848_vm12 = vcmask 1047559  }
   0x5   :  { %5444 = vmatmul.msk.f32.vlgmr.msra.gmra.mxu0 %vm55_vm0, %v50_v2  ;;  %5445 = vmatmul.msk.f32.vlgmr.msra.gmra.mxu3 %vm55_vm0, %v51_v3  ;;  %v5451_v12 = vld [vmem:[%s9761_s3 + $0x38] sm:$0xff]  ;;  %v5450_v13 = vld [vmem:[%s9761_s3 + $0x30] sm:$0xff]  ;;  %v5449_v14 = vld [vmem:[%s9761_s3 + $0x28] sm:$0xff] }
   0x6   :  { %167 = vmatpush.msrb.mxu3 %v5457_v4  ;;  %7480 = vmatpush.msra.mxu2 %v88_v7  ;;  %v5448_v15 = vld [vmem:[%s9761_s3 + $0x20] sm:$0xff]  ;;  %v45_v33 = vadd.s32 4, %v43_v28  ;;  %vm44_vm2 = vcmp.ge.s32.totalorder %v40_v32, %v43_v28 }
   0x7   :  { %109 = vmatpush.msra.mxu1 %v88_v7  ;;  %v36_v16 = vld [vmem:[%s9762_s2] sm:$0xff] }
   0x8   :  { %168 = vmatpush.msrb.mxu3 %v5456_v5  ;;  %7481 = vmatpush.msra.mxu2 %v87_v9  ;;  %v54_v17 = vperm.slane %v36_v16, 0  ;;  %v154_v23 = vperm.slane %v36_v16, 3  ;;  %v89_v29 = vperm.slane %v36_v16, 1  ;;  %v125_v37 = vperm.slane %v36_v16, 2 }
   0x9   :  { %110 = vmatpush.msra.mxu1 %v87_v9  ;;  %vm46_vm3 = vcmp.lt.s32.totalorder %v40_v32, %v45_v33 }
   0xa   :  { %169 = vmatpush.msrb.mxu3 %v5455_v6  ;;  %7482 = vmatpush.msra.mxu2 %v86_v10  ;;  %vm47_vm4 = vmand %vm44_vm2, %vm46_vm3 }
   0xb   :  { %111 = vmatpush.msra.mxu1 %v86_v10  ;;  %v7764_v43 = vsel %vm47_vm4, 1.0, %v7636_v42 }
   0xc   :  { %170 = vmatpush.msrb.mxu3 %v5454_v8  ;;  %7483 = vmatpush.msra.mxu2 %v85_v11 }
   0xd   :  { %112 = vmatpush.msra.mxu1 %v85_v11 }
   0xe   :  { %138 = vmatpush.msrb.mxu2 %v5451_v12 }
  0x10   :  { %139 = vmatpush.msrb.mxu2 %v5450_v13 }
  0x12   :  { %140 = vmatpush.msrb.mxu2 %v5449_v14 }
  0x14   :  { %141 = vmatpush.msrb.mxu2 %v5448_v15 }
  0x82   :  { %v79_v18 = vpop.f32.mrf.mxu0 }
  0x83   :  { %v7744_v19 = vadd.f32 %v79_v18, %v54_v17 }
  0x85   :  { %5458 = vmatmul.msk.f32.vlgmr.msrb.gmra.mxu3 %vm90_vm1, %v7744_v19  ;;  %5446 = vmatmul.msk.f32.vlgmr.msra.gmra.mxu1 %vm90_vm1, %v7744_v19 }
  0x88   :  { %v82_v20 = vpop.f32.mrf.mxu3 }
  0x89   :  { %v7750_v21 = vadd.f32 %v82_v20, %v54_v17 }
  0x8b   :  { %5447 = vmatmul.msk.f32.vlgmr.msra.gmra.mxu2 %vm90_vm1, %v7750_v21 }
  0x8d   :  { %5459 = vmatmul.msk.f32.gmra.mxu3 %vm90_vm1, %v7750_v21 }
  0x93   :  { %5452 = vmatmul.msk.f32.vlgmr.msrb.gmra.mxu2 %vm90_vm1, %v7744_v19 }
  0x9b   :  { %5453 = vmatmul.msk.f32.gmra.mxu2 %vm90_vm1, %v7750_v21 }
 0x102   :  { %v114_v27 = vpop.f32.mrf.mxu1 }
 0x103   :  { %v115_v31 = vadd.f32 %v114_v27, %v89_v29 }
 0x105   :  { %v7760_v36 = vmul.f32 0.5, %v115_v31 }
 0x107   :  { %v196_v40 = vperm.slane %v7760_v36, 0  ;;  %v182_v46 = vrot.slane %v7760_v36, 1  ;;  %v183_v53 = vrot.slane %v7760_v36, 2  ;;  %v184_v59 = vrot.slane %v7760_v36, 3 }
 0x108   :  { %v172_v25 = vpop.f32.mrf.mxu3  ;;  %v185_v1 = vrot.slane %v7760_v36, 4  ;;  %v186_v7 = vrot.slane %v7760_v36, 5  ;;  %v187_v13 = vrot.slane %v7760_v36, 6  ;;  %v188_v20 = vrot.slane %v7760_v36, 7 }
 0x109   :  { %v173_v26 = vadd.f32 %v172_v25, %v154_v23  ;;  %v228_v45 = vmul.f32 %v7764_v43, %v196_v40  ;;  %v197_v48 = vperm.slane %v182_v46, 0  ;;  %v198_v55 = vperm.slane %v183_v53, 0 }
 0x10a   :  { %v199_v61 = vperm.slane %v184_v59, 0  ;;  %v200_v3 = vperm.slane %v185_v1, 0  ;;  %v201_v9 = vperm.slane %v186_v7, 0  ;;  %v202_v15 = vperm.slane %v187_v13, 0 }
 0x10b   :  { %596 = vmatpush.msra.mxu2 %v173_v26  ;;  %v229_v51 = vmul.f32 %v7764_v43, %v197_v48  ;;  %v230_v57 = vmul.f32 %v7764_v43, %v198_v55 }
 0x10c   :  { %v231_v63 = vmul.f32 %v7764_v43, %v199_v61  ;;  %v232_v5 = vmul.f32 %v7764_v43, %v200_v3  ;;  %v233_v11 = vmul.f32 %v7764_v43, %v201_v9  ;;  %v234_v17 = vmul.f32 %v7764_v43, %v202_v15 }
 0x10e   :  { %v117_v30 = vpop.f32.mrf.mxu2 }
 0x10f   :  { %v118_v38 = vadd.f32 %v117_v30, %v89_v29 }
 0x110   :  { %v175_v34 = vpop.f32.mrf.mxu3 }
 0x111   :  { %v176_v35 = vadd.f32 %v175_v34, %v154_v23  ;;  %v179_v44 = vmul.f32 0.5, %v118_v38  ;;  %v203_v23 = vperm.slane %v188_v20, 0 }
 0x113   :  { %661 = vmatpush.msra.mxu3 %v176_v35  ;;  %v204_v49 = vperm.slane %v179_v44, 0  ;;  %v189_v54 = vrot.slane %v179_v44, 1  ;;  %v190_v60 = vrot.slane %v179_v44, 2  ;;  %v191_v2 = vrot.slane %v179_v44, 3 }
 0x114   :  { %v192_v8 = vrot.slane %v179_v44, 4  ;;  %v193_v14 = vrot.slane %v179_v44, 5  ;;  %v194_v22 = vrot.slane %v179_v44, 6  ;;  %v235_v25 = vmul.f32 %v7764_v43, %v203_v23 }
 0x115   :  { %v236_v52 = vmul.f32 %v7764_v43, %v204_v49  ;;  %v205_v56 = vperm.slane %v189_v54, 0  ;;  %v206_v62 = vperm.slane %v190_v60, 0  ;;  %v207_v4 = vperm.slane %v191_v2, 0 }
 0x116   :  { %v143_v39 = vpop.f32.mrf.mxu2  ;;  %v208_v10 = vperm.slane %v192_v8, 0  ;;  %v209_v16 = vperm.slane %v193_v14, 0  ;;  %v210_v24 = vperm.slane %v194_v22, 0  ;;  %v195_v27 = vrot.slane %v179_v44, 7 }
 0x117   :  { %v144_v41 = vadd.f32 %v143_v39, %v125_v37  ;;  %v237_v58 = vmul.f32 %v7764_v43, %v205_v56  ;;  %v238_v0 = vmul.f32 %v7764_v43, %v206_v62  ;;  %v239_v6 = vmul.f32 %v7764_v43, %v207_v4 }
 0x118   :  { %v240_v12 = vmul.f32 %v7764_v43, %v208_v10  ;;  %v241_v18 = vmul.f32 %v7764_v43, %v209_v16  ;;  %v242_v26 = vmul.f32 %v7764_v43, %v210_v24  ;;  %v211_v28 = vperm.slane %v195_v27, 0 }
 0x119   :  { %5460 = vmatpush.xpose.msk.msrb.mxu0 %vm90_vm1, %v144_v41 }
 0x11a   :  { %v243_v29 = vmul.f32 %v7764_v43, %v211_v28 }
 0x11c   :  { %5461 = vmatmul.msk.f32.vlgmr.msrb.gmra.mxu0 %vm90_vm1, %v228_v45 }
 0x11e   :  { %v146_v47 = vpop.f32.mrf.mxu2 }
 0x11f   :  { %v147_v50 = vadd.f32 %v146_v47, %v125_v37 }
 0x121   :  { %5469 = vmatpush.xpose.msk.msrb.mxu1 %vm90_vm1, %v147_v50 }
 0x124   :  { %5462 = vmatmul.msk.f32.gmra.mxu0 %vm90_vm1, %v229_v51  ;;  %5470 = vmatmul.msk.f32.vlgmr.msrb.gmra.mxu1 %vm90_vm1, %v236_v52 }
 0x12c   :  { %5463 = vmatmul.msk.f32.gmra.mxu0 %vm90_vm1, %v230_v57  ;;  %5471 = vmatmul.msk.f32.gmra.mxu1 %vm90_vm1, %v237_v58 }
 0x134   :  { %5464 = vmatmul.msk.f32.gmra.mxu0 %vm90_vm1, %v231_v63  ;;  %5472 = vmatmul.msk.f32.gmra.mxu1 %vm90_vm1, %v238_v0 }
 0x13c   :  { %5465 = vmatmul.msk.f32.gmra.mxu0 %vm90_vm1, %v232_v5  ;;  %5473 = vmatmul.msk.f32.gmra.mxu1 %vm90_vm1, %v239_v6 }
 0x144   :  { %5466 = vmatmul.msk.f32.gmra.mxu0 %vm90_vm1, %v233_v11  ;;  %5474 = vmatmul.msk.f32.gmra.mxu1 %vm90_vm1, %v240_v12 }
 0x14c   :  { %5467 = vmatmul.msk.f32.gmra.mxu0 %vm90_vm1, %v234_v17  ;;  %5475 = vmatmul.msk.f32.gmra.mxu1 %vm90_vm1, %v241_v18 }
 0x154   :  { %5468 = vmatmul.msk.f32.gmra.mxu0 %vm90_vm1, %v235_v25  ;;  %5476 = vmatmul.msk.f32.gmra.mxu1 %vm90_vm1, %v242_v26 }
 0x15c   :  { %5477 = vmatmul.msk.f32.gmra.mxu1 %vm90_vm1, %v243_v29 }
 0x199   :  { %v288_v30 = vpop.f32.mrf.mxu0 }
 0x19a   :  { %v381_v31 = vsel %vm380_vm5, %v288_v30, -inf }
 0x19b   :  { %382 = vmax.xlane.f32.xlu0 %v381_v31 }
 0x1a1   :  { %v291_v32 = vpop.f32.mrf.mxu0  ;;  %v356_v33 = vpop.f32.mrf.mxu1 }
 0x1a2   :  { %v405_v34 = vsel %vm380_vm5, %v356_v33, -inf  ;;  %v384_v35 = vsel %vm380_vm5, %v291_v32, -inf }
 0x1a3   :  { %406 = vmax.xlane.f32.xlu1 %v405_v34  ;;  %385 = vmax.xlane.f32.xlu0 %v384_v35 }
 0x1a9   :  { %v294_v36 = vpop.f32.mrf.mxu0  ;;  %v359_v37 = vpop.f32.mrf.mxu1 }
 0x1aa   :  { %v408_v38 = vsel %vm380_vm5, %v359_v37, -inf  ;;  %v387_v39 = vsel %vm380_vm5, %v294_v36, -inf }
 0x1ab   :  { %409 = vmax.xlane.f32.xlu2 %v408_v38  ;;  %388 = vmax.xlane.f32.xlu1 %v387_v39 }
 0x1b1   :  { %v7811_v40 = vpop.f32.mrf.mxu0  ;;  %v7813_v41 = vpop.f32.mrf.mxu1 }
 0x1b2   :  { %v411_v42 = vsel %vm380_vm5, %v7813_v41, -inf  ;;  %v390_v44 = vsel %vm380_vm5, %v7811_v40, -inf }
 0x1b3   :  { %412 = vmax.xlane.f32.xlu0 %v411_v42  ;;  %391 = vmax.xlane.f32.xlu2 %v390_v44 }
 0x1b9   :  { %v7819_v45 = vpop.f32.mrf.mxu0  ;;  %v7821_v46 = vpop.f32.mrf.mxu1 }
 0x1ba   :  { %v414_v47 = vsel %vm380_vm5, %v7821_v46, -inf  ;;  %v393_v48 = vsel %vm380_vm5, %v7819_v45, -inf }
 0x1bb   :  { %415 = vmax.xlane.f32.xlu2 %v414_v47  ;;  %394 = vmax.xlane.f32.xlu1 %v393_v48 }
 0x1c1   :  { %v7827_v49 = vpop.f32.mrf.mxu0  ;;  %v7829_v50 = vpop.f32.mrf.mxu1 }
 0x1c2   :  { %v417_v51 = vsel %vm380_vm5, %v7829_v50, -inf  ;;  %v396_v52 = vsel %vm380_vm5, %v7827_v49, -inf }
 0x1c3   :  { %418 = vmax.xlane.f32.xlu1 %v417_v51  ;;  %397 = vmax.xlane.f32.xlu0 %v396_v52 }
 0x1c9   :  { %v7835_v53 = vpop.f32.mrf.mxu0  ;;  %v7837_v54 = vpop.f32.mrf.mxu1 }
 0x1ca   :  { %v420_v55 = vsel %vm380_vm5, %v7837_v54, -inf  ;;  %v399_v56 = vsel %vm380_vm5, %v7835_v53, -inf }
 0x1cb   :  { %421 = vmax.xlane.f32.xlu0 %v420_v55  ;;  %400 = vmax.xlane.f32.xlu2 %v399_v56 }
 0x1d1   :  { %v7843_v57 = vpop.f32.mrf.mxu0  ;;  %v7845_v58 = vpop.f32.mrf.mxu1 }
 0x1d2   :  { %v423_v59 = vsel %vm380_vm5, %v7845_v58, -inf  ;;  %v402_v60 = vsel %vm380_vm5, %v7843_v57, -inf }
 0x1d3   :  { %424 = vmax.xlane.f32.xlu0 %v423_v59  ;;  %403 = vmax.xlane.f32.xlu2 %v402_v60 }
 0x1d9   :  { %v7851_v61 = vpop.f32.mrf.mxu1 }
 0x1da   :  { %v426_v62 = vsel %vm380_vm5, %v7851_v61, -inf }
 0x1db   :  { %427 = vmax.xlane.f32.xlu0 %v426_v62 }
 0x20e   :  { %v383_v63 = vpop.xlane.xlu0 %382 }
 0x20f   :  { %v429_v0 = vsub.f32 %v288_v30, %v383_v63 }
 0x211   :  { %v445_v1 = vmul.f32 1.442695, %v429_v0 }
 0x213   :  { %7487 = vpow2.f32 %v445_v1 }
 0x216   :  { %v407_v2 = vpop.xlane.xlu1 %406  ;;  %v386_v3 = vpop.xlane.xlu0 %385 }
 0x217   :  { %v437_v4 = vsub.f32 %v356_v33, %v407_v2  ;;  %v430_v5 = vsub.f32 %v291_v32, %v386_v3 }
 0x219   :  { %v7855_v6 = vpop.eup %7487  ;;  %v461_v7 = vmul.f32 1.442695, %v437_v4  ;;  %v447_v8 = vmul.f32 1.442695, %v430_v5 }
 0x21a   :  { %v477_v9 = vsel %vm380_vm5, %v7855_v6, 0.0 }
 0x21b   :  { %7489 = vpow2.f32 %v461_v7  ;;  %478 = vadd.xlane.f32.xlu1 %v477_v9 }
 0x21c   :  { %7491 = vpow2.f32 %v447_v8 }
 0x21e   :  { %v410_v10 = vpop.xlane.xlu2 %409  ;;  %v389_v11 = vpop.xlane.xlu1 %388 }
 0x21f   :  { %v438_v12 = vsub.f32 %v359_v37, %v410_v10  ;;  %v431_v13 = vsub.f32 %v294_v36, %v389_v11 }
 0x221   :  { %v7859_v14 = vpop.eup %7489  ;;  %v463_v15 = vmul.f32 1.442695, %v438_v12  ;;  %v449_v16 = vmul.f32 1.442695, %v431_v13 }
 0x222   :  { %v7861_v17 = vpop.eup %7491  ;;  %v501_v18 = vsel %vm380_vm5, %v7859_v14, 0.0 }
 0x223   :  { %7493 = vpow2.f32 %v463_v15  ;;  %v480_v20 = vsel %vm380_vm5, %v7861_v17, 0.0  ;;  %502 = vadd.xlane.f32.xlu2 %v501_v18 }
 0x224   :  { %7495 = vpow2.f32 %v449_v16  ;;  %481 = vadd.xlane.f32.xlu1 %v480_v20 }
 0x226   :  { %v413_v22 = vpop.xlane.xlu0 %412  ;;  %v392_v23 = vpop.xlane.xlu2 %391 }
 0x227   :  { %v439_v24 = vsub.f32 %v7813_v41, %v413_v22  ;;  %v432_v25 = vsub.f32 %v7811_v40, %v392_v23 }
 0x229   :  { %v7869_v26 = vpop.eup %7493  ;;  %v465_v27 = vmul.f32 1.442695, %v439_v24  ;;  %v451_v28 = vmul.f32 1.442695, %v432_v25 }
 0x22a   :  { %v7871_v29 = vpop.eup %7495  ;;  %v504_v30 = vsel %vm380_vm5, %v7869_v26, 0.0 }
 0x22b   :  { %7497 = vpow2.f32 %v465_v27  ;;  %v483_v31 = vsel %vm380_vm5, %v7871_v29, 0.0  ;;  %505 = vadd.xlane.f32.xlu2 %v504_v30 }
 0x22c   :  { %7499 = vpow2.f32 %v451_v28  ;;  %484 = vadd.xlane.f32.xlu1 %v483_v31 }
 0x22e   :  { %v416_v32 = vpop.xlane.xlu2 %415  ;;  %v395_v33 = vpop.xlane.xlu1 %394 }
 0x22f   :  { %v440_v34 = vsub.f32 %v7821_v46, %v416_v32  ;;  %v433_v35 = vsub.f32 %v7819_v45, %v395_v33 }
 0x231   :  { %v7879_v36 = vpop.eup %7497  ;;  %v467_v37 = vmul.f32 1.442695, %v440_v34  ;;  %v453_v38 = vmul.f32 1.442695, %v433_v35 }
 0x232   :  { %v7881_v39 = vpop.eup %7499  ;;  %v507_v40 = vsel %vm380_vm5, %v7879_v36, 0.0 }
 0x233   :  { %7501 = vpow2.f32 %v467_v37  ;;  %v486_v41 = vsel %vm380_vm5, %v7881_v39, 0.0 }
 0x234   :  { %7503 = vpow2.f32 %v453_v38  ;;  %508 = vadd.xlane.f32.xlu1 %v507_v40  ;;  %487 = vadd.xlane.f32.xlu0 %v486_v41 }
 0x236   :  { %v419_v42 = vpop.xlane.xlu1 %418  ;;  %v398_v44 = vpop.xlane.xlu0 %397 }
 0x237   :  { %v441_v45 = vsub.f32 %v7829_v50, %v419_v42  ;;  %v434_v46 = vsub.f32 %v7827_v49, %v398_v44 }
 0x239   :  { %v7889_v47 = vpop.eup %7501  ;;  %v469_v48 = vmul.f32 1.442695, %v441_v45  ;;  %v455_v51 = vmul.f32 1.442695, %v434_v46 }
 0x23a   :  { %v7891_v52 = vpop.eup %7503  ;;  %v510_v55 = vsel %vm380_vm5, %v7889_v47, 0.0 }
 0x23b   :  { %7505 = vpow2.f32 %v469_v48  ;;  %v489_v56 = vsel %vm380_vm5, %v7891_v52, 0.0 }
 0x23c   :  { %7507 = vpow2.f32 %v455_v51  ;;  %511 = vadd.xlane.f32.xlu0 %v510_v55  ;;  %490 = vadd.xlane.f32.xlu2 %v489_v56 }
 0x23e   :  { %v422_v59 = vpop.xlane.xlu0 %421  ;;  %v401_v50 = vpop.xlane.xlu2 %400 }
 0x23f   :  { %v442_v49 = vsub.f32 %v7837_v54, %v422_v59  ;;  %v435_v60 = vsub.f32 %v7835_v53, %v401_v50 }
 0x241   :  { %v7899_v62 = vpop.eup %7505  ;;  %v471_v63 = vmul.f32 1.442695, %v442_v49  ;;  %v457_v0 = vmul.f32 1.442695, %v435_v60 }
 0x242   :  { %v7901_v1 = vpop.eup %7507  ;;  %v513_v2 = vsel %vm380_vm5, %v7899_v62, 0.0 }
 0x243   :  { %7509 = vpow2.f32 %v471_v63  ;;  %v492_v3 = vsel %vm380_vm5, %v7901_v1, 0.0 }
 0x244   :  { %7511 = vpow2.f32 %v457_v0  ;;  %493 = vadd.xlane.f32.xlu1 %v492_v3  ;;  %514 = vadd.xlane.f32.xlu2 %v513_v2 }
 0x246   :  { %v425_v4 = vpop.xlane.xlu0 %424  ;;  %v404_v54 = vpop.xlane.xlu2 %403 }
 0x247   :  { %v443_v53 = vsub.f32 %v7845_v58, %v425_v4  ;;  %v436_v5 = vsub.f32 %v7843_v57, %v404_v54 }
 0x249   :  { %v7909_v7 = vpop.eup %7509  ;;  %v473_v8 = vmul.f32 1.442695, %v443_v53  ;;  %v459_v9 = vmul.f32 1.442695, %v436_v5 }
 0x24a   :  { %v7911_v10 = vpop.eup %7511  ;;  %v516_v11 = vsel %vm380_vm5, %v7909_v7, 0.0 }
 0x24b   :  { %7513 = vpow2.f32 %v473_v8  ;;  %v495_v12 = vsel %vm380_vm5, %v7911_v10, 0.0 }
 0x24c   :  { %7515 = vpow2.f32 %v459_v9  ;;  %517 = vadd.xlane.f32.xlu1 %v516_v11  ;;  %496 = vadd.xlane.f32.xlu0 %v495_v12 }
 0x24e   :  { %v428_v13 = vpop.xlane.xlu0 %427 }
 0x24f   :  { %v444_v58 = vsub.f32 %v7851_v61, %v428_v13  ;;  %v818_v13 = vld [vmem:[%s9763_s4 + $0x18] sm:$0xff] }
 0x250   :  { %873 = vmatpush.msra.mxu0 %v818_v13 }
 0x251   :  { %v7918_v57 = vpop.eup %7513  ;;  %v475_v15 = vmul.f32 1.442695, %v444_v58 }
 0x252   :  { %v7920_v16 = vpop.eup %7515  ;;  %v519_v18 = vsel %vm380_vm5, %v7918_v57, 0.0 }
 0x253   :  { %7517 = vpow2.f32 %v475_v15  ;;  %v498_v20 = vsel %vm380_vm5, %v7920_v16, 0.0 }
 0x254   :  { %520 = vadd.xlane.f32.xlu0 %v519_v18  ;;  %499 = vadd.xlane.f32.xlu2 %v498_v20  ;;  %v817_v20 = vld [vmem:[%s9763_s4 + $0x10] sm:$0xff] }
 0x255   :  { %874 = vmatpush.msra.mxu0 %v817_v20 }
 0x259   :  { %v7926_v22 = vpop.eup %7517 }
 0x25a   :  { %v522_v23 = vsel %vm380_vm5, %v7926_v22, 0.0 }
 0x25b   :  { %523 = vadd.xlane.f32.xlu1 %v522_v23 }
 0x28e   :  { %v479_v61 = vpop.xlane.xlu1 %478 }
 0x28f   :  { %7519 = vrcp.f32 %v479_v61 }
 0x295   :  { %v7520_v24 = vpop.eup %7519 }
 0x296   :  { %v541_v25 = vmul.f32 %v7520_v24, %v7855_v6  ;;  %v503_v27 = vpop.xlane.xlu2 %502 }
 0x297   :  { %v482_v28 = vpop.xlane.xlu1 %481  ;;  %7521 = vrcp.f32 %v503_v27 }
 0x298   :  { %7523 = vrcp.f32 %v482_v28  ;;  %5478 = vmatmul.msk.f32.vlgmr.msra.gmra.mxu2 %vm380_vm5, %v541_v25 }
 0x29d   :  { %v7522_v30 = vpop.eup %7521 }
 0x29e   :  { %v7524_v31 = vpop.eup %7523  ;;  %v549_v32 = vmul.f32 %v7522_v30, %v7859_v14  ;;  %v506_v33 = vpop.xlane.xlu2 %505 }
 0x29f   :  { %v485_v34 = vpop.xlane.xlu1 %484  ;;  %7525 = vrcp.f32 %v506_v33  ;;  %v542_v35 = vmul.f32 %v7524_v31, %v7861_v17 }
 0x2a0   :  { %7527 = vrcp.f32 %v485_v34  ;;  %5486 = vmatmul.msk.f32.vlgmr.msra.gmra.mxu3 %vm380_vm5, %v549_v32  ;;  %v816_v34 = vld [vmem:[%s9763_s4 + $0x8] sm:$0xff] }
 0x2a1   :  { %5479 = vmatmul.msk.f32.gmra.mxu2 %vm380_vm5, %v542_v35  ;;  %875 = vmatpush.msra.mxu0 %v816_v34 }
 0x2a5   :  { %v7526_v6 = vpop.eup %7525 }
 0x2a6   :  { %v7528_v37 = vpop.eup %7527  ;;  %v550_v38 = vmul.f32 %v7526_v6, %v7869_v26 }
 0x2a7   :  { %v509_v40 = vpop.xlane.xlu1 %508  ;;  %v488_v41 = vpop.xlane.xlu0 %487  ;;  %v543_v42 = vmul.f32 %v7528_v37, %v7871_v29 }
 0x2a8   :  { %7529 = vrcp.f32 %v509_v40  ;;  %5487 = vmatmul.msk.f32.gmra.mxu3 %vm380_vm5, %v550_v38  ;;  %v815_v40 = vld [vmem:[%s9763_s4] sm:$0xff] }
 0x2a9   :  { %7531 = vrcp.f32 %v488_v41  ;;  %5480 = vmatmul.msk.f32.gmra.mxu2 %vm380_vm5, %v543_v42  ;;  %876 = vmatpush.msra.mxu0 %v815_v40 }
 0x2ae   :  { %v7530_v14 = vpop.eup %7529 }
 0x2af   :  { %v7532_v17 = vpop.eup %7531  ;;  %v512_v44 = vpop.xlane.xlu0 %511  ;;  %v551_v46 = vmul.f32 %v7530_v14, %v7879_v36 }
 0x2b0   :  { %v491_v45 = vpop.xlane.xlu2 %490  ;;  %7533 = vrcp.f32 %v512_v44  ;;  %v544_v48 = vmul.f32 %v7532_v17, %v7881_v39 }
 0x2b1   :  { %7535 = vrcp.f32 %v491_v45  ;;  %5488 = vmatmul.msk.f32.gmra.mxu3 %vm380_vm5, %v551_v46 }
 0x2b2   :  { %5481 = vmatmul.msk.f32.gmra.mxu2 %vm380_vm5, %v544_v48 }
 0x2b6   :  { %v7534_v26 = vpop.eup %7533 }
 0x2b7   :  { %v7536_v29 = vpop.eup %7535  ;;  %v494_v51 = vpop.xlane.xlu1 %493  ;;  %v552_v56 = vmul.f32 %v7534_v26, %v7889_v47 }
 0x2b8   :  { %v515_v55 = vpop.xlane.xlu2 %514  ;;  %7537 = vrcp.f32 %v494_v51  ;;  %v545_v59 = vmul.f32 %v7536_v29, %v7891_v52 }
 0x2b9   :  { %7539 = vrcp.f32 %v515_v55  ;;  %5489 = vmatmul.msk.f32.gmra.mxu3 %vm380_vm5, %v552_v56 }
 0x2ba   :  { %5482 = vmatmul.msk.f32.gmra.mxu2 %vm380_vm5, %v545_v59 }
 0x2be   :  { %v7538_v36 = vpop.eup %7537 }
 0x2bf   :  { %v7540_v39 = vpop.eup %7539  ;;  %v518_v50 = vpop.xlane.xlu1 %517  ;;  %v546_v60 = vmul.f32 %v7538_v36, %v7901_v1 }
 0x2c0   :  { %v497_v49 = vpop.xlane.xlu0 %496  ;;  %7541 = vrcp.f32 %v518_v50  ;;  %v553_v63 = vmul.f32 %v7540_v39, %v7899_v62 }
 0x2c1   :  { %7543 = vrcp.f32 %v497_v49 }
 0x2c2   :  { %5483 = vmatmul.msk.f32.gmra.mxu2 %vm380_vm5, %v546_v60  ;;  %5490 = vmatmul.msk.f32.gmra.mxu3 %vm380_vm5, %v553_v63 }
 0x2c6   :  { %v7542_v47 = vpop.eup %7541 }
 0x2c7   :  { %v7544_v52 = vpop.eup %7543  ;;  %v500_v2 = vpop.xlane.xlu2 %499  ;;  %v554_v3 = vmul.f32 %v7542_v47, %v7909_v7 }
 0x2c8   :  { %v521_v0 = vpop.xlane.xlu0 %520  ;;  %v547_v4 = vmul.f32 %v7544_v52, %v7911_v10 }
 0x2c9   :  { %7545 = vrcp.f32 %v521_v0 }
 0x2ca   :  { %7547 = vrcp.f32 %v500_v2  ;;  %5484 = vmatmul.msk.f32.gmra.mxu2 %vm380_vm5, %v547_v4  ;;  %5491 = vmatmul.msk.f32.gmra.mxu3 %vm380_vm5, %v554_v3 }
 0x2ce   :  { %v524_v1 = vpop.xlane.xlu1 %523 }
 0x2cf   :  { %v7546_v62 = vpop.eup %7545  ;;  %7549 = vrcp.f32 %v524_v1 }
 0x2d0   :  { %v7548_v54 = vpop.eup %7547  ;;  %v555_v53 = vmul.f32 %v7546_v62, %v7918_v57 }
 0x2d1   :  { %v548_v5 = vmul.f32 %v7548_v54, %v7920_v16 }
 0x2d2   :  { %5492 = vmatmul.msk.f32.gmra.mxu3 %vm380_vm5, %v555_v53 }
 0x2d3   :  { %5485 = vmatmul.msk.f32.gmra.mxu2 %vm380_vm5, %v548_v5 }
 0x2d5   :  { %v7550_v7 = vpop.eup %7549 }
 0x2d6   :  { %v556_v8 = vmul.f32 %v7550_v7, %v7926_v22 }
 0x2da   :  { %5493 = vmatmul.msk.f32.gmra.mxu3 %vm380_vm5, %v556_v8 }
 0x31b   :  { %v598_v9 = vpop.f32.mrf.mxu2 }
 0x31c   :  { %v687_v16 = vmul.f32 %v7764_v43, %v598_v9 }
 0x31e   :  { %v703_v22 = vsel %vm90_vm1, %v687_v16, 0.0 }
 0x31f   :  { %v704_v28 = vrot.slane %v703_v22, 4 }
 0x321   :  { %v705_v35 = vadd.f32 %v704_v28, %v703_v22 }
 0x323   :  { %v663_v10 = vpop.f32.mrf.mxu3  ;;  %v706_v46 = vrot.slane %v705_v35, 2 }
 0x324   :  { %v601_v11 = vpop.f32.mrf.mxu2  ;;  %v695_v25 = vmul.f32 %v7764_v43, %v663_v10 }
 0x325   :  { %v688_v18 = vmul.f32 %v7764_v43, %v601_v11  ;;  %v707_v49 = vadd.f32 %v706_v46, %v705_v35 }
 0x326   :  { %v759_v31 = vsel %vm90_vm1, %v695_v25, 0.0 }
 0x327   :  { %v710_v61 = vsel %vm90_vm1, %v688_v18, 0.0  ;;  %v760_v41 = vrot.slane %v759_v31, 4  ;;  %v708_v8 = vrot.slane %v707_v49, 1 }
 0x328   :  { %v711_v30 = vrot.slane %v710_v61, 4 }
 0x329   :  { %v761_v55 = vadd.f32 %v760_v41, %v759_v31 }
 0x32a   :  { %v712_v37 = vadd.f32 %v711_v30, %v710_v61  ;;  %v709_v30 = vadd.f32 %v708_v8, %v707_v49 }
 0x32b   :  { %v666_v12 = vpop.f32.mrf.mxu3  ;;  %v762_v0 = vrot.slane %v761_v55, 2 }
 0x32c   :  { %v604_v58 = vpop.f32.mrf.mxu2  ;;  %v696_v38 = vmul.f32 %v7764_v43, %v666_v12  ;;  %v713_v26 = vrot.slane %v712_v37, 2 }
 0x32d   :  { %v689_v27 = vmul.f32 %v7764_v43, %v604_v58  ;;  %v8000_v22 = vadd.f32 %v762_v0, %v761_v55 }
 0x32e   :  { %v766_v29 = vsel %vm90_vm1, %v696_v38, 0.0  ;;  %v714_v52 = vadd.f32 %v713_v26, %v712_v37 }
 0x32f   :  { %v717_v32 = vsel %vm90_vm1, %v689_v27, 0.0  ;;  %v767_v60 = vrot.slane %v766_v29, 4 }
 0x330   :  { %v718_v42 = vrot.slane %v717_v32, 4  ;;  %v715_v12 = vrot.slane %v714_v52, 1 }
 0x331   :  { %v768_v9 = vadd.f32 %v767_v60, %v766_v29 }
 0x332   :  { %v719_v56 = vadd.f32 %v718_v42, %v717_v32  ;;  %v716_v31 = vadd.f32 %v715_v12, %v714_v52 }
 0x334   :  { %v669_v57 = vpop.f32.mrf.mxu3  ;;  %v720_v2 = vrot.slane %v719_v56, 2 }
 0x335   :  { %v607_v15 = vpop.f32.mrf.mxu2  ;;  %v697_v36 = vmul.f32 %v7764_v43, %v669_v57 }
 0x336   :  { %v690_v33 = vmul.f32 %v7764_v43, %v607_v15  ;;  %v721_v15 = vadd.f32 %v720_v2, %v719_v56 }
 0x337   :  { %v773_v4 = vsel %vm90_vm1, %v697_v36, 0.0 }
 0x338   :  { %v724_v44 = vsel %vm90_vm1, %v690_v33, 0.0  ;;  %v774_v13 = vrot.slane %v773_v4, 4  ;;  %v722_v33 = vrot.slane %v721_v15, 1 }
 0x339   :  { %v725_v59 = vrot.slane %v724_v44, 4 }
 0x33a   :  { %v775_v32 = vadd.f32 %v774_v13, %v773_v4 }
 0x33b   :  { %v726_v3 = vadd.f32 %v725_v59, %v724_v44 }
 0x33c   :  { %v672_v23 = vpop.f32.mrf.mxu3 }
 0x33d   :  { %v610_v24 = vpop.f32.mrf.mxu2  ;;  %v698_v50 = vmul.f32 %v7764_v43, %v672_v23  ;;  %v727_v16 = vrot.slane %v726_v3, 2 }
 0x33e   :  { %v691_v6 = vmul.f32 %v7764_v43, %v610_v24  ;;  %v769_v24 = vrot.slane %v768_v9, 2 }
 0x33f   :  { %v780_v53 = vsel %vm90_vm1, %v698_v50, 0.0  ;;  %v728_v34 = vadd.f32 %v727_v16, %v726_v3  ;;  %v723_v50 = vadd.f32 %v722_v33, %v721_v15 }
 0x340   :  { %v731_v48 = vsel %vm90_vm1, %v691_v6, 0.0  ;;  %v781_v18 = vrot.slane %v780_v53, 4  ;;  %v770_v44 = vadd.f32 %v769_v24, %v768_v9 }
 0x341   :  { %v732_v39 = vrot.slane %v731_v48, 4  ;;  %v729_v55 = vrot.slane %v728_v34, 1 }
 0x342   :  { %v782_v35 = vadd.f32 %v781_v18, %v780_v53  ;;  %v771_v2 = vrot.slane %v770_v44, 1 }
 0x343   :  { %v733_v54 = vadd.f32 %v732_v39, %v731_v48  ;;  %v776_v48 = vrot.slane %v775_v32, 2  ;;  %v837_v39 = vsel %vm836_vm6, %v716_v31, %v709_v30 }
 0x344   :  { %v783_v56 = vrot.slane %v782_v35, 2  ;;  %v772_v24 = vadd.f32 %v771_v2, %v770_v44 }
 0x345   :  { %v613_v14 = vpop.f32.mrf.mxu2  ;;  %v675_v17 = vpop.f32.mrf.mxu3  ;;  %v734_v23 = vrot.slane %v733_v54, 2  ;;  %v777_v3 = vadd.f32 %v776_v48, %v775_v32 }
 0x346   :  { %v692_v45 = vmul.f32 %v7764_v43, %v613_v14  ;;  %v699_v47 = vmul.f32 %v7764_v43, %v675_v17  ;;  %v764_v17 = vrot.slane %v8000_v22, 1 }
 0x347   :  { %v735_v40 = vadd.f32 %v734_v23, %v733_v54 }
 0x348   :  { %v738_v51 = vsel %vm90_vm1, %v692_v45, 0.0  ;;  %v787_v11 = vsel %vm90_vm1, %v699_v47, 0.0 }
 0x349   :  { %v739_v63 = vrot.slane %v738_v51, 4  ;;  %v788_v61 = vrot.slane %v787_v11, 4  ;;  %v736_v49 = vrot.slane %v735_v40, 1 }
 0x34b   :  { %v740_v10 = vadd.f32 %v739_v63, %v738_v51  ;;  %v789_v41 = vadd.f32 %v788_v61, %v787_v11  ;;  %v737_v8 = vadd.f32 %v736_v49, %v735_v40 }
 0x34d   :  { %v616_v62 = vpop.f32.mrf.mxu2  ;;  %v678_v1 = vpop.f32.mrf.mxu3  ;;  %v741_v25 = vrot.slane %v740_v10, 2  ;;  %v790_v60 = vrot.slane %v789_v41, 2 }
 0x34e   :  { %v693_v5 = vmul.f32 %v7764_v43, %v616_v62  ;;  %v700_v7 = vmul.f32 %v7764_v43, %v678_v1  ;;  %v730_v62 = vadd.f32 %v729_v55, %v728_v34  ;;  %v784_v1 = vadd.f32 %v783_v56, %v782_v35  ;;  %v8029_v56 = vld [vmem:[%s9762_s2] sm:$0xff] }
 0x34f   :  { %v742_v45 = vadd.f32 %v741_v25, %v740_v10  ;;  %v791_v9 = vadd.f32 %v790_v60, %v789_v41 }
 0x350   :  { %v745_v58 = vsel %vm90_vm1, %v693_v5, 0.0  ;;  %v794_v57 = vsel %vm90_vm1, %v700_v7, 0.0  ;;  %v839_v7 = vsel %vm838_vm7, %v723_v50, %v837_v39 }
 0x351   :  { %v746_v20 = vrot.slane %v745_v58, 4  ;;  %v795_v28 = vrot.slane %v794_v57, 4  ;;  %v743_v63 = vrot.slane %v742_v45, 1  ;;  %v841_v18 = vsel %vm840_vm8, %v730_v62, %v839_v7 }
 0x352   :  { %v792_v25 = vrot.slane %v791_v9, 1 }
 0x353   :  { %v747_v27 = vadd.f32 %v746_v20, %v745_v58  ;;  %v796_v46 = vadd.f32 %v795_v28, %v794_v57  ;;  %v744_v11 = vadd.f32 %v743_v63, %v742_v45  ;;  %v778_v58 = vrot.slane %v777_v3, 1 }
 0x354   :  { %v785_v20 = vrot.slane %v784_v1, 1  ;;  %v793_v41 = vadd.f32 %v792_v25, %v791_v9  ;;  %v5572_v25 = vld [vmem:[%s9764_s5 + $0xc8] sm:$0xf0] }
 0x355   :  { %v748_v6 = vrot.slane %v747_v27, 2  ;;  %v681_v38 = vpop.f32.mrf.mxu3  ;;  %v797_v47 = vrot.slane %v796_v46, 2  ;;  %v779_v33 = vadd.f32 %v778_v58, %v777_v3 }
 0x356   :  { %v619_v37 = vpop.f32.mrf.mxu2  ;;  %v701_v14 = vmul.f32 %v7764_v43, %v681_v38 }
 0x357   :  { %v694_v42 = vmul.f32 %v7764_v43, %v619_v37  ;;  %v749_v26 = vadd.f32 %v748_v6, %v747_v27  ;;  %v798_v12 = vadd.f32 %v797_v47, %v796_v46  ;;  %v843_v27 = vsel %vm842_vm9, %v737_v8, %v841_v18 }
 0x358   :  { %v801_v51 = vsel %vm90_vm1, %v701_v14, 0.0  ;;  %v845_v32 = vsel %vm844_vm10, %v744_v11, %v843_v27  ;;  %v765_v6 = vadd.f32 %v764_v17, %v8000_v22  ;;  %v786_v37 = vadd.f32 %v785_v20, %v784_v1  ;;  %v5562_v20 = vld [vmem:[%s9764_s5 + $0x80] sm:$0xf] }
 0x359   :  { %v752_v29 = vsel %vm90_vm1, %v694_v42, 0.0  ;;  %v802_v36 = vrot.slane %v801_v51, 4  ;;  %v750_v4 = vrot.slane %v749_v26, 1  ;;  %v799_v28 = vrot.slane %v798_v12, 1 }
 0x35a   :  { %v753_v59 = vrot.slane %v752_v29, 4  ;;  %v850_v42 = vsel %vm836_vm6, %v772_v24, %v765_v6  ;;  %v5498_v6 = vld [vmem:[%s9764_s5] sm:$0xf] }
 0x35b   :  { %v803_v0 = vadd.f32 %v802_v36, %v801_v51  ;;  %v751_v57 = vadd.f32 %v750_v4, %v749_v26  ;;  %v800_v14 = vadd.f32 %v799_v28, %v798_v12  ;;  %v851_v46 = vsel %vm838_vm7, %v779_v33, %v850_v42  ;;  %v7174_v4 = vld [vmem:[%s9764_s5 + $0x84] sm:$0xf]  ;;  %v5506_v33 = vld [vmem:[%s9764_s5 + $0x8] sm:$0xf]  ;;  %v7159_v42 = vld [vmem:[%s9764_s5 + $0xc] sm:$0xf] }
 0x35c   :  { %v754_v52 = vadd.f32 %v753_v59, %v752_v29  ;;  %v852_v26 = vsel %vm840_vm8, %v786_v37, %v851_v46  ;;  %v819_v59 = vperm.slane %v8029_v56, 4  ;;  %v7166_v37 = vld [vmem:[%s9764_s5 + $0x3c] sm:$0xf0]  ;;  %v5578_v46 = vld [vmem:[%s9764_s5 + $0x90] sm:$0xf] }
 0x35d   :  { %v804_v53 = vrot.slane %v803_v0, 2  ;;  %v684_v5 = vpop.f32.mrf.mxu3  ;;  %v847_v35 = vsel %vm846_vm11, %v751_v57, %v845_v32  ;;  %v853_v29 = vsel %vm842_vm9, %v793_v41, %v852_v26  ;;  %v5500_v32 = vld [vmem:[%s9764_s5 + $0x40] sm:$0xf0]  ;;  %v5499_v41 = vor.u32 %v7166_v37, %v5498_v6  ;;  %v7176_v26 = vld [vmem:[%s9764_s5 + $0x94] sm:$0xf] }
 0x35e   :  { %v755_v54 = vrot.slane %v754_v52, 2  ;;  %v702_v10 = vmul.f32 %v7764_v43, %v684_v5  ;;  %v854_v17 = vsel %vm844_vm10, %v800_v14, %v853_v29  ;;  %v5508_v14 = vld [vmem:[%s9764_s5 + $0x48] sm:$0xf0]  ;;  %v7187_v6 = vld [vmem:[%s9764_s5 + $0xe4] sm:$0xf0] }
 0x35f   :  { %v805_v15 = vadd.f32 %v804_v53, %v803_v0  ;;  %v7637_v0 = vmov 32.0   ;;  %v7179_v37 = vld [vmem:[%s9764_s5 + $0xac] sm:$0xf] }
 0x360   :  { %v756_v13 = vadd.f32 %v755_v54, %v754_v52  ;;  %v808_v16 = vsel %vm90_vm1, %v702_v10, 0.0  ;;  %7551 = vrcp.f32 %v7637_v0  ;;  %v7160_v0 = vld [vmem:[%s9764_s5 + $0x14] sm:$0xf] }
 0x361   :  { %v809_v61 = vrot.slane %v808_v16, 4  ;;  %v806_v34 = vrot.slane %v805_v15, 1 }
 0x362   :  { %v757_v23 = vrot.slane %v756_v13, 1 }
 0x363   :  { %v810_v31 = vadd.f32 %v809_v61, %v808_v16  ;;  %v807_v45 = vadd.f32 %v806_v34, %v805_v15  ;;  %v5570_v15 = vld [vmem:[%s9764_s5 + $0x88] sm:$0xf]  ;;  %v7175_v61 = vld [vmem:[%s9764_s5 + $0x8c] sm:$0xf] }
 0x364   :  { %v758_v30 = vadd.f32 %v757_v23, %v756_v13  ;;  %v7183_v16 = vld [vmem:[%s9764_s5 + $0xc4] sm:$0xf0]  ;;  %v7182_v23 = vld [vmem:[%s9764_s5 + $0xbc] sm:$0xf0]  ;;  %v5575_v27 = vor.u32 %v7175_v61, %v5572_v25 }
 0x365   :  { %v811_v38 = vrot.slane %v810_v31, 2  ;;  %v855_v51 = vsel %vm846_vm11, %v807_v45, %v854_v17  ;;  %v5571_v18 = vor.u32 %v7183_v16, %v5570_v15  ;;  %v5563_v24 = vor.u32 %v7182_v23, %v5562_v20  ;;  %v5580_v17 = vld [vmem:[%s9764_s5 + $0xd0] sm:$0xf0] }
 0x366   :  { %v849_v40 = vsel %vm848_vm12, %v758_v30, %v847_v35  ;;  %v7552_v2 = vpop.eup %7551  ;;  %1223 = vmatpush.bf16.msrb.mxu0 %v5575_v27  ;;  %v7167_v35 = vld [vmem:[%s9764_s5 + $0x44] sm:$0xf0]  ;;  %v937_v23 = vperm.slane %v8029_v56, 5  ;;  %v940_v27 = vperm.slane %v8029_v56, 6  ;;  %v5596_v56 = vld [vmem:[%s9764_s5 + $0xe0] sm:$0xf0] }
 0x367   :  { %5494 = vmatmul.msk.f32.vlgmr.msra.gmra.mxu0 %vm90_vm1, %v849_v40  ;;  %v812_v44 = vadd.f32 %v811_v38, %v810_v31  ;;  %v893_v3 = vmul.f32 32.0, %v7552_v2  ;;  %vm897_vm13 = vweird.f32 %v7552_v2  ;;  %1209 = vmatpush.bf16.msrb.mxu3 %v5571_v18  ;;  %v7158_v31 = vld [vmem:[%s9764_s5 + $0x4] sm:$0xf]  ;;  %v5507_v40 = vor.u32 %v7167_v35, %v5506_v33  ;;  %v7186_v33 = vld [vmem:[%s9764_s5 + $0xdc] sm:$0xf0] }
 0x368   :  { %1181 = vmatpush.bf16.msra.mxu1 %v5563_v24  ;;  %v5503_v34 = vor.u32 %v7158_v31, %v5500_v32  ;;  %v5594_v32 = vld [vmem:[%s9764_s5 + $0xa0] sm:$0xf] }
 0x369   :  { %v813_v48 = vrot.slane %v812_v44, 1  ;;  %v894_v1 = vsub.f32 1.0, %v893_v3 }
 0x36b   :  { %v814_v22 = vadd.f32 %v813_v48, %v812_v44  ;;  %v895_v54 = vmul.f32 %v7552_v2, %v894_v1  ;;  %v5511_v44 = vor.u32 %v7159_v42, %v5508_v14  ;;  %1210 = vmatpush.bf16.msrb.mxu3 %v5507_v40  ;;  %v7184_v48 = vld [vmem:[%s9764_s5 + $0xcc] sm:$0xf0]  ;;  %v5530_v14 = vld [vmem:[%s9764_s5 + $0x20] sm:$0xf] }
 0x36c   :  { %1182 = vmatpush.bf16.msra.mxu1 %v5499_v41  ;;  %v5595_v41 = vor.u32 %v7186_v33, %v5594_v32  ;;  %v7211_v32 = vld [vmem:[%s9765_s7 + $0xa8] sm:$0xff]  ;;  %v7194_v33 = vld [vmem:[%s9765_s7 + $0x20] sm:$0xff] }
 0x36d   :  { %v856_v55 = vsel %vm848_vm12, %v814_v22, %v855_v51  ;;  %1224 = vmatpush.bf16.msrb.mxu0 %v5511_v44  ;;  %v5579_v22 = vor.u32 %v7184_v48, %v5578_v46  ;;  %v5586_v51 = vld [vmem:[%s9764_s5 + $0x98] sm:$0xf]  ;;  %v7170_v44 = vld [vmem:[%s9764_s5 + $0x5c] sm:$0xf0]  ;;  %v7162_v48 = vld [vmem:[%s9764_s5 + $0x24] sm:$0xf] }
 0x36f   :  { %5495 = vmatmul.msk.f32.gmra.mxu0 %vm90_vm1, %v856_v55  ;;  %v7185_v55 = vld [vmem:[%s9764_s5 + $0xd4] sm:$0xf0] }
 0x370   :  { %1237 = vmatpush.bf16.msrb.mxu1 %v5579_v22  ;;  %v7171_v22 = vld [vmem:[%s9764_s5 + $0x64] sm:$0xf0] }
 0x3e4   :  { %v878_v36 = vpop.f32.mrf.mxu0 }
 0x3e5   :  { %v879_v39 = vadd.f32 %v878_v36, %v819_v59  ;;  %v5587_v36 = vor.u32 %v7185_v55, %v5586_v51  ;;  %v5540_v51 = vld [vmem:[%s9764_s5 + $0x68] sm:$0xf0]  ;;  %v5531_v55 = vor.u32 %v7170_v44, %v5530_v14  ;;  %v7216_v14 = vld [vmem:[%s9765_s7 + $0xd0] sm:$0xff] }
 0x3e6   :  { %v7200_v44 = vld [vmem:[%s9765_s7 + $0x50] sm:$0xff] }
 0x3e7   :  { %v884_v50 = vadd.f32 %v879_v39, %v7744_v19  ;;  %v5564_v19 = vld [vmem:[%s9764_s5 + $0xc0] sm:$0xf0]  ;;  %v7177_v39 = vld [vmem:[%s9764_s5 + $0x9c] sm:$0xf]  ;;  %1265 = vmatpush.bf16.msra.mxu3 %v5587_v36 }
 0x3e8   :  { %v5567_v62 = vor.u32 %v7174_v4, %v5564_v19  ;;  %v5516_v4 = vld [vmem:[%s9764_s5 + $0x50] sm:$0xf0]  ;;  %v5522_v19 = vld [vmem:[%s9764_s5 + $0x18] sm:$0xf] }
 0x3e9   :  { %v886_v49 = vsel %vm90_vm1, %v884_v50, 0.0  ;;  %v5519_v1 = vor.u32 %v7160_v0, %v5516_v4  ;;  %v7181_v0 = vld [vmem:[%s9764_s5 + $0xbc] sm:$0xf] }
 0x3ea   :  { %887 = vadd.xlane.f32.xlu2 %v886_v49  ;;  %1195 = vmatpush.bf16.msrb.mxu2 %v5567_v62  ;;  %v5514_v49 = vld [vmem:[%s9764_s5 + $0x10] sm:$0xf]  ;;  %v7169_v62 = vld [vmem:[%s9764_s5 + $0x54] sm:$0xf0] }
 0x3ec   :  { %v881_v60 = vpop.f32.mrf.mxu0 }
 0x3ed   :  { %v882_v63 = vadd.f32 %v881_v60, %v819_v59  ;;  %v5583_v59 = vor.u32 %v7176_v26, %v5580_v17  ;;  %v5532_v26 = vld [vmem:[%s9764_s5 + $0x60] sm:$0xf0]  ;;  %v7163_v17 = vld [vmem:[%s9764_s5 + $0x2c] sm:$0xf] }
 0x3ee   :  { %1196 = vmatpush.bf16.msrb.mxu2 %v5503_v34 }
 0x3ef   :  { %v885_v47 = vadd.f32 %v882_v63, %v7750_v21  ;;  %v896_v21 = vadd.f32 %v7552_v2, %v895_v54  ;;  %v5523_v54 = vor.u32 %v7169_v62, %v5522_v19  ;;  %v5546_v19 = vld [vmem:[%s9764_s5 + $0x30] sm:$0xf] }
 0x3f0   :  { %v7172_v62 = vld [vmem:[%s9764_s5 + $0x6c] sm:$0xf0] }
 0x3f1   :  { %v889_v52 = vsel %vm90_vm1, %v885_v47, 0.0  ;;  %v8042_v53 = vsel %vm897_vm13, %v7552_v2, %v896_v21  ;;  %v7161_v21 = vld [vmem:[%s9764_s5 + $0x1c] sm:$0xf]  ;;  %1266 = vmatpush.bf16.msra.mxu3 %v5523_v54 }
 0x3f2   :  { %890 = vadd.xlane.f32.xlu0 %v889_v52  ;;  %v7168_v52 = vld [vmem:[%s9764_s5 + $0x4c] sm:$0xf0]  ;;  %1251 = vmatpush.bf16.msra.mxu2 %v5583_v59  ;;  %v5535_v59 = vor.u32 %v7162_v48, %v5532_v26  ;;  %v7199_v48 = vld [vmem:[%s9765_s7 + $0x48] sm:$0xff] }
 0x3f3   :  { %v5515_v3 = vor.u32 %v7168_v52, %v5514_v49  ;;  %v7188_v49 = vld [vmem:[%s9764_s5 + $0xec] sm:$0xf0]  ;;  %v7189_v52 = vld [vmem:[%s9764_s5 + $0xf4] sm:$0xf0]  ;;  %v7207_v26 = vld [vmem:[%s9765_s7 + $0x88] sm:$0xff] }
 0x3f5   :  { %1238 = vmatpush.bf16.msrb.mxu1 %v5515_v3 }
 0x3f6   :  { %1252 = vmatpush.bf16.msra.mxu2 %v5519_v1 }
 0x45d   :  { %v888_v5 = vpop.xlane.xlu2 %887 }
 0x45e   :  { %v899_v7 = vmul.f32 %v8042_v53, %v888_v5  ;;  %v5524_v5 = vld [vmem:[%s9764_s5 + $0x58] sm:$0xf0] }
 0x460   :  { %v8045_v8 = vsub.f32 %v884_v50, %v899_v7  ;;  %v5588_v50 = vld [vmem:[%s9764_s5 + $0xd8] sm:$0xf0] }
 0x462   :  { %v903_v9 = vmul.f32 %v8045_v8, %v8045_v8 }
 0x464   :  { %v905_v10 = vsel %vm90_vm1, %v903_v9, 0.0  ;;  %v5527_v9 = vor.u32 %v7161_v21, %v5524_v5  ;;  %v7164_v21 = vld [vmem:[%s9764_s5 + $0x34] sm:$0xf] }
 0x465   :  { %v891_v11 = vpop.xlane.xlu0 %890  ;;  %906 = vadd.xlane.f32.xlu1 %v905_v10  ;;  %v5548_v5 = vld [vmem:[%s9764_s5 + $0x70] sm:$0xf0] }
 0x466   :  { %v900_v12 = vmul.f32 %v8042_v53, %v891_v11 }
 0x468   :  { %v8051_v13 = vsub.f32 %v885_v47, %v900_v12  ;;  %v5591_v47 = vor.u32 %v7177_v39, %v5588_v50  ;;  %v5543_v39 = vor.u32 %v7163_v17, %v5540_v51  ;;  %v5610_v50 = vld [vmem:[%s9764_s5 + $0xb0] sm:$0xf]  ;;  %v7229_v17 = vld [vmem:[%s9765_s7 + $0x138] sm:$0xff] }
 0x469   :  { %v5611_v3 = vor.u32 %v7188_v49, %v5610_v50  ;;  %v7253_v51 = vld [vmem:[%s9765_s7 + $0x1f8] sm:$0xff]  ;;  %v7228_v50 = vld [vmem:[%s9765_s7 + $0x130] sm:$0xff] }
 0x46a   :  { %v904_v58 = vmul.f32 %v8051_v13, %v8051_v13  ;;  %1279 = vmatpush.bf16.msra.mxu0 %v5591_v47  ;;  %v5618_v47 = vld [vmem:[%s9764_s5 + $0xb8] sm:$0xf]  ;;  %v7252_v49 = vld [vmem:[%s9765_s7 + $0x1f0] sm:$0xff] }
 0x46b   :  { %v5619_v1 = vor.u32 %v7189_v52, %v5618_v47  ;;  %v7227_v47 = vld [vmem:[%s9765_s7 + $0x128] sm:$0xff] }
 0x46c   :  { %v908_v57 = vsel %vm90_vm1, %v904_v58, 0.0  ;;  %v7251_v52 = vld [vmem:[%s9765_s7 + $0x1e8] sm:$0xff] }
 0x46d   :  { %909 = vadd.xlane.f32.xlu2 %v908_v57 }
 0x46e   :  { %1280 = vmatpush.bf16.msra.mxu0 %v5527_v9  ;;  %v7173_v9 = vld [vmem:[%s9764_s5 + $0x74] sm:$0xf0] }
 0x4d8   :  { %v907_v28 = vpop.xlane.xlu1 %906 }
 0x4d9   :  { %v911_v30 = vmul.f32 %v907_v28, %v8042_v53 }
 0x4db   :  { %v913_v38 = vadd.f32 1e-05, %v911_v30 }
 0x4dd   :  { %7553 = vrsqrt.f32 %v913_v38  ;;  %vm921_vm15 = vweird.f32 %v913_v38 }
 0x4e0   :  { %v910_v45 = vpop.xlane.xlu2 %909 }
 0x4e1   :  { %v912_v29 = vmul.f32 %v910_v45, %v8042_v53 }
 0x4e3   :  { %v7554_v60 = vpop.eup %7553  ;;  %v914_v63 = vadd.f32 1e-05, %v912_v29  ;;  %v5538_v29 = vld [vmem:[%s9764_s5 + $0x28] sm:$0xf] }
 0x4e4   :  { %v916_v2 = vmul.f32 %v7554_v60, %v913_v38  ;;  %vm922_vm14 = vweird.f32 %v7554_v60  ;;  %v5604_v38 = vld [vmem:[%s9764_s5 + $0xe8] sm:$0xf0]  ;;  %v5539_v36 = vor.u32 %v7171_v22, %v5538_v29  ;;  %v7190_v29 = vld [vmem:[%s9765_s7] sm:$0xff] }
 0x4e5   :  { %7555 = vrsqrt.f32 %v914_v63  ;;  %vm923_vm0 = vmor %vm921_vm15, %vm922_vm14  ;;  %vm931_vm3 = vweird.f32 %v914_v63  ;;  %v5607_v46 = vor.u32 %v7179_v37, %v5604_v38  ;;  %v7217_v37 = vld [vmem:[%s9765_s7 + $0xd8] sm:$0xff]  ;;  %v7214_v22 = vld [vmem:[%s9765_s7 + $0xc0] sm:$0xff] }
 0x4e6   :  { %v917_v7 = vmul.f32 %v7554_v60, %v916_v2  ;;  %v5620_v2 = vld [vmem:[%s9764_s5 + $0xf8] sm:$0xf0] }
 0x4e7   :  { %v5623_v54 = vor.u32 %v7181_v0, %v5620_v2  ;;  %v7201_v38 = vld [vmem:[%s9765_s7 + $0x58] sm:$0xff]  ;;  %v7226_v0 = vld [vmem:[%s9765_s7 + $0x120] sm:$0xff] }
 0x4e8   :  { %v918_v10 = vmul.f32 0.5, %v917_v7  ;;  %v5554_v7 = vld [vmem:[%s9764_s5 + $0x38] sm:$0xf]  ;;  %v7250_v2 = vld [vmem:[%s9765_s7 + $0x1e0] sm:$0xff] }
 0x4ea   :  { %v919_v11 = vsub.f32 1.5, %v918_v10  ;;  %v7165_v10 = vld [vmem:[%s9764_s5 + $0x3c] sm:$0xf] }
 0x4eb   :  { %v7556_v12 = vpop.eup %7555 }
 0x4ec   :  { %v920_v58 = vmul.f32 %v7554_v60, %v919_v11  ;;  %v926_v57 = vmul.f32 %v7556_v12, %v914_v63  ;;  %vm932_vm2 = vweird.f32 %v7556_v12  ;;  %v5612_v63 = vld [vmem:[%s9764_s5 + $0xf0] sm:$0xf0]  ;;  %v5556_v11 = vld [vmem:[%s9764_s5 + $0x78] sm:$0xf0] }
 0x4ed   :  { %vm933_vm4 = vmor %vm931_vm3, %vm932_vm2 }
 0x4ee   :  { %v927_v15 = vmul.f32 %v7556_v12, %v926_v57  ;;  %v924_v16 = vsel %vm923_vm0, %v7554_v60, %v920_v58  ;;  %v7180_v60 = vld [vmem:[%s9764_s5 + $0xb4] sm:$0xf]  ;;  %v5551_v58 = vor.u32 %v7164_v21, %v5548_v5  ;;  %v5555_v57 = vor.u32 %v7173_v9, %v5554_v7  ;;  %v7233_v7 = vld [vmem:[%s9765_s7 + $0x158] sm:$0xff] }
 0x4ef   :  { %v935_v61 = vmul.f32 %v924_v16, %v8045_v8  ;;  %v7178_v8 = vld [vmem:[%s9764_s5 + $0xa4] sm:$0xf]  ;;  %v5615_v4 = vor.u32 %v7180_v60, %v5612_v63  ;;  %v7197_v16 = vld [vmem:[%s9765_s7 + $0x38] sm:$0xff]  ;;  %v7236_v60 = vld [vmem:[%s9765_s7 + $0x170] sm:$0xff] }
 0x4f0   :  { %v928_v18 = vmul.f32 0.5, %v927_v15  ;;  %v5599_v42 = vor.u32 %v7178_v8, %v5596_v56  ;;  %v5559_v15 = vor.u32 %v7165_v10, %v5556_v11  ;;  %v7218_v8 = vld [vmem:[%s9765_s7 + $0xe0] sm:$0xff]  ;;  %v7244_v63 = vld [vmem:[%s9765_s7 + $0x1b0] sm:$0xff]  ;;  %v7241_v9 = vld [vmem:[%s9765_s7 + $0x198] sm:$0xff] }
 0x4f1   :  { %v938_v28 = vmul.f32 %v937_v23, %v935_v61  ;;  %v7196_v61 = vld [vmem:[%s9765_s7 + $0x30] sm:$0xff]  ;;  %v7202_v56 = vld [vmem:[%s9765_s7 + $0x60] sm:$0xff]  ;;  %v7223_v10 = vld [vmem:[%s9765_s7 + $0x108] sm:$0xff] }
 0x4f2   :  { %v929_v20 = vsub.f32 1.5, %v928_v18  ;;  %v7221_v18 = vld [vmem:[%s9765_s7 + $0xf8] sm:$0xff]  ;;  %v7224_v21 = vld [vmem:[%s9765_s7 + $0x110] sm:$0xff]  ;;  %v7247_v11 = vld [vmem:[%s9765_s7 + $0x1c8] sm:$0xff] }
 0x4f3   :  { %v8167_v34 = vadd.f32 %v940_v27, %v938_v28  ;;  %v7195_v28 = vld [vmem:[%s9765_s7 + $0x28] sm:$0xff]  ;;  %v7248_v5 = vld [vmem:[%s9765_s7 + $0x1d0] sm:$0xff] }
 0x4f4   :  { %v930_v24 = vmul.f32 %v7556_v12, %v929_v20  ;;  %v7205_v20 = vld [vmem:[%s9765_s7 + $0x78] sm:$0xff] }
 0x4f6   :  { %v934_v25 = vsel %vm933_vm4, %v7556_v12, %v930_v24  ;;  %v5547_v12 = vor.u32 %v7172_v62, %v5546_v19  ;;  %v7220_v24 = vld [vmem:[%s9765_s7 + $0xf0] sm:$0xff]  ;;  %v7225_v19 = vld [vmem:[%s9765_s7 + $0x118] sm:$0xff] }
 0x4f7   :  { %v936_v30 = vmul.f32 %v934_v25, %v8051_v13  ;;  %v5602_v13 = vld [vmem:[%s9764_s5 + $0xa8] sm:$0xf]  ;;  %v7204_v25 = vld [vmem:[%s9765_s7 + $0x70] sm:$0xff]  ;;  %v7249_v62 = vld [vmem:[%s9765_s7 + $0x1d8] sm:$0xff] }
 0x4f8   :  { %v5603_v45 = vor.u32 %v7187_v6, %v5602_v13  ;;  %v7210_v13 = vld [vmem:[%s9765_s7 + $0xa0] sm:$0xff]  ;;  %v7193_v6 = vld [vmem:[%s9765_s7 + $0x18] sm:$0xff] }
 0x4f9   :  { %v939_v31 = vmul.f32 %v937_v23, %v936_v30  ;;  %v7213_v23 = vld [vmem:[%s9765_s7 + $0xb8] sm:$0xff]  ;;  %v7219_v30 = vld [vmem:[%s9765_s7 + $0xe8] sm:$0xff] }
 0x4fb   :  { %v8169_v35 = vadd.f32 %v940_v27, %v939_v31  ;;  %v7212_v27 = vld [vmem:[%s9765_s7 + $0xb0] sm:$0xff]  ;;  %v7203_v31 = vld [vmem:[%s9765_s7 + $0x68] sm:$0xff] }
 0x4fd   :  { %v8182_v40 = vpack.c.bf16 %v8169_v35, %v8167_v34 }
 0x4ff   :  { %5624 = vmatmul.msk.bf16.vlgmr.msra.gmra.mxu1 %vm90_vm1, %v8182_v40  ;;  %5625 = vmatmul.msk.bf16.vlgmr.msrb.gmra.mxu2 %vm90_vm1, %v8182_v40 }
 0x500   :  { %5626 = vmatmul.msk.bf16.vlgmr.msrb.gmra.mxu3 %vm90_vm1, %v8182_v40  ;;  %5627 = vmatmul.msk.bf16.vlgmr.msrb.gmra.mxu0 %vm90_vm1, %v8182_v40 }
 0x501   :  { %1293 = vmatpush.bf16.msra.mxu1 %v5595_v41  ;;  %1307 = vmatpush.bf16.msrb.mxu2 %v5599_v42  ;;  %v7209_v41 = vld [vmem:[%s9765_s7 + $0x98] sm:$0xff]  ;;  %v7192_v42 = vld [vmem:[%s9765_s7 + $0x10] sm:$0xff] }
 0x502   :  { %1321 = vmatpush.bf16.msrb.mxu3 %v5603_v45  ;;  %1335 = vmatpush.bf16.msrb.mxu0 %v5607_v46  ;;  %v7191_v45 = vld [vmem:[%s9765_s7 + $0x8] sm:$0xff] }
 0x503   :  { %v7215_v46 = vld [vmem:[%s9765_s7 + $0xc8] sm:$0xff] }
 0x505   :  { %1294 = vmatpush.bf16.msra.mxu1 %v5531_v55  ;;  %1308 = vmatpush.bf16.msrb.mxu2 %v5535_v59  ;;  %v7198_v55 = vld [vmem:[%s9765_s7 + $0x40] sm:$0xff] }
 0x506   :  { %1322 = vmatpush.bf16.msrb.mxu3 %v5539_v36  ;;  %1336 = vmatpush.bf16.msrb.mxu0 %v5543_v39  ;;  %v7206_v59 = vld [vmem:[%s9765_s7 + $0x80] sm:$0xff]  ;;  %v7237_v36 = vld [vmem:[%s9765_s7 + $0x178] sm:$0xff] }
 0x507   :  { %v7245_v39 = vld [vmem:[%s9765_s7 + $0x1b8] sm:$0xff] }
 0x50f   :  { %5628 = vmatmul.msk.bf16.vlgmr.msrb.gmra.mxu1 %vm90_vm1, %v8182_v40  ;;  %5629 = vmatmul.msk.bf16.vlgmr.msra.gmra.mxu2 %vm90_vm1, %v8182_v40 }
 0x510   :  { %5630 = vmatmul.msk.bf16.vlgmr.msra.gmra.mxu3 %vm90_vm1, %v8182_v40  ;;  %5631 = vmatmul.msk.bf16.vlgmr.msra.gmra.mxu0 %vm90_vm1, %v8182_v40 }
 0x511   :  { %1349 = vmatpush.bf16.msrb.mxu1 %v5611_v3  ;;  %1363 = vmatpush.bf16.msra.mxu2 %v5615_v4  ;;  %v7235_v3 = vld [vmem:[%s9765_s7 + $0x168] sm:$0xff] }
 0x512   :  { %1377 = vmatpush.bf16.msra.mxu3 %v5619_v1  ;;  %1391 = vmatpush.bf16.msra.mxu0 %v5623_v54  ;;  %v7243_v4 = vld [vmem:[%s9765_s7 + $0x1a8] sm:$0xff]  ;;  %v7234_v1 = vld [vmem:[%s9765_s7 + $0x160] sm:$0xff] }
 0x513   :  { %v7242_v54 = vld [vmem:[%s9765_s7 + $0x1a0] sm:$0xff] }
 0x515   :  { %1350 = vmatpush.bf16.msrb.mxu1 %v5547_v12  ;;  %1364 = vmatpush.bf16.msra.mxu2 %v5551_v58  ;;  %v7232_v12 = vld [vmem:[%s9765_s7 + $0x150] sm:$0xff] }
 0x516   :  { %1378 = vmatpush.bf16.msra.mxu3 %v5555_v57  ;;  %1392 = vmatpush.bf16.msra.mxu0 %v5559_v15  ;;  %v7240_v58 = vld [vmem:[%s9765_s7 + $0x190] sm:$0xff]  ;;  %v7222_v57 = vld [vmem:[%s9765_s7 + $0x100] sm:$0xff] }
 0x517   :  { %v7246_v15 = vld [vmem:[%s9765_s7 + $0x1c0] sm:$0xff] }
 0x51f   :  { %5632 = vmatmul.msk.bf16.vlgmr.msra.gmra.mxu1 %vm90_vm1, %v8182_v40  ;;  %5633 = vmatmul.msk.bf16.vlgmr.msrb.gmra.mxu2 %vm90_vm1, %v8182_v40 }
 0x520   :  { %5634 = vmatmul.msk.bf16.vlgmr.msrb.gmra.mxu3 %vm90_vm1, %v8182_v40  ;;  %5635 = vmatmul.msk.bf16.vlgmr.msrb.gmra.mxu0 %vm90_vm1, %v8182_v40 }
 0x521   :  { %2472 = vmatpush.bf16.msra.mxu1 %v7197_v16  ;;  %2514 = vmatpush.bf16.msrb.mxu0 %v7221_v18  ;;  %v7231_v16 = vld [vmem:[%s9765_s7 + $0x148] sm:$0xff] }
 0x522   :  { %2486 = vmatpush.bf16.msrb.mxu2 %v7205_v20  ;;  %2500 = vmatpush.bf16.msrb.mxu3 %v7213_v23  ;;  %v7239_v18 = vld [vmem:[%s9765_s7 + $0x188] sm:$0xff]  ;;  %v7230_v20 = vld [vmem:[%s9765_s7 + $0x140] sm:$0xff] }
 0x523   :  { %v7238_v23 = vld [vmem:[%s9765_s7 + $0x180] sm:$0xff] }
 0x525   :  { %2473 = vmatpush.bf16.msra.mxu1 %v7196_v61  ;;  %2515 = vmatpush.bf16.msrb.mxu0 %v7220_v24  ;;  %v8483_v61 = vld [vmem:[%s9766_s6] sm:$0xff] }
 0x526   :  { %2487 = vmatpush.bf16.msrb.mxu2 %v7204_v25  ;;  %2501 = vmatpush.bf16.msrb.mxu3 %v7212_v27  ;;  %v980_v27 = vperm.slane %v8483_v61, 0 }
 0x529   :  { %2474 = vmatpush.bf16.msra.mxu1 %v7195_v28  ;;  %2516 = vmatpush.bf16.msrb.mxu0 %v7219_v30  ;;  %v983_v28 = vperm.slane %v8483_v61, 3 }
 0x52a   :  { %2488 = vmatpush.bf16.msrb.mxu2 %v7203_v31  ;;  %2502 = vmatpush.bf16.msrb.mxu3 %v7211_v32 }
 0x52d   :  { %2475 = vmatpush.bf16.msra.mxu1 %v7194_v33  ;;  %2517 = vmatpush.bf16.msrb.mxu0 %v7218_v8 }
 0x52e   :  { %2489 = vmatpush.bf16.msrb.mxu2 %v7202_v56  ;;  %2503 = vmatpush.bf16.msrb.mxu3 %v7210_v13  ;;  %v981_v56 = vperm.slane %v8483_v61, 1 }
 0x52f   :  { %5636 = vmatmul.msk.bf16.vlgmr.msrb.gmra.mxu1 %vm90_vm1, %v8182_v40  ;;  %5637 = vmatmul.msk.bf16.vlgmr.msra.gmra.mxu2 %vm90_vm1, %v8182_v40 }
 0x530   :  { %5638 = vmatmul.msk.bf16.vlgmr.msra.gmra.mxu3 %vm90_vm1, %v8182_v40  ;;  %5639 = vmatmul.msk.bf16.vlgmr.msra.gmra.mxu0 %vm90_vm1, %v8182_v40  ;;  %v7208_v40 = vld [vmem:[%s9765_s7 + $0x90] sm:$0xff] }
 0x531   :  { %2476 = vmatpush.bf16.msra.mxu1 %v7193_v6  ;;  %2518 = vmatpush.bf16.msrb.mxu0 %v7217_v37  ;;  %v982_v37 = vperm.slane %v8483_v61, 2 }
 0x532   :  { %2490 = vmatpush.bf16.msrb.mxu2 %v7201_v38  ;;  %2504 = vmatpush.bf16.msrb.mxu3 %v7209_v41 }
 0x535   :  { %2477 = vmatpush.bf16.msra.mxu1 %v7192_v42  ;;  %2519 = vmatpush.bf16.msrb.mxu0 %v7216_v14 }
 0x536   :  { %2491 = vmatpush.bf16.msrb.mxu2 %v7200_v44  ;;  %2505 = vmatpush.bf16.msrb.mxu3 %v7208_v40  ;;  %v7261_v40 = vld [vmem:[%s9765_s7 + $0x238] sm:$0xff] }
 0x539   :  { %2478 = vmatpush.bf16.msra.mxu1 %v7191_v45  ;;  %2520 = vmatpush.bf16.msrb.mxu0 %v7215_v46 }
 0x53a   :  { %2492 = vmatpush.bf16.msrb.mxu2 %v7199_v48  ;;  %2506 = vmatpush.bf16.msrb.mxu3 %v7207_v26  ;;  %v7285_v48 = vld [vmem:[%s9765_s7 + $0x2f8] sm:$0xff] }
 0x53d   :  { %2479 = vmatpush.bf16.msra.mxu1 %v7190_v29  ;;  %2521 = vmatpush.bf16.msrb.mxu0 %v7214_v22 }
 0x53e   :  { %2493 = vmatpush.bf16.msrb.mxu2 %v7198_v55  ;;  %2507 = vmatpush.bf16.msrb.mxu3 %v7206_v59 }
 0x541   :  { %2528 = vmatpush.bf16.msrb.mxu1 %v7229_v17  ;;  %2570 = vmatpush.bf16.msra.mxu0 %v7253_v51 }
 0x542   :  { %2542 = vmatpush.bf16.msra.mxu2 %v7237_v36  ;;  %2556 = vmatpush.bf16.msra.mxu3 %v7245_v39  ;;  %v7260_v36 = vld [vmem:[%s9765_s7 + $0x230] sm:$0xff] }
 0x545   :  { %2529 = vmatpush.bf16.msrb.mxu1 %v7228_v50  ;;  %2571 = vmatpush.bf16.msra.mxu0 %v7252_v49 }
 0x546   :  { %2543 = vmatpush.bf16.msra.mxu2 %v7236_v60  ;;  %2557 = vmatpush.bf16.msra.mxu3 %v7244_v63  ;;  %v7284_v60 = vld [vmem:[%s9765_s7 + $0x2f0] sm:$0xff] }
 0x549   :  { %2530 = vmatpush.bf16.msrb.mxu1 %v7227_v47  ;;  %2572 = vmatpush.bf16.msra.mxu0 %v7251_v52  ;;  %v7269_v52 = vld [vmem:[%s9765_s7 + $0x278] sm:$0xff] }
 0x54a   :  { %2544 = vmatpush.bf16.msra.mxu2 %v7235_v3  ;;  %2558 = vmatpush.bf16.msra.mxu3 %v7243_v4  ;;  %v7277_v3 = vld [vmem:[%s9765_s7 + $0x2b8] sm:$0xff] }
 0x54d   :  { %2531 = vmatpush.bf16.msrb.mxu1 %v7226_v0  ;;  %2573 = vmatpush.bf16.msra.mxu0 %v7250_v2  ;;  %v984_v2 = vperm.slane %v8483_v61, 4 }
 0x54e   :  { %2545 = vmatpush.bf16.msra.mxu2 %v7234_v1  ;;  %2559 = vmatpush.bf16.msra.mxu3 %v7242_v54  ;;  %v7283_v1 = vld [vmem:[%s9765_s7 + $0x2e8] sm:$0xff] }
 0x551   :  { %2532 = vmatpush.bf16.msrb.mxu1 %v7225_v19  ;;  %2574 = vmatpush.bf16.msra.mxu0 %v7249_v62  ;;  %v987_v19 = vperm.slane %v8483_v61, 7  ;;  %v7259_v62 = vld [vmem:[%s9765_s7 + $0x228] sm:$0xff] }
 0x552   :  { %2546 = vmatpush.bf16.msra.mxu2 %v7233_v7  ;;  %2560 = vmatpush.bf16.msra.mxu3 %v7241_v9  ;;  %v7276_v9 = vld [vmem:[%s9765_s7 + $0x2b0] sm:$0xff] }
 0x555   :  { %2533 = vmatpush.bf16.msrb.mxu1 %v7224_v21  ;;  %2575 = vmatpush.bf16.msra.mxu0 %v7248_v5  ;;  %v7268_v21 = vld [vmem:[%s9765_s7 + $0x270] sm:$0xff] }
 0x556   :  { %2547 = vmatpush.bf16.msra.mxu2 %v7232_v12  ;;  %2561 = vmatpush.bf16.msra.mxu3 %v7240_v58  ;;  %v7258_v12 = vld [vmem:[%s9765_s7 + $0x220] sm:$0xff]  ;;  %v985_v58 = vperm.slane %v8483_v61, 5 }
 0x559   :  { %2534 = vmatpush.bf16.msrb.mxu1 %v7223_v10  ;;  %2576 = vmatpush.bf16.msra.mxu0 %v7247_v11 }
 0x55a   :  { %2548 = vmatpush.bf16.msra.mxu2 %v7231_v16  ;;  %2562 = vmatpush.bf16.msra.mxu3 %v7239_v18  ;;  %v7282_v16 = vld [vmem:[%s9765_s7 + $0x2e0] sm:$0xff]  ;;  %v986_v18 = vperm.slane %v8483_v61, 6  ;;  %v7257_v61 = vld [vmem:[%s9765_s7 + $0x218] sm:$0xff] }
 0x55d   :  { %2535 = vmatpush.bf16.msrb.mxu1 %v7222_v57  ;;  %2577 = vmatpush.bf16.msra.mxu0 %v7246_v15 }
 0x55e   :  { %2549 = vmatpush.bf16.msra.mxu2 %v7230_v20  ;;  %2563 = vmatpush.bf16.msra.mxu3 %v7238_v23  ;;  %v7267_v23 = vld [vmem:[%s9765_s7 + $0x268] sm:$0xff] }
 0x57c   :  { %v1184_v24 = vpop.f32.mrf.mxu1 }
 0x57d   :  { %v1226_v25 = vpop.f32.mrf.mxu0  ;;  %v1185_v31 = vadd.f32 %v1184_v24, %v980_v27 }
 0x57e   :  { %v1227_v33 = vadd.f32 %v1226_v25, %v983_v28 }
 0x57f   :  { %v1399_v41 = vmax.f32 %v1185_v31, 0.0 }
 0x580   :  { %v1402_v14 = vmax.f32 %v1227_v33, 0.0  ;;  %v7281_v33 = vld [vmem:[%s9765_s7 + $0x2d8] sm:$0xff] }
 0x582   :  { %v1198_v30 = vpop.f32.mrf.mxu2 }
 0x583   :  { %v1212_v32 = vpop.f32.mrf.mxu3  ;;  %v1199_v45 = vadd.f32 %v1198_v30, %v981_v56 }
 0x584   :  { %v1186_v8 = vpop.f32.mrf.mxu1  ;;  %v1213_v26 = vadd.f32 %v1212_v32, %v982_v37 }
 0x585   :  { %v1187_v13 = vadd.f32 %v1186_v8, %v980_v27  ;;  %v1228_v6 = vpop.f32.mrf.mxu0  ;;  %v1400_v39 = vmax.f32 %v1199_v45, 0.0  ;;  %v7275_v27 = vld [vmem:[%s9765_s7 + $0x2a8] sm:$0xff] }
 0x586   :  { %v1229_v38 = vadd.f32 %v1228_v6, %v983_v28  ;;  %v1401_v63 = vmax.f32 %v1213_v26, 0.0  ;;  %v7266_v6 = vld [vmem:[%s9765_s7 + $0x260] sm:$0xff]  ;;  %v7280_v26 = vld [vmem:[%s9765_s7 + $0x2d0] sm:$0xff] }
 0x587   :  { %v1415_v42 = vmax.f32 %v1187_v13, 0.0 }
 0x588   :  { %v1418_v44 = vmax.f32 %v1229_v38, 0.0 }
 0x589   :  { %v1431_v46 = vpack.c.bf16 %v1415_v42, %v1399_v41  ;;  %v7274_v41 = vld [vmem:[%s9765_s7 + $0x2a0] sm:$0xff] }
 0x58a   :  { %v1434_v29 = vpack.c.bf16 %v1418_v44, %v1402_v14  ;;  %v1200_v22 = vpop.f32.mrf.mxu2  ;;  %v8550_v14 = vld [vmem:[%s9766_s6 + $0x8] sm:$0xff] }
 0x58b   :  { %v1201_v17 = vadd.f32 %v1200_v22, %v981_v56  ;;  %v1214_v51 = vpop.f32.mrf.mxu3  ;;  %2480 = vmatmul.bf16.vlgmr.msra.gmra.mxu1 %v1431_v46 }
 0x58c   :  { %v1215_v55 = vadd.f32 %v1214_v51, %v982_v37  ;;  %2522 = vmatmul.bf16.vlgmr.msrb.gmra.mxu0 %v1434_v29  ;;  %2584 = vmatpush.bf16.msra.mxu1 %v7261_v40  ;;  %v1240_v59 = vpop.f32.mrf.mxu1  ;;  %v7256_v40 = vld [vmem:[%s9765_s7 + $0x210] sm:$0xff] }
 0x58d   :  { %v1416_v50 = vmax.f32 %v1201_v17, 0.0  ;;  %2626 = vmatpush.bf16.msrb.mxu0 %v7285_v48  ;;  %v1282_v49 = vpop.f32.mrf.mxu0  ;;  %v1241_v5 = vadd.f32 %v1240_v59, %v984_v2  ;;  %v7265_v17 = vld [vmem:[%s9765_s7 + $0x258] sm:$0xff] }
 0x58e   :  { %v1417_v47 = vmax.f32 %v1215_v55, 0.0  ;;  %v1283_v10 = vadd.f32 %v1282_v49, %v987_v19  ;;  %v988_v55 = vperm.slane %v8550_v14, 0  ;;  %v7273_v59 = vld [vmem:[%s9765_s7 + $0x298] sm:$0xff]  ;;  %v7279_v49 = vld [vmem:[%s9765_s7 + $0x2c8] sm:$0xff] }
 0x58f   :  { %v1432_v0 = vpack.c.bf16 %v1416_v50, %v1400_v39  ;;  %v1403_v24 = vmax.f32 %v1241_v5, 0.0  ;;  %v991_v39 = vperm.slane %v8550_v14, 3  ;;  %v7255_v50 = vld [vmem:[%s9765_s7 + $0x208] sm:$0xff]  ;;  %v990_v5 = vperm.slane %v8550_v14, 2 }
 0x590   :  { %v1433_v4 = vpack.c.bf16 %v1417_v47, %v1401_v63  ;;  %2585 = vmatpush.bf16.msra.mxu1 %v7260_v36  ;;  %v1406_v28 = vmax.f32 %v1283_v10, 0.0  ;;  %v7264_v63 = vld [vmem:[%s9765_s7 + $0x250] sm:$0xff]  ;;  %v7263_v10 = vld [vmem:[%s9765_s7 + $0x248] sm:$0xff] }
 0x591   :  { %2627 = vmatpush.bf16.msrb.mxu0 %v7284_v60  ;;  %2494 = vmatmul.bf16.vlgmr.msrb.gmra.mxu2 %v1432_v0  ;;  %v7272_v0 = vld [vmem:[%s9765_s7 + $0x290] sm:$0xff] }
 0x592   :  { %2508 = vmatmul.bf16.vlgmr.msrb.gmra.mxu3 %v1433_v4  ;;  %2598 = vmatpush.bf16.msrb.mxu2 %v7269_v52  ;;  %v1254_v54 = vpop.f32.mrf.mxu2  ;;  %v7254_v4 = vld [vmem:[%s9765_s7 + $0x200] sm:$0xff] }
 0x593   :  { %2612 = vmatpush.bf16.msrb.mxu3 %v7277_v3  ;;  %v1268_v7 = vpop.f32.mrf.mxu3  ;;  %v1255_v31 = vadd.f32 %v1254_v54, %v985_v58  ;;  %v7278_v54 = vld [vmem:[%s9765_s7 + $0x2c0] sm:$0xff] }
 0x594   :  { %2586 = vmatpush.bf16.msra.mxu1 %v7259_v62  ;;  %v1242_v11 = vpop.f32.mrf.mxu1  ;;  %v1269_v8 = vadd.f32 %v1268_v7, %v986_v18 }
 0x595   :  { %2628 = vmatpush.bf16.msrb.mxu0 %v7283_v1  ;;  %v1243_v57 = vadd.f32 %v1242_v11, %v984_v2  ;;  %v1284_v15 = vpop.f32.mrf.mxu0  ;;  %v1404_v45 = vmax.f32 %v1255_v31, 0.0  ;;  %v7270_v31 = vld [vmem:[%s9765_s7 + $0x280] sm:$0xff] }
 0x596   :  { %v1285_v20 = vadd.f32 %v1284_v15, %v987_v19  ;;  %2599 = vmatpush.bf16.msrb.mxu2 %v7268_v21  ;;  %v1405_v29 = vmax.f32 %v1269_v8, 0.0  ;;  %v989_v19 = vperm.slane %v8550_v14, 1  ;;  %v7293_v21 = vld [vmem:[%s9765_s7 + $0x338] sm:$0xff] }
 0x597   :  { %v1419_v25 = vmax.f32 %v1243_v57, 0.0  ;;  %2613 = vmatpush.bf16.msrb.mxu3 %v7276_v9  ;;  %v7317_v9 = vld [vmem:[%s9765_s7 + $0x3f8] sm:$0xff] }
 0x598   :  { %v1422_v30 = vmax.f32 %v1285_v20, 0.0  ;;  %2587 = vmatpush.bf16.msra.mxu1 %v7258_v12  ;;  %v7292_v20 = vld [vmem:[%s9765_s7 + $0x330] sm:$0xff]  ;;  %v7309_v8 = vld [vmem:[%s9765_s7 + $0x3b8] sm:$0xff] }
 0x599   :  { %v1435_v32 = vpack.c.bf16 %v1419_v25, %v1403_v24  ;;  %2629 = vmatpush.bf16.msrb.mxu0 %v7282_v16 }
 0x59a   :  { %v1438_v56 = vpack.c.bf16 %v1422_v30, %v1406_v28  ;;  %2600 = vmatpush.bf16.msrb.mxu2 %v7267_v23  ;;  %v1256_v13 = vpop.f32.mrf.mxu2  ;;  %v7262_v28 = vld [vmem:[%s9765_s7 + $0x240] sm:$0xff] }
 0x59b   :  { %2614 = vmatpush.bf16.msrb.mxu3 %v7275_v27  ;;  %v1257_v37 = vadd.f32 %v1256_v13, %v985_v58  ;;  %v1270_v38 = vpop.f32.mrf.mxu3  ;;  %2536 = vmatmul.bf16.vlgmr.msrb.gmra.mxu1 %v1435_v32  ;;  %v7271_v58 = vld [vmem:[%s9765_s7 + $0x288] sm:$0xff]  ;;  %v7316_v27 = vld [vmem:[%s9765_s7 + $0x3f0] sm:$0xff]  ;;  %v7301_v32 = vld [vmem:[%s9765_s7 + $0x378] sm:$0xff] }
 0x59c   :  { %v1271_v42 = vadd.f32 %v1270_v38, %v986_v18  ;;  %2578 = vmatmul.bf16.vlgmr.msra.gmra.mxu0 %v1438_v56  ;;  %2588 = vmatpush.bf16.msra.mxu1 %v7257_v61  ;;  %v1296_v44 = vpop.f32.mrf.mxu1 }
 0x59d   :  { %v1420_v46 = vmax.f32 %v1257_v37, 0.0  ;;  %2630 = vmatpush.bf16.msrb.mxu0 %v7281_v33  ;;  %v1338_v48 = vpop.f32.mrf.mxu0  ;;  %v1297_v47 = vadd.f32 %v1296_v44, %v988_v55  ;;  %v7300_v44 = vld [vmem:[%s9765_s7 + $0x370] sm:$0xff] }
 0x59e   :  { %v1421_v22 = vmax.f32 %v1271_v42, 0.0  ;;  %2601 = vmatpush.bf16.msrb.mxu2 %v7266_v6  ;;  %v1339_v2 = vadd.f32 %v1338_v48, %v991_v39  ;;  %v7291_v6 = vld [vmem:[%s9765_s7 + $0x328] sm:$0xff]  ;;  %v7290_v48 = vld [vmem:[%s9765_s7 + $0x320] sm:$0xff] }
 0x59f   :  { %v1436_v51 = vpack.c.bf16 %v1420_v46, %v1404_v45  ;;  %2615 = vmatpush.bf16.msrb.mxu3 %v7274_v41  ;;  %v1407_v11 = vmax.f32 %v1297_v47, 0.0  ;;  %v7315_v41 = vld [vmem:[%s9765_s7 + $0x3e8] sm:$0xff]  ;;  %v7308_v45 = vld [vmem:[%s9765_s7 + $0x3b0] sm:$0xff]  ;;  %v7297_v47 = vld [vmem:[%s9765_s7 + $0x358] sm:$0xff] }
 0x5a0   :  { %v1437_v36 = vpack.c.bf16 %v1421_v22, %v1405_v29  ;;  %2589 = vmatpush.bf16.msra.mxu1 %v7256_v40  ;;  %v1410_v57 = vmax.f32 %v1339_v2, 0.0  ;;  %v7314_v29 = vld [vmem:[%s9765_s7 + $0x3e0] sm:$0xff]  ;;  %v7299_v22 = vld [vmem:[%s9765_s7 + $0x368] sm:$0xff]  ;;  %v7305_v2 = vld [vmem:[%s9765_s7 + $0x398] sm:$0xff] }
 0x5a1   :  { %2631 = vmatpush.bf16.msrb.mxu0 %v7280_v26  ;;  %2550 = vmatmul.bf16.vlgmr.msra.gmra.mxu2 %v1436_v51  ;;  %v7289_v51 = vld [vmem:[%s9765_s7 + $0x318] sm:$0xff] }
 0x5a2   :  { %2564 = vmatmul.bf16.vlgmr.msra.gmra.mxu3 %v1437_v36  ;;  %2602 = vmatpush.bf16.msrb.mxu2 %v7265_v17  ;;  %v1310_v60 = vpop.f32.mrf.mxu2  ;;  %v7307_v17 = vld [vmem:[%s9765_s7 + $0x3a8] sm:$0xff]  ;;  %v7298_v36 = vld [vmem:[%s9765_s7 + $0x360] sm:$0xff] }
 0x5a3   :  { %2616 = vmatpush.bf16.msrb.mxu3 %v7273_v59  ;;  %v1324_v52 = vpop.f32.mrf.mxu3  ;;  %v1311_v16 = vadd.f32 %v1310_v60, %v989_v19  ;;  %v7312_v60 = vld [vmem:[%s9765_s7 + $0x3d0] sm:$0xff] }
 0x5a4   :  { %2590 = vmatpush.bf16.msra.mxu1 %v7255_v50  ;;  %v1298_v3 = vpop.f32.mrf.mxu1  ;;  %v1325_v23 = vadd.f32 %v1324_v52, %v990_v5  ;;  %v7306_v50 = vld [vmem:[%s9765_s7 + $0x3a0] sm:$0xff]  ;;  %v992_v52 = vperm.slane %v8550_v14, 4 }
 0x5a5   :  { %2632 = vmatpush.bf16.msrb.mxu0 %v7279_v49  ;;  %v1299_v62 = vadd.f32 %v1298_v3, %v988_v55  ;;  %v1340_v1 = vpop.f32.mrf.mxu0  ;;  %v1408_v56 = vmax.f32 %v1311_v16, 0.0  ;;  %v7313_v55 = vld [vmem:[%s9765_s7 + $0x3d8] sm:$0xff]  ;;  %v7288_v49 = vld [vmem:[%s9765_s7 + $0x310] sm:$0xff]  ;;  %v995_v3 = vperm.slane %v8550_v14, 7 }
 0x5a6   :  { %v1341_v7 = vadd.f32 %v1340_v1, %v991_v39  ;;  %2603 = vmatpush.bf16.msrb.mxu2 %v7264_v63  ;;  %v1409_v37 = vmax.f32 %v1325_v23, 0.0 }
 0x5a7   :  { %v1423_v12 = vmax.f32 %v1299_v62, 0.0  ;;  %2617 = vmatpush.bf16.msrb.mxu3 %v7272_v0  ;;  %v7311_v62 = vld [vmem:[%s9765_s7 + $0x3c8] sm:$0xff] }
 0x5a8   :  { %v1426_v15 = vmax.f32 %v1341_v7, 0.0  ;;  %2591 = vmatpush.bf16.msra.mxu1 %v7254_v4  ;;  %v7287_v4 = vld [vmem:[%s9765_s7 + $0x308] sm:$0xff] }
 0x5a9   :  { %v1439_v18 = vpack.c.bf16 %v1423_v12, %v1407_v11  ;;  %2633 = vmatpush.bf16.msrb.mxu0 %v7278_v54  ;;  %v7296_v54 = vld [vmem:[%s9765_s7 + $0x350] sm:$0xff]  ;;  %v993_v11 = vperm.slane %v8550_v14, 5 }
 0x5aa   :  { %v1442_v24 = vpack.c.bf16 %v1426_v15, %v1410_v57  ;;  %2604 = vmatpush.bf16.msrb.mxu2 %v7263_v10  ;;  %v1312_v25 = vpop.f32.mrf.mxu2  ;;  %v7286_v10 = vld [vmem:[%s9765_s7 + $0x300] sm:$0xff]  ;;  %v994_v15 = vperm.slane %v8550_v14, 6 }
 0x5ab   :  { %2618 = vmatpush.bf16.msrb.mxu3 %v7271_v58  ;;  %v1313_v30 = vadd.f32 %v1312_v25, %v989_v19  ;;  %v1326_v61 = vpop.f32.mrf.mxu3  ;;  %2592 = vmatmul.bf16.vlgmr.msra.gmra.mxu1 %v1439_v18  ;;  %v7310_v57 = vld [vmem:[%s9765_s7 + $0x3c0] sm:$0xff]  ;;  %v7295_v18 = vld [vmem:[%s9765_s7 + $0x348] sm:$0xff] }
 0x5ac   :  { %2640 = vmatpush.bf16.msrb.mxu1 %v7293_v21  ;;  %v1327_v33 = vadd.f32 %v1326_v61, %v990_v5  ;;  %2634 = vmatmul.bf16.vlgmr.msrb.gmra.mxu0 %v1442_v24  ;;  %v1352_v46 = vpop.f32.mrf.mxu1  ;;  %v7304_v5 = vld [vmem:[%s9765_s7 + $0x390] sm:$0xff]  ;;  %v7303_v24 = vld [vmem:[%s9765_s7 + $0x388] sm:$0xff] }
 0x5ad   :  { %2682 = vmatpush.bf16.msra.mxu0 %v7317_v9  ;;  %v1424_v13 = vmax.f32 %v1313_v30, 0.0  ;;  %v1394_v26 = vpop.f32.mrf.mxu0  ;;  %v1353_v21 = vadd.f32 %v1352_v46, %v992_v52 }
 0x5ae   :  { %v1425_v38 = vmax.f32 %v1327_v33, 0.0  ;;  %2605 = vmatpush.bf16.msrb.mxu2 %v7262_v28  ;;  %v1395_v7 = vadd.f32 %v1394_v26, %v995_v3  ;;  %v7302_v33 = vld [vmem:[%s9765_s7 + $0x380] sm:$0xff] }
 0x5af   :  { %v1440_v42 = vpack.c.bf16 %v1424_v13, %v1408_v56  ;;  %2619 = vmatpush.bf16.msrb.mxu3 %v7270_v31  ;;  %v7294_v31 = vld [vmem:[%s9765_s7 + $0x340] sm:$0xff] }
 0x5b0   :  { %2641 = vmatpush.bf16.msrb.mxu1 %v7292_v20  ;;  %v1441_v40 = vpack.c.bf16 %v1425_v38, %v1409_v37  ;;  %v1411_v20 = vmax.f32 %v1353_v21, 0.0  ;;  %v1414_v25 = vmax.f32 %v1395_v7, 0.0  ;;  %v7634_v26 = vld [vmem:[%s9762_s2] sm:$0xff] }
 0x5b1   :  { %2683 = vmatpush.bf16.msra.mxu0 %v7316_v27  ;;  %2606 = vmatmul.bf16.vlgmr.msrb.gmra.mxu2 %v1440_v42 }
 0x5b2   :  { %2654 = vmatpush.bf16.msra.mxu2 %v7301_v32  ;;  %2620 = vmatmul.bf16.vlgmr.msrb.gmra.mxu3 %v1441_v40  ;;  %v1366_v59 = vpop.f32.mrf.mxu2 }
 0x5b3   :  { %2668 = vmatpush.bf16.msra.mxu3 %v7309_v8  ;;  %v1380_v39 = vpop.f32.mrf.mxu3  ;;  %v1367_v28 = vadd.f32 %v1366_v59, %v993_v11 }
 0x5b4   :  { %2642 = vmatpush.bf16.msrb.mxu1 %v7291_v6  ;;  %v1354_v63 = vpop.f32.mrf.mxu1  ;;  %v1381_v14 = vadd.f32 %v1380_v39, %v994_v15 }
 0x5b5   :  { %2684 = vmatpush.bf16.msra.mxu0 %v7315_v41  ;;  %v1396_v0 = vpop.f32.mrf.mxu0  ;;  %v1355_v19 = vadd.f32 %v1354_v63, %v992_v52  ;;  %v1412_v56 = vmax.f32 %v1367_v28, 0.0 }
 0x5b6   :  { %2655 = vmatpush.bf16.msra.mxu2 %v7300_v44  ;;  %v1397_v1 = vadd.f32 %v1396_v0, %v995_v3  ;;  %v1413_v13 = vmax.f32 %v1381_v14, 0.0 }
 0x5b7   :  { %2669 = vmatpush.bf16.msra.mxu3 %v7308_v45  ;;  %v1427_v12 = vmax.f32 %v1355_v19, 0.0 }
 0x5b8   :  { %2643 = vmatpush.bf16.msrb.mxu1 %v7290_v48  ;;  %v1430_v16 = vmax.f32 %v1397_v1, 0.0 }
 0x5b9   :  { %2685 = vmatpush.bf16.msra.mxu0 %v7314_v29  ;;  %v1443_v30 = vpack.c.bf16 %v1427_v12, %v1411_v20  ;;  %v1703_v29 = vperm.slane %v7634_v26, 7 }
 0x5ba   :  { %2656 = vmatpush.bf16.msra.mxu2 %v7299_v22  ;;  %v1368_v9 = vpop.f32.mrf.mxu2  ;;  %v1446_v61 = vpack.c.bf16 %v1430_v16, %v1414_v25 }
 0x5bb   :  { %2670 = vmatpush.bf16.msra.mxu3 %v7307_v17  ;;  %v1382_v58 = vpop.f32.mrf.mxu3  ;;  %v1369_v23 = vadd.f32 %v1368_v9, %v993_v11 }
 0x5bc   :  { %2644 = vmatpush.bf16.msrb.mxu1 %v7289_v51  ;;  %v1383_v27 = vadd.f32 %v1382_v58, %v994_v15 }
 0x5bd   :  { %2686 = vmatpush.bf16.msra.mxu0 %v7313_v55  ;;  %v1428_v32 = vmax.f32 %v1369_v23, 0.0 }
 0x5be   :  { %2657 = vmatpush.bf16.msra.mxu2 %v7298_v36  ;;  %v1429_v8 = vmax.f32 %v1383_v27, 0.0 }
 0x5bf   :  { %2671 = vmatpush.bf16.msra.mxu3 %v7306_v50  ;;  %v1444_v6 = vpack.c.bf16 %v1428_v32, %v1412_v56 }
 0x5c0   :  { %2645 = vmatpush.bf16.msrb.mxu1 %v7288_v49  ;;  %v1445_v37 = vpack.c.bf16 %v1429_v8, %v1413_v13 }
 0x5c1   :  { %2687 = vmatpush.bf16.msra.mxu0 %v7312_v60 }
 0x5c2   :  { %2658 = vmatpush.bf16.msra.mxu2 %v7297_v47 }
 0x5c3   :  { %2672 = vmatpush.bf16.msra.mxu3 %v7305_v2 }
 0x5c4   :  { %2646 = vmatpush.bf16.msrb.mxu1 %v7287_v4 }
 0x5c5   :  { %2688 = vmatpush.bf16.msra.mxu0 %v7311_v62 }
 0x5c6   :  { %2659 = vmatpush.bf16.msra.mxu2 %v7296_v54 }
 0x5c7   :  { %2673 = vmatpush.bf16.msra.mxu3 %v7304_v5 }
 0x5c8   :  { %2647 = vmatpush.bf16.msrb.mxu1 %v7286_v10 }
 0x5c9   :  { %2689 = vmatpush.bf16.msra.mxu0 %v7310_v57 }
 0x5ca   :  { %2660 = vmatpush.bf16.msra.mxu2 %v7295_v18 }
 0x5cb   :  { %2674 = vmatpush.bf16.msra.mxu3 %v7303_v24  ;;  %2648 = vmatmul.bf16.vlgmr.msrb.gmra.mxu1 %v1443_v30 }
 0x5cc   :  { %2690 = vmatmul.bf16.vlgmr.msra.gmra.mxu0 %v1446_v61 }
 0x5ce   :  { %2661 = vmatpush.bf16.msra.mxu2 %v7294_v31 }
 0x5cf   :  { %2675 = vmatpush.bf16.msra.mxu3 %v7302_v33 }
 0x5d1   :  { %2662 = vmatmul.bf16.vlgmr.msra.gmra.mxu2 %v1444_v6 }
 0x5d2   :  { %2676 = vmatmul.bf16.vlgmr.msra.gmra.mxu3 %v1445_v37 }
 0x608   :  { %v2481_v38 = vpop.f32.mrf.mxu1 }
 0x609   :  { %v2523_v44 = vpop.f32.mrf.mxu0  ;;  %v2482_v17 = vadd.f32 %v2481_v38, %v1703_v29 }
 0x610   :  { %v2483_v40 = vpop.f32.mrf.mxu1 }
 0x611   :  { %v2525_v48 = vpop.f32.mrf.mxu0  ;;  %v2484_v49 = vadd.f32 %v2483_v40, %v1703_v29 }
 0x614   :  { %v2495_v41 = vpop.f32.mrf.mxu2 }
 0x615   :  { %v2509_v42 = vpop.f32.mrf.mxu3  ;;  %v2496_v51 = vadd.f32 %v2495_v41, %v2482_v17 }
 0x617   :  { %v2510_v39 = vadd.f32 %v2509_v42, %v2496_v51 }
 0x618   :  { %v2537_v22 = vpop.f32.mrf.mxu1 }
 0x619   :  { %v2579_v36 = vpop.f32.mrf.mxu0  ;;  %v2524_v60 = vadd.f32 %v2523_v44, %v2510_v39 }
 0x61b   :  { %v2538_v52 = vadd.f32 %v2537_v22, %v2524_v60  ;;  %v6161_v60 = vld [vmem:[%s9761_s3 + $0x98] sm:$0xff] }
 0x61c   :  { %v2497_v45 = vpop.f32.mrf.mxu2  ;;  %2801 = vmatpush.msrb.mxu2 %v6161_v60 }
 0x61d   :  { %v2511_v46 = vpop.f32.mrf.mxu3  ;;  %v2498_v63 = vadd.f32 %v2497_v45, %v2484_v49  ;;  %v6155_v49 = vld [vmem:[%s9761_s3 + $0x78] sm:$0xff] }
 0x61e   :  { %2772 = vmatpush.msra.mxu1 %v6155_v49 }
 0x61f   :  { %v2512_v0 = vadd.f32 %v2511_v46, %v2498_v63  ;;  %v6167_v63 = vld [vmem:[%s9761_s3 + $0xb8] sm:$0xff] }
 0x620   :  { %v2539_v50 = vpop.f32.mrf.mxu1  ;;  %2830 = vmatpush.msrb.mxu3 %v6167_v63 }
 0x621   :  { %v2581_v3 = vpop.f32.mrf.mxu0  ;;  %v2526_v62 = vadd.f32 %v2525_v48, %v2512_v0  ;;  %v6166_v0 = vld [vmem:[%s9761_s3 + $0xb0] sm:$0xff] }
 0x622   :  { %2831 = vmatpush.msrb.mxu3 %v6166_v0 }
 0x623   :  { %v2540_v54 = vadd.f32 %v2539_v50, %v2526_v62  ;;  %v6158_v62 = vld [vmem:[%s9761_s3 + $0x80] sm:$0xff] }
 0x624   :  { %v2551_v55 = vpop.f32.mrf.mxu2 }
 0x625   :  { %v2565_v59 = vpop.f32.mrf.mxu3  ;;  %v2552_v4 = vadd.f32 %v2551_v55, %v2538_v52  ;;  %v6160_v52 = vld [vmem:[%s9761_s3 + $0x90] sm:$0xff] }
 0x626   :  { %2802 = vmatpush.msrb.mxu2 %v6160_v52 }
 0x627   :  { %v2566_v1 = vadd.f32 %v2565_v59, %v2552_v4  ;;  %v6165_v4 = vld [vmem:[%s9761_s3 + $0xa8] sm:$0xff] }
 0x628   :  { %v2593_v19 = vpop.f32.mrf.mxu1  ;;  %2832 = vmatpush.msrb.mxu3 %v6165_v4 }
 0x629   :  { %v2580_v5 = vadd.f32 %v2579_v36, %v2566_v1  ;;  %v2635_v10 = vpop.f32.mrf.mxu0  ;;  %v6164_v1 = vld [vmem:[%s9761_s3 + $0xa0] sm:$0xff] }
 0x62a   :  { %2833 = vmatpush.msrb.mxu3 %v6164_v1 }
 0x62b   :  { %v2594_v12 = vadd.f32 %v2593_v19, %v2580_v5  ;;  %v6152_v19 = vld [vmem:[%s9761_s3 + $0x60] sm:$0xff] }
 0x62c   :  { %v2553_v47 = vpop.f32.mrf.mxu2 }
 0x62d   :  { %v2567_v2 = vpop.f32.mrf.mxu3  ;;  %v2554_v7 = vadd.f32 %v2553_v47, %v2540_v54  ;;  %v6154_v47 = vld [vmem:[%s9761_s3 + $0x70] sm:$0xff] }
 0x62e   :  { %2773 = vmatpush.msra.mxu1 %v6154_v47 }
 0x62f   :  { %v2568_v58 = vadd.f32 %v2567_v2, %v2554_v7  ;;  %v6153_v2 = vld [vmem:[%s9761_s3 + $0x68] sm:$0xff] }
 0x630   :  { %v2595_v11 = vpop.f32.mrf.mxu1  ;;  %2774 = vmatpush.msra.mxu1 %v6153_v2 }
 0x631   :  { %v2582_v15 = vadd.f32 %v2581_v3, %v2568_v58  ;;  %v2637_v23 = vpop.f32.mrf.mxu0  ;;  %v6159_v3 = vld [vmem:[%s9761_s3 + $0x88] sm:$0xff] }
 0x632   :  { %2803 = vmatpush.msrb.mxu2 %v6159_v3  ;;  %2775 = vmatpush.msra.mxu1 %v6152_v19 }
 0x633   :  { %v2596_v25 = vadd.f32 %v2595_v11, %v2582_v15  ;;  %v37_v15 = vld [vmem:[%s9762_s2 + $0x8] sm:$0xff] }
 0x634   :  { %v2607_v21 = vpop.f32.mrf.mxu2  ;;  %2804 = vmatpush.msrb.mxu2 %v6158_v62 }
 0x635   :  { %v2621_v9 = vpop.f32.mrf.mxu3  ;;  %v2608_v57 = vadd.f32 %v2607_v21, %v2594_v12 }
 0x637   :  { %v2622_v18 = vadd.f32 %v2621_v9, %v2608_v57 }
 0x639   :  { %v2636_v28 = vadd.f32 %v2635_v10, %v2622_v18 }
 0x63c   :  { %v2609_v16 = vpop.f32.mrf.mxu2 }
 0x63d   :  { %v2623_v20 = vpop.f32.mrf.mxu3  ;;  %v2610_v27 = vadd.f32 %v2609_v16, %v2596_v25 }
 0x63f   :  { %v2624_v61 = vadd.f32 %v2623_v20, %v2610_v27 }
 0x641   :  { %v2638_v13 = vadd.f32 %v2637_v23, %v2624_v61 }
 0x648   :  { %v2649_v24 = vpop.f32.mrf.mxu1 }
 0x649   :  { %v2650_v30 = vadd.f32 %v2649_v24, %v2636_v28  ;;  %v2691_v33 = vpop.f32.mrf.mxu0  ;;  %v2742_v24 = vperm.slane %v37_v15, 0  ;;  %v2745_v28 = vperm.slane %v37_v15, 1 }
 0x650   :  { %v2651_v56 = vpop.f32.mrf.mxu1 }
 0x651   :  { %v2652_v37 = vadd.f32 %v2651_v56, %v2638_v13  ;;  %v2693_v46 = vpop.f32.mrf.mxu0 }
 0x654   :  { %v2663_v14 = vpop.f32.mrf.mxu2 }
 0x655   :  { %v2664_v31 = vadd.f32 %v2663_v14, %v2650_v30  ;;  %v2677_v32 = vpop.f32.mrf.mxu3 }
 0x657   :  { %v2678_v8 = vadd.f32 %v2677_v32, %v2664_v31 }
 0x659   :  { %v2692_v6 = vadd.f32 %v2691_v33, %v2678_v8 }
 0x65b   :  { %v2696_v38 = vadd.f32 %v2692_v6, %v8167_v34 }
 0x65c   :  { %v2665_v41 = vpop.f32.mrf.mxu2 }
 0x65d   :  { %v2666_v42 = vadd.f32 %v2665_v41, %v2652_v37  ;;  %v2698_v44 = vsel %vm90_vm1, %v2696_v38, 0.0  ;;  %v2679_v40 = vpop.f32.mrf.mxu3  ;;  %v2753_v37 = vperm.slane %v37_v15, 2 }
 0x65e   :  { %2699 = vadd.xlane.f32.xlu0 %v2698_v44  ;;  %v2788_v44 = vperm.slane %v37_v15, 3 }
 0x65f   :  { %v2680_v45 = vadd.f32 %v2679_v40, %v2666_v42  ;;  %v2817_v40 = vperm.slane %v37_v15, 4 }
 0x661   :  { %v2694_v48 = vadd.f32 %v2693_v46, %v2680_v45 }
 0x663   :  { %v2697_v26 = vadd.f32 %v2694_v48, %v8169_v35 }
 0x665   :  { %v2701_v29 = vsel %vm90_vm1, %v2697_v26, 0.0 }
 0x666   :  { %2702 = vadd.xlane.f32.xlu1 %v2701_v29 }
 0x6d1   :  { %v2700_v22 = vpop.xlane.xlu0 %2699 }
 0x6d2   :  { %v2704_v17 = vmul.f32 %v2700_v22, %v8042_v53 }
 0x6d4   :  { %v2706_v51 = vsub.f32 %v2696_v38, %v2704_v17 }
 0x6d6   :  { %v2708_v55 = vmul.f32 %v2706_v51, %v2706_v51 }
 0x6d8   :  { %v2710_v34 = vsel %vm90_vm1, %v2708_v55, 0.0 }
 0x6d9   :  { %v2703_v59 = vpop.xlane.xlu1 %2702  ;;  %2711 = vadd.xlane.f32.xlu2 %v2710_v34 }
 0x6da   :  { %v2705_v36 = vmul.f32 %v2703_v59, %v8042_v53 }
 0x6dc   :  { %v8708_v39 = vsub.f32 %v2697_v26, %v2705_v36 }
 0x6de   :  { %v2709_v50 = vmul.f32 %v8708_v39, %v8708_v39 }
 0x6e0   :  { %v2713_v35 = vsel %vm90_vm1, %v2709_v50, 0.0 }
 0x6e1   :  { %2714 = vadd.xlane.f32.xlu0 %v2713_v35 }
 0x74c   :  { %v2712_v54 = vpop.xlane.xlu2 %2711 }
 0x74d   :  { %v2716_v21 = vmul.f32 %v2712_v54, %v8042_v53 }
 0x74f   :  { %v2718_v5 = vadd.f32 1e-05, %v2716_v21 }
 0x751   :  { %7557 = vrsqrt.f32 %v2718_v5  ;;  %vm2726_vm14 = vweird.f32 %v2718_v5 }
 0x754   :  { %v2715_v7 = vpop.xlane.xlu0 %2714 }
 0x755   :  { %v2717_v9 = vmul.f32 %v2715_v7, %v8042_v53 }
 0x757   :  { %v7558_v10 = vpop.eup %7557  ;;  %v2719_v11 = vadd.f32 1e-05, %v2717_v9 }
 0x758   :  { %v2721_v12 = vmul.f32 %v7558_v10, %v2718_v5  ;;  %vm2727_vm13 = vweird.f32 %v7558_v10 }
 0x759   :  { %7559 = vrsqrt.f32 %v2719_v11  ;;  %vm2728_vm15 = vmor %vm2726_vm14, %vm2727_vm13  ;;  %vm2736_vm2 = vweird.f32 %v2719_v11 }
 0x75a   :  { %v2722_v58 = vmul.f32 %v7558_v10, %v2721_v12 }
 0x75c   :  { %v2723_v57 = vmul.f32 0.5, %v2722_v58 }
 0x75e   :  { %v2724_v16 = vsub.f32 1.5, %v2723_v57 }
 0x75f   :  { %v7560_v18 = vpop.eup %7559 }
 0x760   :  { %v2725_v20 = vmul.f32 %v7558_v10, %v2724_v16  ;;  %v2731_v23 = vmul.f32 %v7560_v18, %v2719_v11  ;;  %vm2737_vm0 = vweird.f32 %v7560_v18 }
 0x761   :  { %vm2738_vm3 = vmor %vm2736_vm2, %vm2737_vm0 }
 0x762   :  { %v2729_v25 = vsel %vm2728_vm15, %v7558_v10, %v2725_v20  ;;  %v2732_v27 = vmul.f32 %v7560_v18, %v2731_v23 }
 0x763   :  { %v2740_v30 = vmul.f32 %v2729_v25, %v2706_v51 }
 0x764   :  { %v2733_v14 = vmul.f32 0.5, %v2732_v27 }
 0x765   :  { %v2743_v61 = vmul.f32 %v2742_v24, %v2740_v30 }
 0x766   :  { %v2734_v31 = vsub.f32 1.5, %v2733_v14 }
 0x767   :  { %v8754_v32 = vadd.f32 %v2745_v28, %v2743_v61 }
 0x768   :  { %v2735_v33 = vmul.f32 %v7560_v18, %v2734_v31 }
 0x769   :  { %6156 = vmatmul.msk.f32.vlgmr.msra.gmra.mxu1 %vm90_vm1, %v8754_v32  ;;  %6162 = vmatmul.msk.f32.vlgmr.msrb.gmra.mxu2 %vm90_vm1, %v8754_v32 }
 0x76a   :  { %v2739_v8 = vsel %vm2738_vm3, %v7560_v18, %v2735_v33  ;;  %6168 = vmatmul.msk.f32.vlgmr.msrb.gmra.mxu3 %vm90_vm1, %v8754_v32 }
 0x76b   :  { %v2741_v56 = vmul.f32 %v2739_v8, %v8708_v39 }
 0x76d   :  { %v2744_v13 = vmul.f32 %v2742_v24, %v2741_v56 }
 0x76f   :  { %v8763_v6 = vadd.f32 %v2745_v28, %v2744_v13 }
 0x771   :  { %6157 = vmatmul.msk.f32.gmra.mxu1 %vm90_vm1, %v8763_v6  ;;  %6163 = vmatmul.msk.f32.gmra.mxu2 %vm90_vm1, %v8763_v6 }
 0x772   :  { %6169 = vmatmul.msk.f32.gmra.mxu3 %vm90_vm1, %v8763_v6 }
 0x7e6   :  { %v2777_v38 = vpop.f32.mrf.mxu1 }
 0x7e7   :  { %v2778_v41 = vadd.f32 %v2777_v38, %v2753_v37 }
 0x7e9   :  { %v8771_v42 = vmul.f32 0.5, %v2778_v41 }
 0x7eb   :  { %v2859_v46 = vperm.slane %v8771_v42, 0  ;;  %v2845_v55 = vrot.slane %v8771_v42, 1  ;;  %v2846_v47 = vrot.slane %v8771_v42, 2  ;;  %v2847_v19 = vrot.slane %v8771_v42, 3 }
 0x7ec   :  { %v2806_v45 = vpop.f32.mrf.mxu2  ;;  %v2848_v7 = vrot.slane %v8771_v42, 4  ;;  %v2849_v57 = vrot.slane %v8771_v42, 5  ;;  %v2850_v24 = vrot.slane %v8771_v42, 6  ;;  %v2851_v61 = vrot.slane %v8771_v42, 7 }
 0x7ed   :  { %v2807_v48 = vadd.f32 %v2806_v45, %v2788_v44  ;;  %v2835_v26 = vpop.f32.mrf.mxu3  ;;  %v2891_v51 = vmul.f32 %v7764_v43, %v2859_v46  ;;  %v2860_v36 = vperm.slane %v2845_v55, 0  ;;  %v2861_v0 = vperm.slane %v2846_v47, 0 }
 0x7ee   :  { %v2836_v29 = vadd.f32 %v2835_v26, %v2817_v40  ;;  %v2780_v22 = vpop.f32.mrf.mxu1  ;;  %v2862_v1 = vperm.slane %v2847_v19, 0  ;;  %v2863_v10 = vperm.slane %v2848_v7, 0  ;;  %v2864_v16 = vperm.slane %v2849_v57, 0 }
 0x7ef   :  { %v2781_v17 = vadd.f32 %v2780_v22, %v2753_v37  ;;  %6170 = vmatpush.xpose.msk.msrb.mxu0 %vm90_vm1, %v2807_v48  ;;  %v2892_v60 = vmul.f32 %v7764_v43, %v2860_v36  ;;  %v2893_v3 = vmul.f32 %v7764_v43, %v2861_v0  ;;  %v2865_v27 = vperm.slane %v2850_v24, 0 }
 0x7f0   :  { %3258 = vmatpush.msra.mxu2 %v2836_v29  ;;  %v2894_v21 = vmul.f32 %v7764_v43, %v2862_v1  ;;  %v2895_v12 = vmul.f32 %v7764_v43, %v2863_v10  ;;  %v2896_v20 = vmul.f32 %v7764_v43, %v2864_v16  ;;  %v2866_v33 = vperm.slane %v2851_v61, 0 }
 0x7f1   :  { %v8777_v34 = vmul.f32 0.5, %v2781_v17  ;;  %v2897_v30 = vmul.f32 %v7764_v43, %v2865_v27 }
 0x7f2   :  { %6171 = vmatmul.msk.f32.vlgmr.msrb.gmra.mxu0 %vm90_vm1, %v2891_v51  ;;  %v2898_v56 = vmul.f32 %v7764_v43, %v2866_v33 }
 0x7f3   :  { %v2867_v39 = vperm.slane %v8777_v34, 0  ;;  %v2852_v52 = vrot.slane %v8777_v34, 1  ;;  %v2853_v62 = vrot.slane %v8777_v34, 2  ;;  %v2854_v9 = vrot.slane %v8777_v34, 3 }
 0x7f4   :  { %v2809_v59 = vpop.f32.mrf.mxu2  ;;  %v2855_v15 = vrot.slane %v8777_v34, 4  ;;  %v2856_v25 = vrot.slane %v8777_v34, 5  ;;  %v2857_v31 = vrot.slane %v8777_v34, 6  ;;  %v2858_v37 = vrot.slane %v8777_v34, 7 }
 0x7f5   :  { %v2810_v50 = vadd.f32 %v2809_v59, %v2788_v44  ;;  %v2838_v35 = vpop.f32.mrf.mxu3  ;;  %v2899_v63 = vmul.f32 %v7764_v43, %v2867_v39  ;;  %v2868_v2 = vperm.slane %v2852_v52, 0  ;;  %v2869_v54 = vperm.slane %v2853_v62, 0 }
 0x7f6   :  { %v2839_v49 = vadd.f32 %v2838_v35, %v2817_v40  ;;  %v2870_v11 = vperm.slane %v2854_v9, 0  ;;  %v2871_v18 = vperm.slane %v2855_v15, 0  ;;  %v2872_v28 = vperm.slane %v2856_v25, 0 }
 0x7f7   :  { %6179 = vmatpush.xpose.msk.msrb.mxu1 %vm90_vm1, %v2810_v50  ;;  %v2900_v4 = vmul.f32 %v7764_v43, %v2868_v2  ;;  %v2901_v5 = vmul.f32 %v7764_v43, %v2869_v54  ;;  %v2873_v8 = vperm.slane %v2857_v31, 0  ;;  %v2874_v38 = vperm.slane %v2858_v37, 0 }
 0x7f8   :  { %3323 = vmatpush.msra.mxu3 %v2839_v49  ;;  %v2902_v58 = vmul.f32 %v7764_v43, %v2870_v11  ;;  %v2903_v23 = vmul.f32 %v7764_v43, %v2871_v18  ;;  %v2904_v14 = vmul.f32 %v7764_v43, %v2872_v28 }
 0x7f9   :  { %v2905_v13 = vmul.f32 %v7764_v43, %v2873_v8  ;;  %v2906_v41 = vmul.f32 %v7764_v43, %v2874_v38 }
 0x7fa   :  { %6172 = vmatmul.msk.f32.gmra.mxu0 %vm90_vm1, %v2892_v60  ;;  %6180 = vmatmul.msk.f32.vlgmr.msrb.gmra.mxu1 %vm90_vm1, %v2899_v63 }
 0x802   :  { %6173 = vmatmul.msk.f32.gmra.mxu0 %vm90_vm1, %v2893_v3  ;;  %6181 = vmatmul.msk.f32.gmra.mxu1 %vm90_vm1, %v2900_v4 }
 0x80a   :  { %6174 = vmatmul.msk.f32.gmra.mxu0 %vm90_vm1, %v2894_v21  ;;  %6182 = vmatmul.msk.f32.gmra.mxu1 %vm90_vm1, %v2901_v5 }
 0x812   :  { %6175 = vmatmul.msk.f32.gmra.mxu0 %vm90_vm1, %v2895_v12  ;;  %6183 = vmatmul.msk.f32.gmra.mxu1 %vm90_vm1, %v2902_v58 }
 0x81a   :  { %6176 = vmatmul.msk.f32.gmra.mxu0 %vm90_vm1, %v2896_v20  ;;  %6184 = vmatmul.msk.f32.gmra.mxu1 %vm90_vm1, %v2903_v23 }
 0x822   :  { %6177 = vmatmul.msk.f32.gmra.mxu0 %vm90_vm1, %v2897_v30  ;;  %6185 = vmatmul.msk.f32.gmra.mxu1 %vm90_vm1, %v2904_v14 }
 0x82a   :  { %6178 = vmatmul.msk.f32.gmra.mxu0 %vm90_vm1, %v2898_v56  ;;  %6186 = vmatmul.msk.f32.gmra.mxu1 %vm90_vm1, %v2905_v13 }
 0x832   :  { %6187 = vmatmul.msk.f32.gmra.mxu1 %vm90_vm1, %v2906_v41 }
 0x86f   :  { %v2951_v42 = vpop.f32.mrf.mxu0 }
 0x870   :  { %v3043_v44 = vsel %vm380_vm5, %v2951_v42, -inf }
 0x871   :  { %3044 = vmax.xlane.f32.xlu1 %v3043_v44 }
 0x877   :  { %v2954_v40 = vpop.f32.mrf.mxu0  ;;  %v3019_v45 = vpop.f32.mrf.mxu1 }
 0x878   :  { %v3046_v46 = vsel %vm380_vm5, %v2954_v40, -inf  ;;  %v3067_v48 = vsel %vm380_vm5, %v3019_v45, -inf }
 0x879   :  { %3047 = vmax.xlane.f32.xlu2 %v3046_v46  ;;  %3068 = vmax.xlane.f32.xlu0 %v3067_v48 }
 0x87f   :  { %v2957_v26 = vpop.f32.mrf.mxu0  ;;  %v3022_v29 = vpop.f32.mrf.mxu1 }
 0x880   :  { %v3049_v22 = vsel %vm380_vm5, %v2957_v26, -inf  ;;  %v3070_v17 = vsel %vm380_vm5, %v3022_v29, -inf }
 0x881   :  { %3050 = vmax.xlane.f32.xlu1 %v3049_v22  ;;  %3071 = vmax.xlane.f32.xlu2 %v3070_v17 }
 0x887   :  { %v8830_v51 = vpop.f32.mrf.mxu0  ;;  %v8832_v55 = vpop.f32.mrf.mxu1 }
 0x888   :  { %v3052_v34 = vsel %vm380_vm5, %v8830_v51, -inf  ;;  %v3073_v59 = vsel %vm380_vm5, %v8832_v55, -inf }
 0x889   :  { %3053 = vmax.xlane.f32.xlu0 %v3052_v34  ;;  %3074 = vmax.xlane.f32.xlu1 %v3073_v59 }
 0x88f   :  { %v8838_v36 = vpop.f32.mrf.mxu0  ;;  %v8840_v39 = vpop.f32.mrf.mxu1 }
 0x890   :  { %v3055_v50 = vsel %vm380_vm5, %v8838_v36, -inf  ;;  %v3076_v35 = vsel %vm380_vm5, %v8840_v39, -inf }
 0x891   :  { %3056 = vmax.xlane.f32.xlu2 %v3055_v50  ;;  %3077 = vmax.xlane.f32.xlu0 %v3076_v35 }
 0x897   :  { %v8846_v49 = vpop.f32.mrf.mxu0  ;;  %v8848_v60 = vpop.f32.mrf.mxu1 }
 0x898   :  { %v3058_v63 = vsel %vm380_vm5, %v8846_v49, -inf  ;;  %v3079_v47 = vsel %vm380_vm5, %v8848_v60, -inf }
 0x899   :  { %3059 = vmax.xlane.f32.xlu1 %v3058_v63  ;;  %3080 = vmax.xlane.f32.xlu2 %v3079_v47 }
 0x89f   :  { %v8854_v52 = vpop.f32.mrf.mxu0  ;;  %v8856_v0 = vpop.f32.mrf.mxu1 }
 0x8a0   :  { %v3061_v2 = vsel %vm380_vm5, %v8854_v52, -inf  ;;  %v3082_v3 = vsel %vm380_vm5, %v8856_v0, -inf }
 0x8a1   :  { %3062 = vmax.xlane.f32.xlu0 %v3061_v2  ;;  %3083 = vmax.xlane.f32.xlu1 %v3082_v3 }
 0x8a7   :  { %v8862_v4 = vpop.f32.mrf.mxu0  ;;  %v8864_v19 = vpop.f32.mrf.mxu1 }
 0x8a8   :  { %v3064_v62 = vsel %vm380_vm5, %v8862_v4, -inf  ;;  %v3085_v1 = vsel %vm380_vm5, %v8864_v19, -inf }
 0x8a9   :  { %3065 = vmax.xlane.f32.xlu0 %v3064_v62  ;;  %3086 = vmax.xlane.f32.xlu1 %v3085_v1 }
 0x8af   :  { %v8870_v54 = vpop.f32.mrf.mxu1 }
 0x8b0   :  { %v3088_v21 = vsel %vm380_vm5, %v8870_v54, -inf }
 0x8b1   :  { %3089 = vmax.xlane.f32.xlu1 %v3088_v21 }
 0x8e4   :  { %v3045_v5 = vpop.xlane.xlu1 %3044 }
 0x8e5   :  { %v3091_v7 = vsub.f32 %v2951_v42, %v3045_v5 }
 0x8e7   :  { %v3107_v9 = vmul.f32 1.442695, %v3091_v7 }
 0x8e9   :  { %7561 = vpow2.f32 %v3107_v9 }
 0x8ec   :  { %v3048_v10 = vpop.xlane.xlu2 %3047  ;;  %v3069_v11 = vpop.xlane.xlu0 %3068 }
 0x8ed   :  { %v3092_v12 = vsub.f32 %v2954_v40, %v3048_v10  ;;  %v3099_v58 = vsub.f32 %v3019_v45, %v3069_v11 }
 0x8ef   :  { %v8874_v57 = vpop.eup %7561  ;;  %v3109_v15 = vmul.f32 1.442695, %v3092_v12  ;;  %v3123_v16 = vmul.f32 1.442695, %v3099_v58 }
 0x8f0   :  { %v3139_v18 = vsel %vm380_vm5, %v8874_v57, 0.0 }
 0x8f1   :  { %7563 = vpow2.f32 %v3109_v15  ;;  %3140 = vadd.xlane.f32.xlu2 %v3139_v18 }
 0x8f2   :  { %7565 = vpow2.f32 %v3123_v16 }
 0x8f4   :  { %v3051_v20 = vpop.xlane.xlu1 %3050  ;;  %v3072_v23 = vpop.xlane.xlu2 %3071 }
 0x8f5   :  { %v3093_v24 = vsub.f32 %v2957_v26, %v3051_v20  ;;  %v3100_v25 = vsub.f32 %v3022_v29, %v3072_v23 }
 0x8f7   :  { %v8878_v27 = vpop.eup %7563  ;;  %v3111_v28 = vmul.f32 1.442695, %v3093_v24  ;;  %v3125_v30 = vmul.f32 1.442695, %v3100_v25 }
 0x8f8   :  { %v8880_v14 = vpop.eup %7565  ;;  %v3142_v61 = vsel %vm380_vm5, %v8878_v27, 0.0 }
 0x8f9   :  { %7567 = vpow2.f32 %v3111_v28  ;;  %v3163_v31 = vsel %vm380_vm5, %v8880_v14, 0.0  ;;  %3143 = vadd.xlane.f32.xlu2 %v3142_v61 }
 0x8fa   :  { %7569 = vpow2.f32 %v3125_v30  ;;  %3164 = vadd.xlane.f32.xlu0 %v3163_v31 }
 0x8fc   :  { %v3054_v33 = vpop.xlane.xlu0 %3053  ;;  %v3075_v8 = vpop.xlane.xlu1 %3074 }
 0x8fd   :  { %v3094_v56 = vsub.f32 %v8830_v51, %v3054_v33  ;;  %v3101_v13 = vsub.f32 %v8832_v55, %v3075_v8 }
 0x8ff   :  { %v8888_v37 = vpop.eup %7567  ;;  %v3113_v38 = vmul.f32 1.442695, %v3094_v56  ;;  %v3127_v41 = vmul.f32 1.442695, %v3101_v13 }
 0x900   :  { %v8890_v42 = vpop.eup %7569  ;;  %v3145_v44 = vsel %vm380_vm5, %v8888_v37, 0.0 }
 0x901   :  { %7571 = vpow2.f32 %v3113_v38  ;;  %v3166_v40 = vsel %vm380_vm5, %v8890_v42, 0.0  ;;  %3146 = vadd.xlane.f32.xlu2 %v3145_v44 }
 0x902   :  { %7573 = vpow2.f32 %v3127_v41  ;;  %3167 = vadd.xlane.f32.xlu0 %v3166_v40 }
 0x904   :  { %v3057_v45 = vpop.xlane.xlu2 %3056  ;;  %v3078_v46 = vpop.xlane.xlu0 %3077 }
 0x905   :  { %v3095_v48 = vsub.f32 %v8838_v36, %v3057_v45  ;;  %v3102_v26 = vsub.f32 %v8840_v39, %v3078_v46 }
 0x907   :  { %v8898_v29 = vpop.eup %7571  ;;  %v3115_v22 = vmul.f32 1.442695, %v3095_v48  ;;  %v3129_v17 = vmul.f32 1.442695, %v3102_v26 }
 0x908   :  { %v8900_v51 = vpop.eup %7573  ;;  %v3148_v55 = vsel %vm380_vm5, %v8898_v29, 0.0 }
 0x909   :  { %7575 = vpow2.f32 %v3115_v22  ;;  %v3169_v34 = vsel %vm380_vm5, %v8900_v51, 0.0  ;;  %3149 = vadd.xlane.f32.xlu1 %v3148_v55 }
 0x90a   :  { %7577 = vpow2.f32 %v3129_v17  ;;  %3170 = vadd.xlane.f32.xlu2 %v3169_v34 }
 0x90c   :  { %v3060_v59 = vpop.xlane.xlu1 %3059  ;;  %v3081_v36 = vpop.xlane.xlu2 %3080 }
 0x90d   :  { %v3096_v39 = vsub.f32 %v8846_v49, %v3060_v59  ;;  %v3103_v50 = vsub.f32 %v8848_v60, %v3081_v36 }
 0x90f   :  { %v8908_v35 = vpop.eup %7575  ;;  %v3117_v63 = vmul.f32 1.442695, %v3096_v39  ;;  %v3131_v47 = vmul.f32 1.442695, %v3103_v50 }
 0x910   :  { %v8910_v2 = vpop.eup %7577  ;;  %v3151_v3 = vsel %vm380_vm5, %v8908_v35, 0.0 }
 0x911   :  { %7579 = vpow2.f32 %v3117_v63  ;;  %3152 = vadd.xlane.f32.xlu0 %v3151_v3  ;;  %v3172_v62 = vsel %vm380_vm5, %v8910_v2, 0.0 }
 0x912   :  { %7581 = vpow2.f32 %v3131_v47  ;;  %3173 = vadd.xlane.f32.xlu1 %v3172_v62 }
 0x914   :  { %v3063_v1 = vpop.xlane.xlu0 %3062  ;;  %v3084_v49 = vpop.xlane.xlu1 %3083 }
 0x915   :  { %v3097_v60 = vsub.f32 %v8854_v52, %v3063_v1  ;;  %v3104_v21 = vsub.f32 %v8856_v0, %v3084_v49 }
 0x917   :  { %v8918_v5 = vpop.eup %7579  ;;  %v3119_v7 = vmul.f32 1.442695, %v3097_v60  ;;  %v3133_v9 = vmul.f32 1.442695, %v3104_v21 }
 0x918   :  { %v8920_v10 = vpop.eup %7581  ;;  %v3154_v11 = vsel %vm380_vm5, %v8918_v5, 0.0 }
 0x919   :  { %7583 = vpow2.f32 %v3119_v7  ;;  %3155 = vadd.xlane.f32.xlu2 %v3154_v11  ;;  %v3175_v12 = vsel %vm380_vm5, %v8920_v10, 0.0 }
 0x91a   :  { %7585 = vpow2.f32 %v3133_v9  ;;  %3176 = vadd.xlane.f32.xlu0 %v3175_v12 }
 0x91c   :  { %v3066_v58 = vpop.xlane.xlu0 %3065  ;;  %v3087_v52 = vpop.xlane.xlu1 %3086 }
 0x91d   :  { %v3098_v0 = vsub.f32 %v8862_v4, %v3066_v58  ;;  %v3105_v15 = vsub.f32 %v8864_v19, %v3087_v52 }
 0x91f   :  { %v8928_v16 = vpop.eup %7583  ;;  %v3121_v18 = vmul.f32 1.442695, %v3098_v0  ;;  %v3135_v20 = vmul.f32 1.442695, %v3105_v15 }
 0x920   :  { %v8930_v23 = vpop.eup %7585  ;;  %v3157_v24 = vsel %vm380_vm5, %v8928_v16, 0.0 }
 0x921   :  { %7587 = vpow2.f32 %v3121_v18  ;;  %v3178_v25 = vsel %vm380_vm5, %v8930_v23, 0.0  ;;  %3158 = vadd.xlane.f32.xlu1 %v3157_v24  ;;  %v6207_v24 = vld [vmem:[%s9763_s4 + $0x38] sm:$0xff] }
 0x922   :  { %7589 = vpow2.f32 %v3135_v20  ;;  %3179 = vadd.xlane.f32.xlu2 %v3178_v25  ;;  %3529 = vmatpush.msra.mxu0 %v6207_v24 }
 0x924   :  { %v3090_v28 = vpop.xlane.xlu1 %3089 }
 0x925   :  { %v3106_v4 = vsub.f32 %v8870_v54, %v3090_v28 }
 0x927   :  { %v8937_v19 = vpop.eup %7587  ;;  %v3137_v30 = vmul.f32 1.442695, %v3106_v4 }
 0x928   :  { %v8939_v61 = vpop.eup %7589  ;;  %v3160_v31 = vsel %vm380_vm5, %v8937_v19, 0.0 }
 0x929   :  { %7591 = vpow2.f32 %v3137_v30  ;;  %3161 = vadd.xlane.f32.xlu0 %v3160_v31  ;;  %v3181_v33 = vsel %vm380_vm5, %v8939_v61, 0.0  ;;  %v6206_v30 = vld [vmem:[%s9763_s4 + $0x30] sm:$0xff] }
 0x92a   :  { %3182 = vadd.xlane.f32.xlu1 %v3181_v33  ;;  %3530 = vmatpush.msra.mxu0 %v6206_v30 }
 0x92f   :  { %v8945_v8 = vpop.eup %7591 }
 0x930   :  { %v3184_v56 = vsel %vm380_vm5, %v8945_v8, 0.0 }
 0x931   :  { %3185 = vadd.xlane.f32.xlu2 %v3184_v56  ;;  %v6205_v56 = vld [vmem:[%s9763_s4 + $0x28] sm:$0xff] }
 0x932   :  { %3531 = vmatpush.msra.mxu0 %v6205_v56 }
 0x964   :  { %v3141_v54 = vpop.xlane.xlu2 %3140 }
 0x965   :  { %7593 = vrcp.f32 %v3141_v54 }
 0x96b   :  { %v7594_v13 = vpop.eup %7593 }
 0x96c   :  { %v3203_v38 = vmul.f32 %v7594_v13, %v8874_v57  ;;  %v3144_v41 = vpop.xlane.xlu2 %3143 }
 0x96d   :  { %v3165_v44 = vpop.xlane.xlu0 %3164  ;;  %7595 = vrcp.f32 %v3144_v41 }
 0x96e   :  { %7597 = vrcp.f32 %v3165_v44  ;;  %6188 = vmatmul.msk.f32.vlgmr.msra.gmra.mxu2 %vm380_vm5, %v3203_v38 }
 0x973   :  { %v7596_v40 = vpop.eup %7595 }
 0x974   :  { %v7598_v45 = vpop.eup %7597  ;;  %v3147_v46 = vpop.xlane.xlu2 %3146  ;;  %v3204_v48 = vmul.f32 %v7596_v40, %v8878_v27 }
 0x975   :  { %v3211_v26 = vmul.f32 %v7598_v45, %v8880_v14  ;;  %v3168_v22 = vpop.xlane.xlu0 %3167  ;;  %7599 = vrcp.f32 %v3147_v46 }
 0x976   :  { %7601 = vrcp.f32 %v3168_v22  ;;  %6189 = vmatmul.msk.f32.gmra.mxu2 %vm380_vm5, %v3204_v48 }
 0x977   :  { %6196 = vmatmul.msk.f32.vlgmr.msra.gmra.mxu3 %vm380_vm5, %v3211_v26 }
 0x97b   :  { %v7600_v57 = vpop.eup %7599 }
 0x97c   :  { %v7602_v17 = vpop.eup %7601  ;;  %v3150_v55 = vpop.xlane.xlu1 %3149  ;;  %v3205_v34 = vmul.f32 %v7600_v57, %v8888_v37 }
 0x97d   :  { %v3171_v59 = vpop.xlane.xlu2 %3170  ;;  %7603 = vrcp.f32 %v3150_v55  ;;  %v3212_v36 = vmul.f32 %v7602_v17, %v8890_v42 }
 0x97e   :  { %7605 = vrcp.f32 %v3171_v59  ;;  %6190 = vmatmul.msk.f32.gmra.mxu2 %vm380_vm5, %v3205_v34 }
 0x97f   :  { %6197 = vmatmul.msk.f32.gmra.mxu3 %vm380_vm5, %v3212_v36 }
 0x983   :  { %v7604_v27 = vpop.eup %7603 }
 0x984   :  { %v7606_v14 = vpop.eup %7605  ;;  %v3153_v39 = vpop.xlane.xlu0 %3152  ;;  %v3206_v50 = vmul.f32 %v7604_v27, %v8898_v29 }
 0x985   :  { %7607 = vrcp.f32 %v3153_v39  ;;  %v3174_v63 = vpop.xlane.xlu1 %3173  ;;  %v3213_v47 = vmul.f32 %v7606_v14, %v8900_v51 }
 0x986   :  { %7609 = vrcp.f32 %v3174_v63  ;;  %6191 = vmatmul.msk.f32.gmra.mxu2 %vm380_vm5, %v3206_v50  ;;  %v6204_v50 = vld [vmem:[%s9763_s4 + $0x20] sm:$0xff] }
 0x987   :  { %6198 = vmatmul.msk.f32.gmra.mxu3 %vm380_vm5, %v3213_v47  ;;  %3532 = vmatpush.msra.mxu0 %v6204_v50 }
 0x98b   :  { %v7608_v37 = vpop.eup %7607 }
 0x98c   :  { %v7610_v42 = vpop.eup %7609  ;;  %v3156_v3 = vpop.xlane.xlu2 %3155  ;;  %v3207_v62 = vmul.f32 %v7608_v37, %v8908_v35 }
 0x98d   :  { %v3177_v1 = vpop.xlane.xlu0 %3176  ;;  %7611 = vrcp.f32 %v3156_v3  ;;  %v3214_v49 = vmul.f32 %v7610_v42, %v8910_v2 }
 0x98e   :  { %7613 = vrcp.f32 %v3177_v1  ;;  %6192 = vmatmul.msk.f32.gmra.mxu2 %vm380_vm5, %v3207_v62 }
 0x98f   :  { %6199 = vmatmul.msk.f32.gmra.mxu3 %vm380_vm5, %v3214_v49 }
 0x993   :  { %v7612_v29 = vpop.eup %7611 }
 0x994   :  { %v7614_v51 = vpop.eup %7613  ;;  %v3159_v60 = vpop.xlane.xlu1 %3158  ;;  %v3208_v21 = vmul.f32 %v7612_v29, %v8918_v5 }
 0x995   :  { %v3180_v7 = vpop.xlane.xlu2 %3179  ;;  %7615 = vrcp.f32 %v3159_v60  ;;  %v3215_v9 = vmul.f32 %v7614_v51, %v8920_v10 }
 0x996   :  { %7617 = vrcp.f32 %v3180_v7  ;;  %6193 = vmatmul.msk.f32.gmra.mxu2 %vm380_vm5, %v3208_v21 }
 0x997   :  { %6200 = vmatmul.msk.f32.gmra.mxu3 %vm380_vm5, %v3215_v9 }
 0x99b   :  { %v7616_v35 = vpop.eup %7615 }
 0x99c   :  { %v7618_v2 = vpop.eup %7617  ;;  %v3162_v11 = vpop.xlane.xlu0 %3161  ;;  %v3209_v12 = vmul.f32 %v7616_v35, %v8928_v16 }
 0x99d   :  { %7619 = vrcp.f32 %v3162_v11  ;;  %v3183_v58 = vpop.xlane.xlu1 %3182  ;;  %v3216_v52 = vmul.f32 %v7618_v2, %v8930_v23 }
 0x99e   :  { %7621 = vrcp.f32 %v3183_v58  ;;  %6194 = vmatmul.msk.f32.gmra.mxu2 %vm380_vm5, %v3209_v12 }
 0x99f   :  { %6201 = vmatmul.msk.f32.gmra.mxu3 %vm380_vm5, %v3216_v52 }
 0x9a3   :  { %v7620_v5 = vpop.eup %7619 }
 0x9a4   :  { %v7622_v10 = vpop.eup %7621  ;;  %v3186_v0 = vpop.xlane.xlu2 %3185  ;;  %v3210_v15 = vmul.f32 %v7620_v5, %v8937_v19 }
 0x9a5   :  { %7623 = vrcp.f32 %v3186_v0  ;;  %v3217_v18 = vmul.f32 %v7622_v10, %v8939_v61 }
 0x9a6   :  { %6195 = vmatmul.msk.f32.gmra.mxu2 %vm380_vm5, %v3210_v15 }
 0x9a7   :  { %6202 = vmatmul.msk.f32.gmra.mxu3 %vm380_vm5, %v3217_v18 }
 0x9ab   :  { %v7624_v16 = vpop.eup %7623 }
 0x9ac   :  { %v3218_v20 = vmul.f32 %v7624_v16, %v8945_v8 }
 0x9af   :  { %6203 = vmatmul.msk.f32.gmra.mxu3 %vm380_vm5, %v3218_v20 }
 0x9f1   :  { %v3260_v23 = vpop.f32.mrf.mxu2 }
 0x9f2   :  { %v3349_v33 = vmul.f32 %v7764_v43, %v3260_v23 }
 0x9f4   :  { %v3365_v8 = vsel %vm90_vm1, %v3349_v33, 0.0 }
 0x9f5   :  { %v3366_v13 = vrot.slane %v3365_v8, 4 }
 0x9f7   :  { %v3367_v40 = vadd.f32 %v3366_v13, %v3365_v8 }
 0x9f9   :  { %v3263_v25 = vpop.f32.mrf.mxu2  ;;  %v3368_v55 = vrot.slane %v3367_v40, 2 }
 0x9fa   :  { %v3325_v28 = vpop.f32.mrf.mxu3  ;;  %v3350_v38 = vmul.f32 %v7764_v43, %v3263_v25 }
 0x9fb   :  { %v3357_v57 = vmul.f32 %v7764_v43, %v3325_v28  ;;  %v3369_v62 = vadd.f32 %v3368_v55, %v3367_v40 }
 0x9fc   :  { %v3372_v45 = vsel %vm90_vm1, %v3350_v38, 0.0 }
 0x9fd   :  { %v3373_v22 = vrot.slane %v3372_v45, 4  ;;  %v3421_v37 = vsel %vm90_vm1, %v3357_v57, 0.0  ;;  %v3370_v12 = vrot.slane %v3369_v62, 1 }
 0x9fe   :  { %v3422_v21 = vrot.slane %v3421_v37, 4 }
 0x9ff   :  { %v3374_v47 = vadd.f32 %v3373_v22, %v3372_v45  ;;  %v3371_v38 = vadd.f32 %v3370_v12, %v3369_v62 }
 0xa00   :  { %v3423_v20 = vadd.f32 %v3422_v21, %v3421_v37 }
 0xa01   :  { %v3266_v4 = vpop.f32.mrf.mxu2  ;;  %v3375_v9 = vrot.slane %v3374_v47, 2 }
 0xa02   :  { %v3328_v19 = vpop.f32.mrf.mxu3  ;;  %v3351_v44 = vmul.f32 %v7764_v43, %v3266_v4  ;;  %v3424_v45 = vrot.slane %v3423_v20, 2 }
 0xa03   :  { %v3358_v14 = vmul.f32 %v7764_v43, %v3328_v19  ;;  %v3376_v28 = vadd.f32 %v3375_v9, %v3374_v47 }
 0xa04   :  { %v3379_v26 = vsel %vm90_vm1, %v3351_v44, 0.0 }
 0xa05   :  { %v3380_v27 = vrot.slane %v3379_v26, 4  ;;  %v3428_v29 = vsel %vm90_vm1, %v3358_v14, 0.0  ;;  %v3377_v40 = vrot.slane %v3376_v28, 1 }
 0xa06   :  { %v3429_v58 = vrot.slane %v3428_v29, 4 }
 0xa07   :  { %v3381_v49 = vadd.f32 %v3380_v27, %v3379_v26  ;;  %v3378_v37 = vadd.f32 %v3377_v40, %v3376_v28 }
 0xa09   :  { %v3269_v61 = vpop.f32.mrf.mxu2  ;;  %v3382_v0 = vrot.slane %v3381_v49, 2 }
 0xa0a   :  { %v3331_v31 = vpop.f32.mrf.mxu3  ;;  %v3352_v46 = vmul.f32 %v7764_v43, %v3269_v61  ;;  %v3430_v61 = vadd.f32 %v3429_v58, %v3428_v29  ;;  %v3499_v58 = vsel %vm836_vm6, %v3378_v37, %v3371_v38 }
 0xa0b   :  { %v3359_v3 = vmul.f32 %v7764_v43, %v3331_v31  ;;  %v3383_v8 = vadd.f32 %v3382_v0, %v3381_v49 }
 0xa0c   :  { %v3386_v34 = vsel %vm90_vm1, %v3352_v46, 0.0  ;;  %v3431_v22 = vrot.slane %v3430_v61, 2 }
 0xa0d   :  { %v3387_v42 = vrot.slane %v3386_v34, 4  ;;  %v3435_v2 = vsel %vm90_vm1, %v3359_v3, 0.0 }
 0xa0e   :  { %v3436_v23 = vrot.slane %v3435_v2, 4 }
 0xa0f   :  { %v3388_v35 = vadd.f32 %v3387_v42, %v3386_v34 }
 0xa11   :  { %v3272_v54 = vpop.f32.mrf.mxu2  ;;  %v3389_v4 = vrot.slane %v3388_v35, 2 }
 0xa12   :  { %v3334_v41 = vpop.f32.mrf.mxu3  ;;  %v3353_v48 = vmul.f32 %v7764_v43, %v3272_v54 }
 0xa13   :  { %v3360_v51 = vmul.f32 %v7764_v43, %v3334_v41  ;;  %v3437_v41 = vadd.f32 %v3436_v23, %v3435_v2  ;;  %v3390_v46 = vadd.f32 %v3389_v4, %v3388_v35 }
 0xa14   :  { %v3393_v39 = vsel %vm90_vm1, %v3353_v48, 0.0 }
 0xa15   :  { %v3394_v1 = vrot.slane %v3393_v39, 4  ;;  %v3442_v15 = vsel %vm90_vm1, %v3360_v51, 0.0  ;;  %v3391_v42 = vrot.slane %v3390_v46, 1 }
 0xa16   :  { %v3443_v33 = vrot.slane %v3442_v15, 4 }
 0xa17   :  { %v3395_v52 = vadd.f32 %v3394_v1, %v3393_v39  ;;  %v3438_v39 = vrot.slane %v3437_v41, 2  ;;  %v3432_v1 = vadd.f32 %v3431_v22, %v3430_v61 }
 0xa19   :  { %v3275_v17 = vpop.f32.mrf.mxu2  ;;  %v3396_v31 = vrot.slane %v3395_v52, 2  ;;  %v3439_v35 = vadd.f32 %v3438_v39, %v3437_v41  ;;  %v3433_v0 = vrot.slane %v3432_v1, 1 }
 0xa1a   :  { %v3354_v59 = vmul.f32 %v7764_v43, %v3275_v17  ;;  %v3337_v36 = vpop.f32.mrf.mxu3  ;;  %v3444_v17 = vadd.f32 %v3443_v33, %v3442_v15 }
 0xa1b   :  { %v3361_v7 = vmul.f32 %v7764_v43, %v3337_v36  ;;  %v3397_v57 = vadd.f32 %v3396_v31, %v3395_v52  ;;  %v3425_v52 = vadd.f32 %v3424_v45, %v3423_v20  ;;  %v3434_v45 = vadd.f32 %v3433_v0, %v3432_v1  ;;  %v7342_v0 = vld [vmem:[%s9764_s5 + $0x1bc] sm:$0xf0] }
 0xa1c   :  { %v3400_v63 = vsel %vm90_vm1, %v3354_v59, 0.0  ;;  %v3384_v59 = vrot.slane %v3383_v8, 1  ;;  %v3445_v29 = vrot.slane %v3444_v17, 2 }
 0xa1d   :  { %v3401_v60 = vrot.slane %v3400_v63, 4  ;;  %v3449_v24 = vsel %vm90_vm1, %v3361_v7, 0.0  ;;  %v3398_v49 = vrot.slane %v3397_v57, 1 }
 0xa1e   :  { %v3450_v54 = vrot.slane %v3449_v24, 4 }
 0xa1f   :  { %v3402_v18 = vadd.f32 %v3401_v60, %v3400_v63  ;;  %v3385_v60 = vadd.f32 %v3384_v59, %v3383_v8  ;;  %v3399_v15 = vadd.f32 %v3398_v49, %v3397_v57 }
 0xa20   :  { %v3451_v27 = vadd.f32 %v3450_v54, %v3449_v24  ;;  %v3426_v54 = vrot.slane %v3425_v52, 1 }
 0xa21   :  { %v3278_v11 = vpop.f32.mrf.mxu2  ;;  %v3403_v56 = vrot.slane %v3402_v18, 2 }
 0xa22   :  { %v3355_v5 = vmul.f32 %v7764_v43, %v3278_v11  ;;  %v3340_v10 = vpop.f32.mrf.mxu3  ;;  %v3452_v7 = vrot.slane %v3451_v27, 2 }
 0xa23   :  { %v3362_v16 = vmul.f32 %v7764_v43, %v3340_v10  ;;  %v3404_v36 = vadd.f32 %v3403_v56, %v3402_v18  ;;  %v3446_v18 = vadd.f32 %v3445_v29, %v3444_v17  ;;  %v9044_v29 = vld [vmem:[%s9762_s2 + $0x8] sm:$0xff] }
 0xa24   :  { %v3407_v25 = vsel %vm90_vm1, %v3355_v5, 0.0  ;;  %v3392_v5 = vadd.f32 %v3391_v42, %v3390_v46 }
 0xa25   :  { %v3408_v19 = vrot.slane %v3407_v25, 4  ;;  %v3456_v30 = vsel %vm90_vm1, %v3362_v16, 0.0  ;;  %v3405_v21 = vrot.slane %v3404_v36, 1  ;;  %v3447_v38 = vrot.slane %v3446_v18, 1 }
 0xa26   :  { %v3457_v44 = vrot.slane %v3456_v30, 4 }
 0xa27   :  { %v3409_v13 = vadd.f32 %v3408_v19, %v3407_v25  ;;  %v3406_v24 = vadd.f32 %v3405_v21, %v3404_v36  ;;  %v3453_v25 = vadd.f32 %v3452_v7, %v3451_v27  ;;  %v3500_v19 = vsel %vm838_vm7, %v3385_v60, %v3499_v58  ;;  %v7334_v58 = vld [vmem:[%s9764_s5 + $0x184] sm:$0xf] }
 0xa28   :  { %v3458_v63 = vadd.f32 %v3457_v44, %v3456_v30  ;;  %v3440_v30 = vrot.slane %v3439_v35, 1  ;;  %v3501_v33 = vsel %vm840_vm8, %v3392_v5, %v3500_v19 }
 0xa29   :  { %v3410_v48 = vrot.slane %v3409_v13, 2  ;;  %v3281_v26 = vpop.f32.mrf.mxu2  ;;  %v3454_v40 = vrot.slane %v3453_v25, 1 }
 0xa2a   :  { %v3356_v55 = vmul.f32 %v7764_v43, %v3281_v26  ;;  %v3343_v34 = vpop.f32.mrf.mxu3  ;;  %v3459_v11 = vrot.slane %v3458_v63, 2  ;;  %v3441_v22 = vadd.f32 %v3440_v30, %v3439_v35 }
 0xa2b   :  { %v3363_v14 = vmul.f32 %v7764_v43, %v3343_v34  ;;  %v3411_v50 = vadd.f32 %v3410_v48, %v3409_v13  ;;  %v3502_v13 = vsel %vm842_vm9, %v3399_v15, %v3501_v33  ;;  %v3448_v34 = vadd.f32 %v3447_v38, %v3446_v18  ;;  %v7318_v38 = vld [vmem:[%s9764_s5 + $0x104] sm:$0xf] }
 0xa2c   :  { %v3414_v47 = vsel %vm90_vm1, %v3356_v55, 0.0  ;;  %v3460_v31 = vadd.f32 %v3459_v11, %v3458_v63  ;;  %v3503_v44 = vsel %vm844_vm10, %v3406_v24, %v3502_v13  ;;  %v3427_v55 = vadd.f32 %v3426_v54, %v3425_v52  ;;  %v6312_v52 = vld [vmem:[%s9764_s5 + $0x1c0] sm:$0xf0] }
 0xa2d   :  { %v3415_v3 = vrot.slane %v3414_v47, 4  ;;  %v3463_v62 = vsel %vm90_vm1, %v3363_v14, 0.0  ;;  %v3412_v2 = vrot.slane %v3411_v50, 1  ;;  %v3455_v36 = vadd.f32 %v3454_v40, %v3453_v25 }
 0xa2e   :  { %v3464_v51 = vrot.slane %v3463_v62, 4  ;;  %v3461_v46 = vrot.slane %v3460_v31, 1  ;;  %v3506_v27 = vsel %vm836_vm6, %v3434_v45, %v3427_v55  ;;  %v6315_v5 = vor.u32 %v7334_v58, %v6312_v52  ;;  %v6246_v45 = vld [vmem:[%s9764_s5 + $0x100] sm:$0xf]  ;;  %v7329_v58 = vld [vmem:[%s9764_s5 + $0x154] sm:$0xf0] }
 0xa2f   :  { %v3416_v9 = vadd.f32 %v3415_v3, %v3414_v47  ;;  %v3413_v61 = vadd.f32 %v3412_v2, %v3411_v50  ;;  %v3507_v50 = vsel %vm838_vm7, %v3441_v22, %v3506_v27  ;;  %v7319_v22 = vld [vmem:[%s9764_s5 + $0x10c] sm:$0xf]  ;;  %v7321_v52 = vld [vmem:[%s9764_s5 + $0x11c] sm:$0xf] }
 0xa30   :  { %v3465_v12 = vadd.f32 %v3464_v51, %v3463_v62  ;;  %v3462_v14 = vadd.f32 %v3461_v46, %v3460_v31  ;;  %v3508_v47 = vsel %vm840_vm8, %v3448_v34, %v3507_v50  ;;  %v3482_v51 = vperm.slane %v9044_v29, 5  ;;  %3846 = vmatpush.bf16.msrb.mxu2 %v6315_v5  ;;  %v7326_v46 = vld [vmem:[%s9764_s5 + $0x13c] sm:$0xf0]  ;;  %v6326_v34 = vld [vmem:[%s9764_s5 + $0x190] sm:$0xf] }
 0xa31   :  { %v3417_v10 = vrot.slane %v3416_v9, 2  ;;  %v3504_v26 = vsel %vm846_vm11, %v3413_v61, %v3503_v44  ;;  %v3509_v42 = vsel %vm842_vm9, %v3455_v36, %v3508_v47  ;;  %v6254_v44 = vld [vmem:[%s9764_s5 + $0x108] sm:$0xf]  ;;  %v7336_v36 = vld [vmem:[%s9764_s5 + $0x194] sm:$0xf] }
 0xa32   :  { %v3466_v16 = vrot.slane %v3465_v12, 2  ;;  %v3346_v23 = vpop.f32.mrf.mxu3  ;;  %v3510_v62 = vsel %vm844_vm10, %v3462_v14, %v3509_v42  ;;  %v6334_v50 = vld [vmem:[%s9764_s5 + $0x198] sm:$0xf] }
 0xa33   :  { %v3418_v28 = vadd.f32 %v3417_v10, %v3416_v9  ;;  %v3364_v4 = vmul.f32 %v7764_v43, %v3346_v23  ;;  %v6310_v10 = vld [vmem:[%s9764_s5 + $0x180] sm:$0xf] }
 0xa34   :  { %v3467_v8 = vadd.f32 %v3466_v16, %v3465_v12  ;;  %v6311_v18 = vor.u32 %v7342_v0, %v6310_v10 }
 0xa35   :  { %v3419_v20 = vrot.slane %v3418_v28, 1  ;;  %v3470_v56 = vsel %vm90_vm1, %v3364_v4, 0.0 }
 0xa36   :  { %v3471_v41 = vrot.slane %v3470_v56, 4  ;;  %v3468_v57 = vrot.slane %v3467_v8, 1  ;;  %3832 = vmatpush.bf16.msra.mxu1 %v6311_v18 }
 0xa37   :  { %v3420_v43 = vadd.f32 %v3419_v20, %v3418_v28  ;;  %v7335_v20 = vld [vmem:[%s9764_s5 + $0x18c] sm:$0xf] }
 0xa38   :  { %v3472_v48 = vadd.f32 %v3471_v41, %v3470_v56  ;;  %v3469_v63 = vadd.f32 %v3468_v57, %v3467_v8  ;;  %v6320_v8 = vld [vmem:[%s9764_s5 + $0x1c8] sm:$0xf0]  ;;  %v6248_v41 = vld [vmem:[%s9764_s5 + $0x140] sm:$0xf0] }
 0xa39   :  { %v3505_v17 = vsel %vm848_vm12, %v3420_v43, %v3504_v26  ;;  %v6323_v54 = vor.u32 %v7335_v20, %v6320_v8  ;;  %v6251_v40 = vor.u32 %v7318_v38, %v6248_v41  ;;  %v7327_v43 = vld [vmem:[%s9764_s5 + $0x144] sm:$0xf0]  ;;  %v6247_v26 = vor.u32 %v7326_v46, %v6246_v45  ;;  %v6256_v57 = vld [vmem:[%s9764_s5 + $0x148] sm:$0xf0]  ;;  %v7346_v38 = vld [vmem:[%s9764_s5 + $0x1dc] sm:$0xf0] }
 0xa3a   :  { %v3473_v59 = vrot.slane %v3472_v48, 2  ;;  %6208 = vmatmul.msk.f32.vlgmr.msra.gmra.mxu0 %vm90_vm1, %v3505_v17  ;;  %v3511_v1 = vsel %vm846_vm11, %v3469_v63, %v3510_v62  ;;  %v6259_v17 = vor.u32 %v7319_v22, %v6256_v57  ;;  %v7345_v63 = vld [vmem:[%s9764_s5 + $0x1d4] sm:$0xf0]  ;;  %v6336_v62 = vld [vmem:[%s9764_s5 + $0x1d8] sm:$0xf0]  ;;  %v3589_v20 = vperm.slane %v9044_v29, 7 }
 0xa3b   :  { %3874 = vmatpush.bf16.msrb.mxu0 %v6323_v54  ;;  %3847 = vmatpush.bf16.msrb.mxu2 %v6251_v40  ;;  %v6335_v42 = vor.u32 %v7345_v63, %v6334_v50  ;;  %v7347_v40 = vld [vmem:[%s9764_s5 + $0x1e4] sm:$0xf0]  ;;  %v6352_v45 = vld [vmem:[%s9764_s5 + $0x1e8] sm:$0xf0]  ;;  %v6278_v22 = vld [vmem:[%s9764_s5 + $0x120] sm:$0xf] }
 0xa3c   :  { %v3474_v39 = vadd.f32 %v3473_v59, %v3472_v48  ;;  %v6255_v48 = vor.u32 %v7327_v43, %v6254_v44  ;;  %3833 = vmatpush.bf16.msra.mxu1 %v6247_v26  ;;  %v7344_v59 = vld [vmem:[%s9764_s5 + $0x1cc] sm:$0xf0]  ;;  %v7339_v43 = vld [vmem:[%s9764_s5 + $0x1ac] sm:$0xf]  ;;  %v7330_v57 = vld [vmem:[%s9764_s5 + $0x15c] sm:$0xf0] }
 0xa3d   :  { %v6327_v14 = vor.u32 %v7344_v59, %v6326_v34  ;;  %v7322_v34 = vld [vmem:[%s9764_s5 + $0x124] sm:$0xf]  ;;  %v6279_v50 = vor.u32 %v7330_v57, %v6278_v22  ;;  %v7360_v22 = vld [vmem:[%s9765_s7 + $0x450] sm:$0xff]  ;;  %v7351_v57 = vld [vmem:[%s9765_s7 + $0x408] sm:$0xff] }
 0xa3e   :  { %v3475_v37 = vrot.slane %v3474_v39, 1  ;;  %v6280_v59 = vld [vmem:[%s9764_s5 + $0x160] sm:$0xf0] }
 0xa3f   :  { %3875 = vmatpush.bf16.msrb.mxu0 %v6259_v17  ;;  %v6283_v63 = vor.u32 %v7322_v34, %v6280_v59  ;;  %v7367_v34 = vld [vmem:[%s9765_s7 + $0x488] sm:$0xff]  ;;  %v7350_v59 = vld [vmem:[%s9765_s7 + $0x400] sm:$0xff] }
 0xa40   :  { %v3476_v3 = vadd.f32 %v3475_v37, %v3474_v39  ;;  %v6328_v39 = vld [vmem:[%s9764_s5 + $0x1d0] sm:$0xf0]  ;;  %3888 = vmatpush.bf16.msrb.mxu1 %v6327_v14  ;;  %v7323_v14 = vld [vmem:[%s9764_s5 + $0x12c] sm:$0xf] }
 0xa41   :  { %v6331_v37 = vor.u32 %v7336_v36, %v6328_v39  ;;  %v6286_v36 = vld [vmem:[%s9764_s5 + $0x128] sm:$0xf]  ;;  %v6288_v39 = vld [vmem:[%s9764_s5 + $0x168] sm:$0xf0] }
 0xa42   :  { %v3512_v49 = vsel %vm848_vm12, %v3476_v3, %v3511_v1  ;;  %v7337_v3 = vld [vmem:[%s9764_s5 + $0x19c] sm:$0xf]  ;;  %v6262_v1 = vld [vmem:[%s9764_s5 + $0x110] sm:$0xf] }
 0xa43   :  { %6209 = vmatmul.msk.f32.gmra.mxu0 %vm90_vm1, %v3512_v49  ;;  %3902 = vmatpush.bf16.msra.mxu2 %v6331_v37  ;;  %v6291_v37 = vor.u32 %v7323_v14, %v6288_v39  ;;  %v7413_v14 = vld [vmem:[%s9765_s7 + $0x5f8] sm:$0xff]  ;;  %v7358_v39 = vld [vmem:[%s9765_s7 + $0x440] sm:$0xff] }
 0xab7   :  { %v3534_v60 = vpop.f32.mrf.mxu0 }
 0xab8   :  { %v3535_v21 = vadd.f32 %v3534_v60, %v3482_v51  ;;  %v6339_v60 = vor.u32 %v7337_v3, %v6336_v62  ;;  %v7348_v3 = vld [vmem:[%s9764_s5 + $0x1ec] sm:$0xf0]  ;;  %v7340_v62 = vld [vmem:[%s9764_s5 + $0x1b4] sm:$0xf] }
 0xaba   :  { %v3540_v7 = vadd.f32 %v3535_v21, %v8754_v32  ;;  %v6318_v32 = vld [vmem:[%s9764_s5 + $0x188] sm:$0xf]  ;;  %v7328_v21 = vld [vmem:[%s9764_s5 + $0x14c] sm:$0xf0]  ;;  %3930 = vmatpush.bf16.msra.mxu0 %v6339_v60  ;;  %v7341_v60 = vld [vmem:[%s9764_s5 + $0x1bc] sm:$0xf] }
 0xabc   :  { %v3542_v9 = vsel %vm90_vm1, %v3540_v7, 0.0 }
 0xabd   :  { %3543 = vadd.xlane.f32.xlu0 %v3542_v9  ;;  %v6263_v9 = vor.u32 %v7328_v21, %v6262_v1  ;;  %v6360_v1 = vld [vmem:[%s9764_s5 + $0x1f0] sm:$0xf0]  ;;  %v6368_v21 = vld [vmem:[%s9764_s5 + $0x1f8] sm:$0xf0] }
 0xabf   :  { %3889 = vmatpush.bf16.msrb.mxu1 %v6263_v9  ;;  %v6363_v9 = vor.u32 %v7340_v62, %v6360_v1  ;;  %v7404_v62 = vld [vmem:[%s9765_s7 + $0x5b0] sm:$0xff]  ;;  %v7387_v1 = vld [vmem:[%s9765_s7 + $0x528] sm:$0xff] }
 0xac0   :  { %v3537_v35 = vpop.f32.mrf.mxu0 }
 0xac1   :  { %v3538_v2 = vadd.f32 %v3537_v35, %v3482_v51  ;;  %v6264_v35 = vld [vmem:[%s9764_s5 + $0x150] sm:$0xf0] }
 0xac3   :  { %v3541_v11 = vadd.f32 %v3538_v2, %v8763_v6  ;;  %v7343_v6 = vld [vmem:[%s9764_s5 + $0x1c4] sm:$0xf0]  ;;  %v6270_v2 = vld [vmem:[%s9764_s5 + $0x118] sm:$0xf] }
 0xac4   :  { %v6319_v15 = vor.u32 %v7343_v6, %v6318_v32  ;;  %v6272_v32 = vld [vmem:[%s9764_s5 + $0x158] sm:$0xf0]  ;;  %v6271_v5 = vor.u32 %v7329_v58, %v6270_v2  ;;  %v7332_v2 = vld [vmem:[%s9764_s5 + $0x16c] sm:$0xf0]  ;;  %v7324_v58 = vld [vmem:[%s9764_s5 + $0x134] sm:$0xf] }
 0xac5   :  { %v3545_v12 = vsel %vm90_vm1, %v3541_v11, 0.0  ;;  %v6275_v6 = vor.u32 %v7321_v52, %v6272_v32  ;;  %v6296_v52 = vld [vmem:[%s9764_s5 + $0x170] sm:$0xf0]  ;;  %v6302_v32 = vld [vmem:[%s9764_s5 + $0x138] sm:$0xf] }
 0xac6   :  { %3546 = vadd.xlane.f32.xlu1 %v3545_v12  ;;  %3860 = vmatpush.bf16.msrb.mxu3 %v6319_v15 }
 0xac7   :  { %3931 = vmatpush.bf16.msra.mxu0 %v6275_v6  ;;  %v7325_v6 = vld [vmem:[%s9764_s5 + $0x13c] sm:$0xf] }
 0xaca   :  { %3861 = vmatpush.bf16.msrb.mxu3 %v6255_v48 }
 0xace   :  { %3916 = vmatpush.bf16.msra.mxu3 %v6335_v42  ;;  %v6358_v42 = vld [vmem:[%s9764_s5 + $0x1b0] sm:$0xf] }
 0xad2   :  { %3917 = vmatpush.bf16.msra.mxu3 %v6271_v5  ;;  %v7333_v5 = vld [vmem:[%s9764_s5 + $0x174] sm:$0xf0] }
 0xb30   :  { %v3544_v16 = vpop.xlane.xlu0 %3543 }
 0xb31   :  { %v3548_v23 = vmul.f32 %v3544_v16, %v8042_v53 }
 0xb33   :  { %v9070_v24 = vsub.f32 %v3540_v7, %v3548_v23  ;;  %v7320_v7 = vld [vmem:[%s9764_s5 + $0x114] sm:$0xf] }
 0xb34   :  { %v6267_v12 = vor.u32 %v7320_v7, %v6264_v35  ;;  %v6359_v7 = vor.u32 %v7348_v3, %v6358_v42  ;;  %v6294_v35 = vld [vmem:[%s9764_s5 + $0x130] sm:$0xf] }
 0xb35   :  { %v3552_v25 = vmul.f32 %v9070_v24, %v9070_v24  ;;  %v7412_v42 = vld [vmem:[%s9765_s7 + $0x5f0] sm:$0xff] }
 0xb36   :  { %3903 = vmatpush.bf16.msra.mxu2 %v6267_v12  ;;  %v6371_v12 = vor.u32 %v7341_v60, %v6368_v21  ;;  %v7396_v3 = vld [vmem:[%s9765_s7 + $0x570] sm:$0xff]  ;;  %v7410_v60 = vld [vmem:[%s9765_s7 + $0x5e0] sm:$0xff]  ;;  %v7395_v21 = vld [vmem:[%s9765_s7 + $0x568] sm:$0xff] }
 0xb37   :  { %v3554_v28 = vsel %vm90_vm1, %v3552_v25, 0.0 }
 0xb38   :  { %3555 = vadd.xlane.f32.xlu2 %v3554_v28 }
 0xb39   :  { %v3547_v4 = vpop.xlane.xlu1 %3546 }
 0xb3a   :  { %v3549_v19 = vmul.f32 %v3547_v4, %v8042_v53 }
 0xb3c   :  { %v9076_v30 = vsub.f32 %v3541_v11, %v3549_v19  ;;  %v3586_v19 = vperm.slane %v9044_v29, 6  ;;  %v6344_v29 = vld [vmem:[%s9764_s5 + $0x1e0] sm:$0xf0] }
 0xb3e   :  { %v3553_v61 = vmul.f32 %v9076_v30, %v9076_v30 }
 0xb40   :  { %v3557_v31 = vsel %vm90_vm1, %v3553_v61, 0.0 }
 0xb41   :  { %3558 = vadd.xlane.f32.xlu0 %v3557_v31 }
 0xbab   :  { %v3556_v33 = vpop.xlane.xlu2 %3555 }
 0xbac   :  { %v3560_v56 = vmul.f32 %v3556_v33, %v8042_v53 }
 0xbae   :  { %v9088_v13 = vadd.f32 1e-05, %v3560_v56 }
 0xbb0   :  { %7625 = vrsqrt.f32 %v9088_v13  ;;  %vm3570_vm7 = vweird.f32 %v9088_v13 }
 0xbb4   :  { %v3559_v55 = vpop.xlane.xlu0 %3558 }
 0xbb5   :  { %v3561_v27 = vmul.f32 %v3559_v55, %v8042_v53  ;;  %v6355_v55 = vor.u32 %v7339_v43, %v6352_v45  ;;  %v7361_v43 = vld [vmem:[%s9765_s7 + $0x458] sm:$0xff] }
 0xbb6   :  { %v7626_v47 = vpop.eup %7625  ;;  %v7369_v45 = vld [vmem:[%s9765_s7 + $0x498] sm:$0xff] }
 0xbb7   :  { %v3565_v49 = vmul.f32 %v7626_v47, %v9088_v13  ;;  %v3563_v51 = vadd.f32 1e-05, %v3561_v27  ;;  %vm3571_vm6 = vweird.f32 %v7626_v47  ;;  %v6342_v13 = vld [vmem:[%s9764_s5 + $0x1a0] sm:$0xf]  ;;  %v7331_v27 = vld [vmem:[%s9764_s5 + $0x164] sm:$0xf0] }
 0xbb8   :  { %vm3572_vm8 = vmor %vm3570_vm7, %vm3571_vm6  ;;  %v6343_v48 = vor.u32 %v7346_v38, %v6342_v13  ;;  %v7354_v13 = vld [vmem:[%s9765_s7 + $0x420] sm:$0xff] }
 0xbb9   :  { %v3566_v11 = vmul.f32 %v7626_v47, %v3565_v49  ;;  %7627 = vrsqrt.f32 %v3563_v51  ;;  %vm3580_vm10 = vweird.f32 %v3563_v51  ;;  %v6366_v49 = vld [vmem:[%s9764_s5 + $0x1b8] sm:$0xf]  ;;  %v7378_v38 = vld [vmem:[%s9765_s7 + $0x4e0] sm:$0xff] }
 0xbbb   :  { %v3567_v10 = vmul.f32 0.5, %v3566_v11 }
 0xbbd   :  { %v3568_v0 = vsub.f32 1.5, %v3567_v10  ;;  %v6304_v10 = vld [vmem:[%s9764_s5 + $0x178] sm:$0xf0] }
 0xbbf   :  { %v7628_v15 = vpop.eup %7627  ;;  %v3569_v18 = vmul.f32 %v7626_v47, %v3568_v0  ;;  %v6295_v0 = vor.u32 %v7332_v2, %v6294_v35  ;;  %v7409_v35 = vld [vmem:[%s9765_s7 + $0x5d8] sm:$0xff]  ;;  %v7394_v2 = vld [vmem:[%s9765_s7 + $0x560] sm:$0xff] }
 0xbc0   :  { %v3575_v16 = vmul.f32 %v7628_v15, %v3563_v51  ;;  %vm3581_vm9 = vweird.f32 %v7628_v15  ;;  %v7349_v51 = vld [vmem:[%s9764_s5 + $0x1f4] sm:$0xf0] }
 0xbc1   :  { %v3573_v25 = vsel %vm3572_vm8, %v7626_v47, %v3569_v18  ;;  %vm3582_vm11 = vmor %vm3580_vm10, %vm3581_vm9  ;;  %v6287_v47 = vor.u32 %v7331_v27, %v6286_v36  ;;  %v6367_v11 = vor.u32 %v7349_v51, %v6366_v49  ;;  %v6303_v18 = vor.u32 %v7333_v5, %v6302_v32  ;;  %v7374_v36 = vld [vmem:[%s9765_s7 + $0x4c0] sm:$0xff]  ;;  %v7389_v27 = vld [vmem:[%s9765_s7 + $0x538] sm:$0xff] }
 0xbc2   :  { %v3576_v23 = vmul.f32 %v7628_v15, %v3575_v16  ;;  %v3584_v61 = vmul.f32 %v3573_v25, %v9070_v24  ;;  %v7338_v24 = vld [vmem:[%s9764_s5 + $0x1a4] sm:$0xf]  ;;  %v6307_v16 = vor.u32 %v7325_v6, %v6304_v10  ;;  %v7381_v25 = vld [vmem:[%s9765_s7 + $0x4f8] sm:$0xff]  ;;  %v7411_v49 = vld [vmem:[%s9765_s7 + $0x5e8] sm:$0xff] }
 0xbc3   :  { %v6347_v26 = vor.u32 %v7338_v24, %v6344_v29  ;;  %v7362_v24 = vld [vmem:[%s9765_s7 + $0x460] sm:$0xff]  ;;  %v7401_v32 = vld [vmem:[%s9765_s7 + $0x598] sm:$0xff]  ;;  %v7383_v5 = vld [vmem:[%s9765_s7 + $0x508] sm:$0xff] }
 0xbc4   :  { %v3577_v28 = vmul.f32 0.5, %v3576_v23  ;;  %v3587_v8 = vmul.f32 %v3586_v19, %v3584_v61  ;;  %v7357_v23 = vld [vmem:[%s9765_s7 + $0x438] sm:$0xff]  ;;  %v7380_v61 = vld [vmem:[%s9765_s7 + $0x4f0] sm:$0xff]  ;;  %v7370_v29 = vld [vmem:[%s9765_s7 + $0x4a0] sm:$0xff] }
 0xbc5   :  { %v7386_v51 = vld [vmem:[%s9765_s7 + $0x520] sm:$0xff]  ;;  %v7407_v6 = vld [vmem:[%s9765_s7 + $0x5c8] sm:$0xff]  ;;  %v7392_v10 = vld [vmem:[%s9765_s7 + $0x550] sm:$0xff] }
 0xbc6   :  { %v3578_v4 = vsub.f32 1.5, %v3577_v28  ;;  %v9185_v41 = vadd.f32 %v3589_v20, %v3587_v8  ;;  %v7365_v28 = vld [vmem:[%s9765_s7 + $0x478] sm:$0xff]  ;;  %v7379_v8 = vld [vmem:[%s9765_s7 + $0x4e8] sm:$0xff] }
 0xbc8   :  { %v3579_v31 = vmul.f32 %v7628_v15, %v3578_v4  ;;  %v7373_v4 = vld [vmem:[%s9765_s7 + $0x4b8] sm:$0xff] }
 0xbca   :  { %v3583_v33 = vsel %vm3582_vm11, %v7628_v15, %v3579_v31  ;;  %v6299_v15 = vor.u32 %v7324_v58, %v6296_v52  ;;  %v7364_v31 = vld [vmem:[%s9765_s7 + $0x470] sm:$0xff]  ;;  %v7393_v52 = vld [vmem:[%s9765_s7 + $0x558] sm:$0xff] }
 0xbcb   :  { %v3585_v56 = vmul.f32 %v3583_v33, %v9076_v30  ;;  %v6350_v30 = vld [vmem:[%s9764_s5 + $0x1a8] sm:$0xf]  ;;  %v7372_v33 = vld [vmem:[%s9765_s7 + $0x4b0] sm:$0xff] }
 0xbcc   :  { %v6351_v17 = vor.u32 %v7347_v40, %v6350_v30  ;;  %v7353_v30 = vld [vmem:[%s9765_s7 + $0x418] sm:$0xff]  ;;  %v7408_v58 = vld [vmem:[%s9765_s7 + $0x5d0] sm:$0xff] }
 0xbcd   :  { %v3588_v54 = vmul.f32 %v3586_v19, %v3585_v56  ;;  %v7356_v19 = vld [vmem:[%s9765_s7 + $0x430] sm:$0xff]  ;;  %v7363_v56 = vld [vmem:[%s9765_s7 + $0x468] sm:$0xff]  ;;  %v7377_v40 = vld [vmem:[%s9765_s7 + $0x4d8] sm:$0xff] }
 0xbcf   :  { %v9187_v44 = vadd.f32 %v3589_v20, %v3588_v54  ;;  %v7355_v20 = vld [vmem:[%s9765_s7 + $0x428] sm:$0xff] }
 0xbd0   :  { %v7371_v54 = vld [vmem:[%s9765_s7 + $0x4a8] sm:$0xff] }
 0xbd1   :  { %v9200_v46 = vpack.c.bf16 %v9187_v44, %v9185_v41 }
 0xbd3   :  { %6372 = vmatmul.msk.bf16.vlgmr.msra.gmra.mxu1 %vm90_vm1, %v9200_v46  ;;  %6373 = vmatmul.msk.bf16.vlgmr.msrb.gmra.mxu2 %vm90_vm1, %v9200_v46 }
 0xbd4   :  { %6374 = vmatmul.msk.bf16.vlgmr.msrb.gmra.mxu3 %vm90_vm1, %v9200_v46  ;;  %6375 = vmatmul.msk.bf16.vlgmr.msrb.gmra.mxu0 %vm90_vm1, %v9200_v46 }
 0xbd5   :  { %3944 = vmatpush.bf16.msra.mxu1 %v6343_v48  ;;  %3958 = vmatpush.bf16.msrb.mxu2 %v6347_v26  ;;  %v7352_v48 = vld [vmem:[%s9765_s7 + $0x410] sm:$0xff] }
 0xbd6   :  { %3972 = vmatpush.bf16.msrb.mxu3 %v6351_v17  ;;  %3986 = vmatpush.bf16.msrb.mxu0 %v6355_v55  ;;  %v7376_v26 = vld [vmem:[%s9765_s7 + $0x4d0] sm:$0xff]  ;;  %v7375_v17 = vld [vmem:[%s9765_s7 + $0x4c8] sm:$0xff] }
 0xbd7   :  { %v7359_v55 = vld [vmem:[%s9765_s7 + $0x448] sm:$0xff] }
 0xbd9   :  { %3945 = vmatpush.bf16.msra.mxu1 %v6279_v50  ;;  %3959 = vmatpush.bf16.msrb.mxu2 %v6283_v63  ;;  %v7366_v50 = vld [vmem:[%s9765_s7 + $0x480] sm:$0xff]  ;;  %v7397_v63 = vld [vmem:[%s9765_s7 + $0x578] sm:$0xff] }
 0xbda   :  { %3973 = vmatpush.bf16.msrb.mxu3 %v6287_v47  ;;  %3987 = vmatpush.bf16.msrb.mxu0 %v6291_v37  ;;  %v7405_v47 = vld [vmem:[%s9765_s7 + $0x5b8] sm:$0xff]  ;;  %v7388_v37 = vld [vmem:[%s9765_s7 + $0x530] sm:$0xff] }
 0xbe3   :  { %6376 = vmatmul.msk.bf16.vlgmr.msrb.gmra.mxu1 %vm90_vm1, %v9200_v46  ;;  %6377 = vmatmul.msk.bf16.vlgmr.msra.gmra.mxu2 %vm90_vm1, %v9200_v46 }
 0xbe4   :  { %6378 = vmatmul.msk.bf16.vlgmr.msra.gmra.mxu3 %vm90_vm1, %v9200_v46  ;;  %6379 = vmatmul.msk.bf16.vlgmr.msra.gmra.mxu0 %vm90_vm1, %v9200_v46 }
 0xbe5   :  { %4000 = vmatpush.bf16.msrb.mxu1 %v6359_v7  ;;  %4014 = vmatpush.bf16.msra.mxu2 %v6363_v9  ;;  %v7403_v7 = vld [vmem:[%s9765_s7 + $0x5a8] sm:$0xff]  ;;  %v7385_v9 = vld [vmem:[%s9765_s7 + $0x518] sm:$0xff] }
 0xbe6   :  { %4028 = vmatpush.bf16.msra.mxu3 %v6367_v11  ;;  %4042 = vmatpush.bf16.msra.mxu0 %v6371_v12  ;;  %v7402_v11 = vld [vmem:[%s9765_s7 + $0x5a0] sm:$0xff]  ;;  %v7384_v12 = vld [vmem:[%s9765_s7 + $0x510] sm:$0xff] }
 0xbe9   :  { %4001 = vmatpush.bf16.msrb.mxu1 %v6295_v0  ;;  %4015 = vmatpush.bf16.msra.mxu2 %v6299_v15  ;;  %v7400_v0 = vld [vmem:[%s9765_s7 + $0x590] sm:$0xff]  ;;  %v7382_v15 = vld [vmem:[%s9765_s7 + $0x500] sm:$0xff] }
 0xbea   :  { %4029 = vmatpush.bf16.msra.mxu3 %v6303_v18  ;;  %4043 = vmatpush.bf16.msra.mxu0 %v6307_v16  ;;  %v7406_v18 = vld [vmem:[%s9765_s7 + $0x5c0] sm:$0xff]  ;;  %v7391_v16 = vld [vmem:[%s9765_s7 + $0x548] sm:$0xff] }
 0xbf3   :  { %6380 = vmatmul.msk.bf16.vlgmr.msra.gmra.mxu1 %vm90_vm1, %v9200_v46  ;;  %6381 = vmatmul.msk.bf16.vlgmr.msrb.gmra.mxu2 %vm90_vm1, %v9200_v46 }
 0xbf4   :  { %6382 = vmatmul.msk.bf16.vlgmr.msrb.gmra.mxu3 %vm90_vm1, %v9200_v46  ;;  %6383 = vmatmul.msk.bf16.vlgmr.msrb.gmra.mxu0 %vm90_vm1, %v9200_v46 }
 0xbf5   :  { %5124 = vmatpush.bf16.msra.mxu1 %v7357_v23  ;;  %5166 = vmatpush.bf16.msrb.mxu0 %v7381_v25  ;;  %v7399_v23 = vld [vmem:[%s9765_s7 + $0x588] sm:$0xff]  ;;  %v7390_v25 = vld [vmem:[%s9765_s7 + $0x540] sm:$0xff] }
 0xbf6   :  { %5138 = vmatpush.bf16.msrb.mxu2 %v7365_v28  ;;  %5152 = vmatpush.bf16.msrb.mxu3 %v7373_v4  ;;  %v7398_v28 = vld [vmem:[%s9765_s7 + $0x580] sm:$0xff]  ;;  %v9501_v4 = vld [vmem:[%s9766_s6 + $0x10] sm:$0xff] }
 0xbf9   :  { %5125 = vmatpush.bf16.msra.mxu1 %v7356_v19  ;;  %5167 = vmatpush.bf16.msrb.mxu0 %v7380_v61 }
 0xbfa   :  { %5139 = vmatpush.bf16.msrb.mxu2 %v7364_v31  ;;  %5153 = vmatpush.bf16.msrb.mxu3 %v7372_v33  ;;  %v3631_v31 = vperm.slane %v9501_v4, 0  ;;  %v3634_v33 = vperm.slane %v9501_v4, 3 }
 0xbfd   :  { %5126 = vmatpush.bf16.msra.mxu1 %v7355_v20  ;;  %5168 = vmatpush.bf16.msrb.mxu0 %v7379_v8 }
 0xbfe   :  { %5140 = vmatpush.bf16.msrb.mxu2 %v7363_v56  ;;  %5154 = vmatpush.bf16.msrb.mxu3 %v7371_v54 }
 0xc01   :  { %5127 = vmatpush.bf16.msra.mxu1 %v7354_v13  ;;  %5169 = vmatpush.bf16.msrb.mxu0 %v7378_v38  ;;  %v3632_v38 = vperm.slane %v9501_v4, 1 }
 0xc02   :  { %5141 = vmatpush.bf16.msrb.mxu2 %v7362_v24  ;;  %5155 = vmatpush.bf16.msrb.mxu3 %v7370_v29 }
 0xc03   :  { %6384 = vmatmul.msk.bf16.vlgmr.msrb.gmra.mxu1 %vm90_vm1, %v9200_v46  ;;  %6385 = vmatmul.msk.bf16.vlgmr.msra.gmra.mxu2 %vm90_vm1, %v9200_v46 }
 0xc04   :  { %6386 = vmatmul.msk.bf16.vlgmr.msra.gmra.mxu3 %vm90_vm1, %v9200_v46  ;;  %6387 = vmatmul.msk.bf16.vlgmr.msra.gmra.mxu0 %vm90_vm1, %v9200_v46  ;;  %v7368_v46 = vld [vmem:[%s9765_s7 + $0x490] sm:$0xff] }
 0xc05   :  { %5128 = vmatpush.bf16.msra.mxu1 %v7353_v30  ;;  %5170 = vmatpush.bf16.msrb.mxu0 %v7377_v40  ;;  %v3633_v30 = vperm.slane %v9501_v4, 2 }
 0xc06   :  { %5142 = vmatpush.bf16.msrb.mxu2 %v7361_v43  ;;  %5156 = vmatpush.bf16.msrb.mxu3 %v7369_v45 }
 0xc09   :  { %5129 = vmatpush.bf16.msra.mxu1 %v7352_v48  ;;  %5171 = vmatpush.bf16.msrb.mxu0 %v7376_v26 }
 0xc0a   :  { %5143 = vmatpush.bf16.msrb.mxu2 %v7360_v22  ;;  %5157 = vmatpush.bf16.msrb.mxu3 %v7368_v46  ;;  %v7421_v22 = vld [vmem:[%s9765_s7 + $0x638] sm:$0xff] }
 0xc0d   :  { %5130 = vmatpush.bf16.msra.mxu1 %v7351_v57  ;;  %5172 = vmatpush.bf16.msrb.mxu0 %v7375_v17  ;;  %v7445_v17 = vld [vmem:[%s9765_s7 + $0x6f8] sm:$0xff] }
 0xc0e   :  { %5144 = vmatpush.bf16.msrb.mxu2 %v7359_v55  ;;  %5158 = vmatpush.bf16.msrb.mxu3 %v7367_v34 }
 0xc11   :  { %5131 = vmatpush.bf16.msra.mxu1 %v7350_v59  ;;  %5173 = vmatpush.bf16.msrb.mxu0 %v7374_v36 }
 0xc12   :  { %5145 = vmatpush.bf16.msrb.mxu2 %v7358_v39  ;;  %5159 = vmatpush.bf16.msrb.mxu3 %v7366_v50  ;;  %v7420_v50 = vld [vmem:[%s9765_s7 + $0x630] sm:$0xff] }
 0xc15   :  { %5180 = vmatpush.bf16.msrb.mxu1 %v7389_v27  ;;  %5222 = vmatpush.bf16.msra.mxu0 %v7413_v14 }
 0xc16   :  { %5194 = vmatpush.bf16.msra.mxu2 %v7397_v63  ;;  %5208 = vmatpush.bf16.msra.mxu3 %v7405_v47 }
 0xc19   :  { %5181 = vmatpush.bf16.msrb.mxu1 %v7388_v37  ;;  %5223 = vmatpush.bf16.msra.mxu0 %v7412_v42  ;;  %v7444_v42 = vld [vmem:[%s9765_s7 + $0x6f0] sm:$0xff] }
 0xc1a   :  { %5195 = vmatpush.bf16.msra.mxu2 %v7396_v3  ;;  %5209 = vmatpush.bf16.msra.mxu3 %v7404_v62 }
 0xc1d   :  { %5182 = vmatpush.bf16.msrb.mxu1 %v7387_v1  ;;  %5224 = vmatpush.bf16.msra.mxu0 %v7411_v49  ;;  %v7429_v1 = vld [vmem:[%s9765_s7 + $0x678] sm:$0xff] }
 0xc1e   :  { %5196 = vmatpush.bf16.msra.mxu2 %v7395_v21  ;;  %5210 = vmatpush.bf16.msra.mxu3 %v7403_v7  ;;  %v3638_v7 = vperm.slane %v9501_v4, 7 }
 0xc21   :  { %5183 = vmatpush.bf16.msrb.mxu1 %v7386_v51  ;;  %5225 = vmatpush.bf16.msra.mxu0 %v7410_v60  ;;  %v3635_v51 = vperm.slane %v9501_v4, 4  ;;  %v7437_v60 = vld [vmem:[%s9765_s7 + $0x6b8] sm:$0xff] }
 0xc22   :  { %5197 = vmatpush.bf16.msra.mxu2 %v7394_v2  ;;  %5211 = vmatpush.bf16.msra.mxu3 %v7402_v11  ;;  %v7428_v11 = vld [vmem:[%s9765_s7 + $0x670] sm:$0xff] }
 0xc25   :  { %5184 = vmatpush.bf16.msrb.mxu1 %v7385_v9  ;;  %5226 = vmatpush.bf16.msra.mxu0 %v7409_v35  ;;  %v7419_v9 = vld [vmem:[%s9765_s7 + $0x628] sm:$0xff] }
 0xc26   :  { %5198 = vmatpush.bf16.msra.mxu2 %v7393_v52  ;;  %5212 = vmatpush.bf16.msra.mxu3 %v7401_v32  ;;  %v7443_v35 = vld [vmem:[%s9765_s7 + $0x6e8] sm:$0xff]  ;;  %v7436_v52 = vld [vmem:[%s9765_s7 + $0x6b0] sm:$0xff] }
 0xc29   :  { %5185 = vmatpush.bf16.msrb.mxu1 %v7384_v12  ;;  %5227 = vmatpush.bf16.msra.mxu0 %v7408_v58 }
 0xc2a   :  { %5199 = vmatpush.bf16.msra.mxu2 %v7392_v10  ;;  %5213 = vmatpush.bf16.msra.mxu3 %v7400_v0  ;;  %v3636_v10 = vperm.slane %v9501_v4, 5 }
 0xc2d   :  { %5186 = vmatpush.bf16.msrb.mxu1 %v7383_v5  ;;  %5228 = vmatpush.bf16.msra.mxu0 %v7407_v6  ;;  %v7418_v6 = vld [vmem:[%s9765_s7 + $0x620] sm:$0xff] }
 0xc2e   :  { %5200 = vmatpush.bf16.msra.mxu2 %v7391_v16  ;;  %5214 = vmatpush.bf16.msra.mxu3 %v7399_v23  ;;  %v3637_v16 = vperm.slane %v9501_v4, 6  ;;  %v7417_v4 = vld [vmem:[%s9765_s7 + $0x618] sm:$0xff] }
 0xc31   :  { %5187 = vmatpush.bf16.msrb.mxu1 %v7382_v15  ;;  %5229 = vmatpush.bf16.msra.mxu0 %v7406_v18  ;;  %v7442_v18 = vld [vmem:[%s9765_s7 + $0x6e0] sm:$0xff] }
 0xc32   :  { %5201 = vmatpush.bf16.msra.mxu2 %v7390_v25  ;;  %5215 = vmatpush.bf16.msra.mxu3 %v7398_v28  ;;  %v7427_v25 = vld [vmem:[%s9765_s7 + $0x668] sm:$0xff] }
 0xc50   :  { %v3835_v19 = vpop.f32.mrf.mxu1 }
 0xc51   :  { %v3877_v61 = vpop.f32.mrf.mxu0  ;;  %v3836_v8 = vadd.f32 %v3835_v19, %v3631_v31 }
 0xc52   :  { %v3878_v54 = vadd.f32 %v3877_v61, %v3634_v33  ;;  %v7435_v61 = vld [vmem:[%s9765_s7 + $0x6a8] sm:$0xff] }
 0xc53   :  { %v4050_v43 = vmax.f32 %v3836_v8, 0.0 }
 0xc54   :  { %v4053_v48 = vmax.f32 %v3878_v54, 0.0 }
 0xc56   :  { %v3849_v20 = vpop.f32.mrf.mxu2 }
 0xc57   :  { %v3863_v56 = vpop.f32.mrf.mxu3  ;;  %v3850_v46 = vadd.f32 %v3849_v20, %v3632_v38 }
 0xc58   :  { %v3837_v13 = vpop.f32.mrf.mxu1  ;;  %v3864_v55 = vadd.f32 %v3863_v56, %v3633_v30  ;;  %v7441_v56 = vld [vmem:[%s9765_s7 + $0x6d8] sm:$0xff] }
 0xc59   :  { %v3838_v24 = vadd.f32 %v3837_v13, %v3631_v31  ;;  %v3879_v29 = vpop.f32.mrf.mxu0  ;;  %v4051_v63 = vmax.f32 %v3850_v46, 0.0 }
 0xc5a   :  { %v3880_v40 = vadd.f32 %v3879_v29, %v3634_v33  ;;  %v4052_v3 = vmax.f32 %v3864_v55, 0.0 }
 0xc5b   :  { %v4066_v45 = vmax.f32 %v3838_v24, 0.0  ;;  %v7426_v24 = vld [vmem:[%s9765_s7 + $0x660] sm:$0xff] }
 0xc5c   :  { %v4069_v26 = vmax.f32 %v3880_v40, 0.0  ;;  %v7434_v40 = vld [vmem:[%s9765_s7 + $0x6a0] sm:$0xff] }
 0xc5d   :  { %v4082_v57 = vpack.c.bf16 %v4066_v45, %v4050_v43  ;;  %v9568_v45 = vld [vmem:[%s9766_s6 + $0x18] sm:$0xff] }
 0xc5e   :  { %v4085_v34 = vpack.c.bf16 %v4069_v26, %v4053_v48  ;;  %v3851_v59 = vpop.f32.mrf.mxu2  ;;  %v7416_v26 = vld [vmem:[%s9765_s7 + $0x610] sm:$0xff] }
 0xc5f   :  { %v3852_v36 = vadd.f32 %v3851_v59, %v3632_v38  ;;  %v3865_v27 = vpop.f32.mrf.mxu3  ;;  %5132 = vmatmul.bf16.vlgmr.msra.gmra.mxu1 %v4082_v57  ;;  %v7425_v59 = vld [vmem:[%s9765_s7 + $0x658] sm:$0xff] }
 0xc60   :  { %v3866_v14 = vadd.f32 %v3865_v27, %v3633_v30  ;;  %5174 = vmatmul.bf16.vlgmr.msrb.gmra.mxu0 %v4085_v34  ;;  %5236 = vmatpush.bf16.msra.mxu1 %v7421_v22  ;;  %v3891_v39 = vpop.f32.mrf.mxu1  ;;  %v3639_v27 = vperm.slane %v9568_v45, 0 }
 0xc61   :  { %v4067_v47 = vmax.f32 %v3852_v36, 0.0  ;;  %5278 = vmatpush.bf16.msrb.mxu0 %v7445_v17  ;;  %v3933_v37 = vpop.f32.mrf.mxu0  ;;  %v3892_v12 = vadd.f32 %v3891_v39, %v3635_v51  ;;  %v7440_v17 = vld [vmem:[%s9765_s7 + $0x6d0] sm:$0xff] }
 0xc62   :  { %v4068_v62 = vmax.f32 %v3866_v14, 0.0  ;;  %v3934_v32 = vadd.f32 %v3933_v37, %v3638_v7  ;;  %v7433_v14 = vld [vmem:[%s9765_s7 + $0x698] sm:$0xff] }
 0xc63   :  { %v4083_v49 = vpack.c.bf16 %v4067_v47, %v4051_v63  ;;  %v4054_v28 = vmax.f32 %v3892_v12, 0.0  ;;  %v7415_v63 = vld [vmem:[%s9765_s7 + $0x608] sm:$0xff] }
 0xc64   :  { %v4084_v21 = vpack.c.bf16 %v4068_v62, %v4052_v3  ;;  %5237 = vmatpush.bf16.msra.mxu1 %v7420_v50  ;;  %v4057_v31 = vmax.f32 %v3934_v32, 0.0  ;;  %v3642_v50 = vperm.slane %v9568_v45, 3  ;;  %v7439_v47 = vld [vmem:[%s9765_s7 + $0x6c8] sm:$0xff] }
 0xc65   :  { %5279 = vmatpush.bf16.msrb.mxu0 %v7444_v42  ;;  %5146 = vmatmul.bf16.vlgmr.msrb.gmra.mxu2 %v4083_v49  ;;  %v7424_v42 = vld [vmem:[%s9765_s7 + $0x650] sm:$0xff] }
 0xc66   :  { %5160 = vmatmul.bf16.vlgmr.msrb.gmra.mxu3 %v4084_v21  ;;  %5250 = vmatpush.bf16.msrb.mxu2 %v7429_v1  ;;  %v3905_v2 = vpop.f32.mrf.mxu2  ;;  %v7432_v1 = vld [vmem:[%s9765_s7 + $0x690] sm:$0xff]  ;;  %v3640_v21 = vperm.slane %v9568_v45, 1 }
 0xc67   :  { %5264 = vmatpush.bf16.msrb.mxu3 %v7437_v60  ;;  %v3919_v58 = vpop.f32.mrf.mxu3  ;;  %v3906_v20 = vadd.f32 %v3905_v2, %v3636_v10  ;;  %v7414_v60 = vld [vmem:[%s9765_s7 + $0x600] sm:$0xff]  ;;  %v7453_v2 = vld [vmem:[%s9765_s7 + $0x738] sm:$0xff] }
 0xc68   :  { %5238 = vmatpush.bf16.msra.mxu1 %v7419_v9  ;;  %v3893_v5 = vpop.f32.mrf.mxu1  ;;  %v3920_v54 = vadd.f32 %v3919_v58, %v3637_v16  ;;  %v7477_v58 = vld [vmem:[%s9765_s7 + $0x7f8] sm:$0xff] }
 0xc69   :  { %5280 = vmatpush.bf16.msrb.mxu0 %v7443_v35  ;;  %v3894_v0 = vadd.f32 %v3893_v5, %v3635_v51  ;;  %v3935_v15 = vpop.f32.mrf.mxu0  ;;  %v4055_v22 = vmax.f32 %v3906_v20, 0.0  ;;  %v7438_v35 = vld [vmem:[%s9765_s7 + $0x6c0] sm:$0xff]  ;;  %v7461_v20 = vld [vmem:[%s9765_s7 + $0x778] sm:$0xff] }
 0xc6a   :  { %v3936_v23 = vadd.f32 %v3935_v15, %v3638_v7  ;;  %5251 = vmatpush.bf16.msrb.mxu2 %v7428_v11  ;;  %v4056_v55 = vmax.f32 %v3920_v54, 0.0  ;;  %v3641_v11 = vperm.slane %v9568_v45, 2 }
 0xc6b   :  { %v4070_v19 = vmax.f32 %v3894_v0, 0.0  ;;  %5265 = vmatpush.bf16.msrb.mxu3 %v7436_v52  ;;  %v7423_v52 = vld [vmem:[%s9765_s7 + $0x648] sm:$0xff] }
 0xc6c   :  { %v4073_v33 = vmax.f32 %v3936_v23, 0.0  ;;  %5239 = vmatpush.bf16.msra.mxu1 %v7418_v6  ;;  %v7431_v6 = vld [vmem:[%s9765_s7 + $0x688] sm:$0xff] }
 0xc6d   :  { %v4086_v8 = vpack.c.bf16 %v4070_v19, %v4054_v28  ;;  %5281 = vmatpush.bf16.msrb.mxu0 %v7442_v18  ;;  %v7476_v19 = vld [vmem:[%s9765_s7 + $0x7f0] sm:$0xff] }
 0xc6e   :  { %v4089_v13 = vpack.c.bf16 %v4073_v33, %v4057_v31  ;;  %5252 = vmatpush.bf16.msrb.mxu2 %v7427_v25  ;;  %v3907_v38 = vpop.f32.mrf.mxu2 }
 0xc6f   :  { %5266 = vmatpush.bf16.msrb.mxu3 %v7435_v61  ;;  %v3908_v29 = vadd.f32 %v3907_v38, %v3636_v10  ;;  %v3921_v30 = vpop.f32.mrf.mxu3  ;;  %5188 = vmatmul.bf16.vlgmr.msrb.gmra.mxu1 %v4086_v8  ;;  %v7422_v61 = vld [vmem:[%s9765_s7 + $0x640] sm:$0xff]  ;;  %v7451_v38 = vld [vmem:[%s9765_s7 + $0x728] sm:$0xff] }
 0xc70   :  { %v3922_v43 = vadd.f32 %v3921_v30, %v3637_v16  ;;  %5230 = vmatmul.bf16.vlgmr.msra.gmra.mxu0 %v4089_v13  ;;  %5240 = vmatpush.bf16.msra.mxu1 %v7417_v4  ;;  %v3947_v48 = vpop.f32.mrf.mxu1  ;;  %v7452_v16 = vld [vmem:[%s9765_s7 + $0x730] sm:$0xff]  ;;  %v7430_v4 = vld [vmem:[%s9765_s7 + $0x680] sm:$0xff]  ;;  %v7475_v30 = vld [vmem:[%s9765_s7 + $0x7e8] sm:$0xff] }
 0xc71   :  { %v4071_v46 = vmax.f32 %v3908_v29, 0.0  ;;  %5282 = vmatpush.bf16.msrb.mxu0 %v7441_v56  ;;  %v3989_v57 = vpop.f32.mrf.mxu0  ;;  %v3948_v3 = vadd.f32 %v3947_v48, %v3639_v27  ;;  %v7469_v56 = vld [vmem:[%s9765_s7 + $0x7b8] sm:$0xff] }
 0xc72   :  { %v4072_v34 = vmax.f32 %v3922_v43, 0.0  ;;  %5253 = vmatpush.bf16.msrb.mxu2 %v7426_v24  ;;  %v3990_v49 = vadd.f32 %v3989_v57, %v3642_v50  ;;  %v7460_v43 = vld [vmem:[%s9765_s7 + $0x770] sm:$0xff] }
 0xc73   :  { %v4087_v36 = vpack.c.bf16 %v4071_v46, %v4055_v22  ;;  %5267 = vmatpush.bf16.msrb.mxu3 %v7434_v40  ;;  %v4058_v32 = vmax.f32 %v3948_v3, 0.0  ;;  %v7450_v46 = vld [vmem:[%s9765_s7 + $0x720] sm:$0xff]  ;;  %v3643_v3 = vperm.slane %v9568_v45, 4 }
 0xc74   :  { %v4088_v39 = vpack.c.bf16 %v4072_v34, %v4056_v55  ;;  %5241 = vmatpush.bf16.msra.mxu1 %v7416_v26  ;;  %v4061_v10 = vmax.f32 %v3990_v49, 0.0  ;;  %v7468_v26 = vld [vmem:[%s9765_s7 + $0x7b0] sm:$0xff]  ;;  %v7459_v55 = vld [vmem:[%s9765_s7 + $0x768] sm:$0xff]  ;;  %v3646_v49 = vperm.slane %v9568_v45, 7 }
 0xc75   :  { %5283 = vmatpush.bf16.msrb.mxu0 %v7440_v17  ;;  %5202 = vmatmul.bf16.vlgmr.msra.gmra.mxu2 %v4087_v36  ;;  %v7474_v17 = vld [vmem:[%s9765_s7 + $0x7e0] sm:$0xff]  ;;  %v7467_v34 = vld [vmem:[%s9765_s7 + $0x7a8] sm:$0xff]  ;;  %v7473_v36 = vld [vmem:[%s9765_s7 + $0x7d8] sm:$0xff] }
 0xc76   :  { %5216 = vmatmul.bf16.vlgmr.msra.gmra.mxu3 %v4088_v39  ;;  %5254 = vmatpush.bf16.msrb.mxu2 %v7425_v59  ;;  %v3961_v37 = vpop.f32.mrf.mxu2  ;;  %v7449_v59 = vld [vmem:[%s9765_s7 + $0x718] sm:$0xff] }
 0xc77   :  { %5268 = vmatpush.bf16.msrb.mxu3 %v7433_v14  ;;  %v3975_v62 = vpop.f32.mrf.mxu3  ;;  %v3962_v15 = vadd.f32 %v3961_v37, %v3640_v21  ;;  %v7458_v14 = vld [vmem:[%s9765_s7 + $0x760] sm:$0xff] }
 0xc78   :  { %5242 = vmatpush.bf16.msra.mxu1 %v7415_v63  ;;  %v3949_v51 = vpop.f32.mrf.mxu1  ;;  %v3976_v23 = vadd.f32 %v3975_v62, %v3641_v11  ;;  %v7448_v63 = vld [vmem:[%s9765_s7 + $0x710] sm:$0xff] }
 0xc79   :  { %5284 = vmatpush.bf16.msrb.mxu0 %v7439_v47  ;;  %v3950_v7 = vadd.f32 %v3949_v51, %v3639_v27  ;;  %v3991_v9 = vpop.f32.mrf.mxu0  ;;  %v4059_v54 = vmax.f32 %v3962_v15, 0.0  ;;  %v7472_v47 = vld [vmem:[%s9765_s7 + $0x7d0] sm:$0xff]  ;;  %v7447_v51 = vld [vmem:[%s9765_s7 + $0x708] sm:$0xff] }
 0xc7a   :  { %v3992_v12 = vadd.f32 %v3991_v9, %v3642_v50  ;;  %5255 = vmatpush.bf16.msrb.mxu2 %v7424_v42  ;;  %v4060_v24 = vmax.f32 %v3976_v23, 0.0  ;;  %v7466_v50 = vld [vmem:[%s9765_s7 + $0x7a0] sm:$0xff]  ;;  %v7457_v42 = vld [vmem:[%s9765_s7 + $0x758] sm:$0xff]  ;;  %v7456_v9 = vld [vmem:[%s9765_s7 + $0x750] sm:$0xff] }
 0xc7b   :  { %v4074_v5 = vmax.f32 %v3950_v7, 0.0  ;;  %5269 = vmatpush.bf16.msrb.mxu3 %v7432_v1  ;;  %v7465_v1 = vld [vmem:[%s9765_s7 + $0x798] sm:$0xff]  ;;  %v7455_v15 = vld [vmem:[%s9765_s7 + $0x748] sm:$0xff] }
 0xc7c   :  { %v4077_v0 = vmax.f32 %v3992_v12, 0.0  ;;  %5243 = vmatpush.bf16.msra.mxu1 %v7414_v60  ;;  %v7463_v23 = vld [vmem:[%s9765_s7 + $0x788] sm:$0xff] }
 0xc7d   :  { %v4090_v18 = vpack.c.bf16 %v4074_v5, %v4058_v32  ;;  %5285 = vmatpush.bf16.msrb.mxu0 %v7438_v35 }
 0xc7e   :  { %v4093_v25 = vpack.c.bf16 %v4077_v0, %v4061_v10  ;;  %5256 = vmatpush.bf16.msrb.mxu2 %v7423_v52  ;;  %v3963_v28 = vpop.f32.mrf.mxu2  ;;  %v3644_v52 = vperm.slane %v9568_v45, 5  ;;  %v3645_v10 = vperm.slane %v9568_v45, 6 }
 0xc7f   :  { %5270 = vmatpush.bf16.msrb.mxu3 %v7431_v6  ;;  %v3964_v31 = vadd.f32 %v3963_v28, %v3640_v21  ;;  %v3977_v33 = vpop.f32.mrf.mxu3  ;;  %5244 = vmatmul.bf16.vlgmr.msra.gmra.mxu1 %v4090_v18  ;;  %v7471_v21 = vld [vmem:[%s9765_s7 + $0x7c8] sm:$0xff]  ;;  %v7470_v6 = vld [vmem:[%s9765_s7 + $0x7c0] sm:$0xff] }
 0xc80   :  { %5292 = vmatpush.bf16.msrb.mxu1 %v7453_v2  ;;  %v3978_v8 = vadd.f32 %v3977_v33, %v3641_v11  ;;  %5286 = vmatmul.bf16.vlgmr.msrb.gmra.mxu0 %v4093_v25  ;;  %v4003_v22 = vpop.f32.mrf.mxu1  ;;  %v7464_v2 = vld [vmem:[%s9765_s7 + $0x790] sm:$0xff]  ;;  %v7454_v33 = vld [vmem:[%s9765_s7 + $0x740] sm:$0xff] }
 0xc81   :  { %5334 = vmatpush.bf16.msra.mxu0 %v7477_v58  ;;  %v4075_v13 = vmax.f32 %v3964_v31, 0.0  ;;  %v4045_v57 = vpop.f32.mrf.mxu0  ;;  %v4004_v35 = vadd.f32 %v4003_v22, %v3643_v3  ;;  %v7446_v58 = vld [vmem:[%s9765_s7 + $0x700] sm:$0xff] }
 0xc82   :  { %v4076_v29 = vmax.f32 %v3978_v8, 0.0  ;;  %5257 = vmatpush.bf16.msrb.mxu2 %v7422_v61  ;;  %v4046_v11 = vadd.f32 %v4045_v57, %v3646_v49 }
 0xc83   :  { %v4091_v40 = vpack.c.bf16 %v4075_v13, %v4059_v54  ;;  %5271 = vmatpush.bf16.msrb.mxu3 %v7430_v4  ;;  %v4062_v18 = vmax.f32 %v4004_v35, 0.0 }
 0xc84   :  { %5293 = vmatpush.bf16.msrb.mxu1 %v7452_v16  ;;  %v4092_v48 = vpack.c.bf16 %v4076_v29, %v4060_v24  ;;  %v4065_v25 = vmax.f32 %v4046_v11, 0.0 }
 0xc85   :  { %5335 = vmatpush.bf16.msra.mxu0 %v7476_v19  ;;  %5258 = vmatmul.bf16.vlgmr.msrb.gmra.mxu2 %v4091_v40 }
 0xc86   :  { %5306 = vmatpush.bf16.msra.mxu2 %v7461_v20  ;;  %5272 = vmatmul.bf16.vlgmr.msrb.gmra.mxu3 %v4092_v48  ;;  %v4017_v27 = vpop.f32.mrf.mxu2  ;;  %v7462_v20 = vld [vmem:[%s9765_s7 + $0x780] sm:$0xff]  ;;  %v9719_v48 = vld [vmem:[%s9762_s2 + $0x10] sm:$0x7] }
 0xc87   :  { %5320 = vmatpush.bf16.msra.mxu3 %v7469_v56  ;;  %v4031_v39 = vpop.f32.mrf.mxu3  ;;  %v4018_v19 = vadd.f32 %v4017_v27, %v3644_v52  ;;  %v4355_v57 = vperm.slane %v9719_v48, 0 }
 0xc88   :  { %5294 = vmatpush.bf16.msrb.mxu1 %v7451_v38  ;;  %v4005_v37 = vpop.f32.mrf.mxu1  ;;  %v4032_v45 = vadd.f32 %v4031_v39, %v3645_v10 }
 0xc89   :  { %5336 = vmatpush.bf16.msra.mxu0 %v7475_v30  ;;  %v4047_v62 = vpop.f32.mrf.mxu0  ;;  %v4006_v60 = vadd.f32 %v4005_v37, %v3643_v3  ;;  %v4063_v56 = vmax.f32 %v4018_v19, 0.0 }
 0xc8a   :  { %5307 = vmatpush.bf16.msra.mxu2 %v7460_v43  ;;  %v4048_v7 = vadd.f32 %v4047_v62, %v3646_v49  ;;  %v4064_v54 = vmax.f32 %v4032_v45, 0.0 }
 0xc8b   :  { %5321 = vmatpush.bf16.msra.mxu3 %v7468_v26  ;;  %v4078_v32 = vmax.f32 %v4006_v60, 0.0 }
 0xc8c   :  { %5295 = vmatpush.bf16.msrb.mxu1 %v7450_v46  ;;  %v4081_v0 = vmax.f32 %v4048_v7, 0.0 }
 0xc8d   :  { %5337 = vmatpush.bf16.msra.mxu0 %v7474_v17  ;;  %v4094_v61 = vpack.c.bf16 %v4078_v32, %v4062_v18 }
 0xc8e   :  { %5308 = vmatpush.bf16.msra.mxu2 %v7459_v55  ;;  %v4019_v12 = vpop.f32.mrf.mxu2  ;;  %v4097_v31 = vpack.c.bf16 %v4081_v0, %v4065_v25 }
 0xc8f   :  { %5322 = vmatpush.bf16.msra.mxu3 %v7467_v34  ;;  %v4033_v5 = vpop.f32.mrf.mxu3  ;;  %v4020_v16 = vadd.f32 %v4019_v12, %v3644_v52 }
 0xc90   :  { %5296 = vmatpush.bf16.msrb.mxu1 %v7449_v59  ;;  %v4034_v28 = vadd.f32 %v4033_v5, %v3645_v10 }
 0xc91   :  { %5338 = vmatpush.bf16.msra.mxu0 %v7473_v36  ;;  %v4079_v4 = vmax.f32 %v4020_v16, 0.0 }
 0xc92   :  { %5309 = vmatpush.bf16.msra.mxu2 %v7458_v14  ;;  %v4080_v8 = vmax.f32 %v4034_v28, 0.0 }
 0xc93   :  { %5323 = vmatpush.bf16.msra.mxu3 %v7466_v50  ;;  %v4095_v13 = vpack.c.bf16 %v4079_v4, %v4063_v56 }
 0xc94   :  { %5297 = vmatpush.bf16.msrb.mxu1 %v7448_v63  ;;  %v4096_v38 = vpack.c.bf16 %v4080_v8, %v4064_v54 }
 0xc95   :  { %5339 = vmatpush.bf16.msra.mxu0 %v7472_v47 }
 0xc96   :  { %5310 = vmatpush.bf16.msra.mxu2 %v7457_v42 }
 0xc97   :  { %5324 = vmatpush.bf16.msra.mxu3 %v7465_v1 }
 0xc98   :  { %5298 = vmatpush.bf16.msrb.mxu1 %v7447_v51 }
 0xc99   :  { %5340 = vmatpush.bf16.msra.mxu0 %v7471_v21 }
 0xc9a   :  { %5311 = vmatpush.bf16.msra.mxu2 %v7456_v9 }
 0xc9b   :  { %5325 = vmatpush.bf16.msra.mxu3 %v7464_v2 }
 0xc9c   :  { %5299 = vmatpush.bf16.msrb.mxu1 %v7446_v58 }
 0xc9d   :  { %5341 = vmatpush.bf16.msra.mxu0 %v7470_v6 }
 0xc9e   :  { %5312 = vmatpush.bf16.msra.mxu2 %v7455_v15 }
 0xc9f   :  { %5326 = vmatpush.bf16.msra.mxu3 %v7463_v23  ;;  %5300 = vmatmul.bf16.vlgmr.msrb.gmra.mxu1 %v4094_v61 }
 0xca0   :  { %5342 = vmatmul.bf16.vlgmr.msra.gmra.mxu0 %v4097_v31 }
 0xca2   :  { %5313 = vmatpush.bf16.msra.mxu2 %v7454_v33 }
 0xca3   :  { %5327 = vmatpush.bf16.msra.mxu3 %v7462_v20 }
 0xca5   :  { %5314 = vmatmul.bf16.vlgmr.msra.gmra.mxu2 %v4095_v13 }
 0xca6   :  { %5328 = vmatmul.bf16.vlgmr.msra.gmra.mxu3 %v4096_v38 }
 0xcdc   :  { %v5133_v24 = vpop.f32.mrf.mxu1 }
 0xcdd   :  { %v5175_v40 = vpop.f32.mrf.mxu0  ;;  %v5134_v55 = vadd.f32 %v5133_v24, %v4355_v57 }
 0xce4   :  { %v5135_v43 = vpop.f32.mrf.mxu1 }
 0xce5   :  { %v5177_v46 = vpop.f32.mrf.mxu0  ;;  %v5136_v50 = vadd.f32 %v5135_v43, %v4355_v57 }
 0xce8   :  { %v5147_v29 = vpop.f32.mrf.mxu2 }
 0xce9   :  { %v5161_v30 = vpop.f32.mrf.mxu3  ;;  %v5148_v34 = vadd.f32 %v5147_v29, %v5134_v55 }
 0xceb   :  { %v5162_v14 = vadd.f32 %v5161_v30, %v5148_v34 }
 0xcec   :  { %v5189_v17 = vpop.f32.mrf.mxu1 }
 0xced   :  { %v5231_v27 = vpop.f32.mrf.mxu0  ;;  %v5176_v63 = vadd.f32 %v5175_v40, %v5162_v14 }
 0xcef   :  { %v5190_v42 = vadd.f32 %v5189_v17, %v5176_v63  ;;  %v5402_v63 = vld [vmem:[%s9768_s8 + $0x10] sm:$0xff] }
 0xcf0   :  { %v5149_v26 = vpop.f32.mrf.mxu2 }
 0xcf1   :  { %v5163_v22 = vpop.f32.mrf.mxu3  ;;  %v5150_v47 = vadd.f32 %v5149_v26, %v5136_v50 }
 0xcf3   :  { %v5164_v3 = vadd.f32 %v5163_v22, %v5150_v47  ;;  %v5401_v47 = vld [vmem:[%s9768_s8 + $0x8] sm:$0xff] }
 0xcf4   :  { %v5191_v39 = vpop.f32.mrf.mxu1 }
 0xcf5   :  { %v5233_v1 = vpop.f32.mrf.mxu0  ;;  %v5178_v60 = vadd.f32 %v5177_v46, %v5164_v3 }
 0xcf7   :  { %v5192_v7 = vadd.f32 %v5191_v39, %v5178_v60 }
 0xcf8   :  { %v5203_v59 = vpop.f32.mrf.mxu2 }
 0xcf9   :  { %v5217_v36 = vpop.f32.mrf.mxu3  ;;  %v5204_v49 = vadd.f32 %v5203_v59, %v5190_v42 }
 0xcfb   :  { %v5218_v21 = vadd.f32 %v5217_v36, %v5204_v49 }
 0xcfc   :  { %v5245_v51 = vpop.f32.mrf.mxu1 }
 0xcfd   :  { %v5232_v35 = vadd.f32 %v5231_v27, %v5218_v21  ;;  %v5287_v12 = vpop.f32.mrf.mxu0 }
 0xcff   :  { %v5246_v52 = vadd.f32 %v5245_v51, %v5232_v35 }
 0xd00   :  { %v5205_v37 = vpop.f32.mrf.mxu2 }
 0xd01   :  { %v5219_v62 = vpop.f32.mrf.mxu3  ;;  %v5206_v2 = vadd.f32 %v5205_v37, %v5192_v7  ;;  %v5400_v37 = vld [vmem:[%s9768_s8] sm:$0xff] }
 0xd03   :  { %v5220_v32 = vadd.f32 %v5219_v62, %v5206_v2 }
 0xd04   :  { %v5247_v58 = vpop.f32.mrf.mxu1 }
 0xd05   :  { %v5234_v6 = vadd.f32 %v5233_v1, %v5220_v32  ;;  %v5289_v18 = vpop.f32.mrf.mxu0 }
 0xd07   :  { %v5248_v23 = vadd.f32 %v5247_v58, %v5234_v6  ;;  %v5394_v58 = vperm.slane %v9719_v48, 1 }
 0xd08   :  { %v5259_v9 = vpop.f32.mrf.mxu2 }
 0xd09   :  { %v5273_v11 = vpop.f32.mrf.mxu3  ;;  %v5260_v5 = vadd.f32 %v5259_v9, %v5246_v52 }
 0xd0b   :  { %v5274_v0 = vadd.f32 %v5273_v11, %v5260_v5  ;;  %v5397_v5 = vperm.slane %v9719_v48, 2  ;;  %v7486_v48 = vld [vmem:[%s9767_s9] ss:$0 sm:$0xff] }
 0xd0d   :  { %v5288_v28 = vadd.f32 %v5287_v12, %v5274_v0 }
 0xd10   :  { %v5261_v10 = vpop.f32.mrf.mxu2 }
 0xd11   :  { %v5275_v15 = vpop.f32.mrf.mxu3  ;;  %v5262_v25 = vadd.f32 %v5261_v10, %v5248_v23 }
 0xd13   :  { %v5276_v45 = vadd.f32 %v5275_v15, %v5262_v25 }
 0xd15   :  { %v5290_v56 = vadd.f32 %v5289_v18, %v5276_v45 }
 0xd1c   :  { %v5301_v16 = vpop.f32.mrf.mxu1 }
 0xd1d   :  { %v5302_v19 = vadd.f32 %v5301_v16, %v5288_v28  ;;  %v5343_v4 = vpop.f32.mrf.mxu0 }
 0xd24   :  { %v5303_v8 = vpop.f32.mrf.mxu1 }
 0xd25   :  { %v5304_v13 = vadd.f32 %v5303_v8, %v5290_v56  ;;  %v5345_v26 = vpop.f32.mrf.mxu0 }
 0xd28   :  { %v5315_v61 = vpop.f32.mrf.mxu2 }
 0xd29   :  { %v5316_v31 = vadd.f32 %v5315_v61, %v5302_v19  ;;  %v5329_v33 = vpop.f32.mrf.mxu3 }
 0xd2b   :  { %v5330_v20 = vadd.f32 %v5329_v33, %v5316_v31 }
 0xd2d   :  { %v5344_v54 = vadd.f32 %v5343_v4, %v5330_v20 }
 0xd2f   :  { %v5348_v38 = vadd.f32 %v5344_v54, %v9185_v41 }
 0xd30   :  { %v5317_v24 = vpop.f32.mrf.mxu2 }
 0xd31   :  { %v5318_v29 = vadd.f32 %v5317_v24, %v5304_v13  ;;  %v5350_v30 = vsel %vm90_vm1, %v5348_v38, 0.0  ;;  %v5331_v40 = vpop.f32.mrf.mxu3 }
 0xd32   :  { %5351 = vadd.xlane.f32.xlu1 %v5350_v30 }
 0xd33   :  { %v5332_v43 = vadd.f32 %v5331_v40, %v5318_v29 }
 0xd35   :  { %v5346_v22 = vadd.f32 %v5345_v26, %v5332_v43 }
 0xd37   :  { %v5349_v46 = vadd.f32 %v5346_v22, %v9187_v44  ;;  %v5403_v44 = vld [vmem:[%s9768_s8 + $0x18] sm:$0xff] }
 0xd38   :  { %5426 = vmatpush.msra.mxu1 %v5403_v44 }
 0xd39   :  { %v5353_v57 = vsel %vm90_vm1, %v5349_v46, 0.0 }
 0xd3a   :  { %5354 = vadd.xlane.f32.xlu2 %v5353_v57  ;;  %5427 = vmatpush.msra.mxu1 %v5402_v63 }
 0xd3c   :  { %5428 = vmatpush.msra.mxu1 %v5401_v47 }
 0xd3e   :  { %5429 = vmatpush.msra.mxu1 %v5400_v37 }
 0xda5   :  { %v5352_v17 = vpop.xlane.xlu1 %5351 }
 0xda6   :  { %v5356_v55 = vmul.f32 %v5352_v17, %v8042_v53 }
 0xda8   :  { %v5358_v34 = vsub.f32 %v5348_v38, %v5356_v55 }
 0xdaa   :  { %v5360_v59 = vmul.f32 %v5358_v34, %v5358_v34 }
 0xdac   :  { %v5362_v41 = vsel %vm90_vm1, %v5360_v59, 0.0 }
 0xdad   :  { %v5355_v36 = vpop.xlane.xlu2 %5354  ;;  %5363 = vadd.xlane.f32.xlu0 %v5362_v41 }
 0xdae   :  { %v5357_v27 = vmul.f32 %v5355_v36, %v8042_v53 }
 0xdb0   :  { %v5359_v14 = vsub.f32 %v5349_v46, %v5357_v27 }
 0xdb2   :  { %v5361_v39 = vmul.f32 %v5359_v14, %v5359_v14 }
 0xdb4   :  { %v5365_v50 = vsel %vm90_vm1, %v5361_v39, 0.0 }
 0xdb5   :  { %5366 = vadd.xlane.f32.xlu1 %v5365_v50 }
 0xe20   :  { %v5364_v42 = vpop.xlane.xlu0 %5363 }
 0xe21   :  { %v5368_v3 = vmul.f32 %v5364_v42, %v8042_v53 }
 0xe23   :  { %v5370_v62 = vadd.f32 1e-05, %v5368_v3 }
 0xe25   :  { %7629 = vrsqrt.f32 %v5370_v62  ;;  %vm5378_vm4 = vweird.f32 %v5370_v62 }
 0xe28   :  { %v5367_v1 = vpop.xlane.xlu1 %5366 }
 0xe29   :  { %v5369_v49 = vmul.f32 %v5367_v1, %v8042_v53 }
 0xe2b   :  { %v7630_v51 = vpop.eup %7629  ;;  %v5371_v60 = vadd.f32 1e-05, %v5369_v49 }
 0xe2c   :  { %v5373_v21 = vmul.f32 %v7630_v51, %v5370_v62  ;;  %vm5379_vm12 = vweird.f32 %v7630_v51 }
 0xe2d   :  { %7631 = vrsqrt.f32 %v5371_v60  ;;  %vm5380_vm13 = vmor %vm5378_vm4, %vm5379_vm12  ;;  %vm5388_vm15 = vweird.f32 %v5371_v60 }
 0xe2e   :  { %v5374_v7 = vmul.f32 %v7630_v51, %v5373_v21 }
 0xe30   :  { %v5375_v9 = vmul.f32 0.5, %v5374_v7 }
 0xe32   :  { %v5376_v35 = vsub.f32 1.5, %v5375_v9 }
 0xe33   :  { %v7632_v2 = vpop.eup %7631 }
 0xe34   :  { %v5377_v11 = vmul.f32 %v7630_v51, %v5376_v35  ;;  %v5383_v12 = vmul.f32 %v7632_v2, %v5371_v60  ;;  %vm5389_vm14 = vweird.f32 %v7632_v2 }
 0xe35   :  { %vm5390_vm0 = vmor %vm5388_vm15, %vm5389_vm14 }
 0xe36   :  { %v5381_v52 = vsel %vm5380_vm13, %v7630_v51, %v5377_v11  ;;  %v5384_v32 = vmul.f32 %v7632_v2, %v5383_v12 }
 0xe37   :  { %v5392_v53 = vmul.f32 %v5381_v52, %v5358_v34 }
 0xe38   :  { %v5385_v6 = vmul.f32 0.5, %v5384_v32 }
 0xe39   :  { %v5395_v10 = vmul.f32 %v5394_v58, %v5392_v53 }
 0xe3a   :  { %v5386_v0 = vsub.f32 1.5, %v5385_v6 }
 0xe3b   :  { %v5398_v15 = vadd.f32 %v5397_v5, %v5395_v10 }
 0xe3c   :  { %v5387_v18 = vmul.f32 %v7632_v2, %v5386_v0 }
 0xe3d   :  { %7156 = vmatmul.msk.f32.vlgmr.msra.gmra.mxu1 %vm90_vm1, %v5398_v15 }
 0xe3e   :  { %v5391_v16 = vsel %vm5390_vm0, %v7632_v2, %v5387_v18 }
 0xe3f   :  { %v5393_v23 = vmul.f32 %v5391_v16, %v5359_v14 }
 0xe41   :  { %v5396_v25 = vmul.f32 %v5394_v58, %v5393_v23 }
 0xe43   :  { %v5399_v28 = vadd.f32 %v5397_v5, %v5396_v25 }
 0xe45   :  { %7157 = vmatmul.msk.f32.gmra.mxu1 %vm90_vm1, %v5399_v28 }
 0xeba   :  { %v5431_v19 = vpop.f32.mrf.mxu1 }
 0xebb   :  { %v5432_v61 = vadd.f32 %v7486_v48, %v5431_v19 }
 0xebd   :  { %5437 = vst.msk [vmem:[%s9769_s10] sm:$0xff] %vm380_vm5, %v5432_v61 }
 0xec2   :  { %v5434_v45 = vpop.f32.mrf.mxu1 }
 0xec3   :  { %v5435_v31 = vadd.f32 %v7486_v48, %v5434_v45 }
 0xec5   :  { %5438 = vst.msk [vmem:[%s9769_s10 + $0x8] sm:$0xff] %vm380_vm5, %v5435_v31 }

</bundles_post_ra>
